<compile_context>
chip_gen: v6e
topology: v6e:2x2x1
jax: 0.10.0
libtpu: 0.0.40
codegen_flags: <defaults>
</compile_context>

<pallas_src>
import jax
import jax.numpy as jnp
from jax import lax
from jax.experimental import pallas as pl
from jax.experimental.pallas import tpu as pltpu


def lstm_tagger_kernel(x_ref, wih_ref, whh_ref, b_ref, wtag_ref, btag_ref,
                       out_ref, gx_ref):
    # Per batch tile (Bt sequences on the lane axis):
    #   x_ref    : (T, Bt)     time-major scalar inputs (input_dim == 1)
    #   wih_ref  : (4H, 1)     W_ih column (g-gate rows pre-scaled by 2)
    #   whh_ref  : (4H, H)     W_hh (g-gate rows pre-scaled by 2)
    #   b_ref    : (4H, 1)     b_ih + b_hh column (g-gate rows pre-scaled by 2)
    #   wtag_ref : (O, H)      hidden2tag weight
    #   btag_ref : (O, 1)
    #   out_ref  : (O, Bt)     log-softmax tag scores (transposed)
    #   gx_ref   : (T*4H, Bt)  VMEM scratch: input+bias gate contribution
    T, _ = x_ref.shape
    G, H = whh_ref.shape  # G = 4H

    wih = wih_ref[...]   # (4H, 1)
    bias = b_ref[...]    # (4H, 1)
    whh = whh_ref[...]   # (4H, H)  loop-invariant matmul LHS

    # ---- Precompute gx[t] = W_ih * x_t + b for every step (pure VPU work,
    # kept off the serial h->h chain; scratch-backed to bound vreg pressure).
    @pl.loop(0, T)
    def _(t):
        xt = x_ref[pl.ds(t, 1), :]                          # (1, Bt)
        row = pl.multiple_of(t * G, G)
        gx_ref[pl.ds(row, G), :] = wih * xt + bias          # (4H, Bt)

    # ---- Serial recurrence.  Gates live on sublanes 0:H, H:2H, 2H:3H, 3H:4H
    # (vreg-aligned slices), batch on the lanes -> gate math is pure VPU.
    def step(t, carry):
        h, c = carry                                        # (H, Bt) each
        row = pl.multiple_of(t * G, G)
        g = gx_ref[pl.ds(row, G), :] + jnp.dot(
            whh, h, preferred_element_type=jnp.float32)     # (4H, Bt)
        sg = jax.nn.sigmoid(g)                              # single EUP pass
        i_g = sg[0 * H:1 * H, :]
        f_g = sg[1 * H:2 * H, :]
        g_g = 2.0 * sg[2 * H:3 * H, :] - 1.0                # tanh(z)=2*sig(2z)-1
        o_g = sg[3 * H:4 * H, :]
        c_new = f_g * c + i_g * g_g
        h_new = o_g * jnp.tanh(c_new)
        return h_new, c_new

    h0 = jnp.zeros((H, x_ref.shape[1]), jnp.float32)
    c0 = jnp.zeros((H, x_ref.shape[1]), jnp.float32)
    h, _ = lax.fori_loop(0, T, step, (h0, c0), unroll=min(T, 8))

    # ---- hidden2tag + numerically stable log_softmax (reduction over O,
    # a single small XLU reduce per tile).  Output block is lane-dense.
    tag = jnp.dot(wtag_ref[...], h,
                  preferred_element_type=jnp.float32) + btag_ref[...]  # (O, Bt)
    m = jnp.max(tag, axis=0, keepdims=True)
    z = tag - m
    out_ref[...] = z - jnp.log(jnp.sum(jnp.exp(z), axis=0, keepdims=True))


def lstm_tagger_forward(x_batch, wih, whh, b, wtag, btag, *, batch_tile=128):
    """x_batch: (B, T) scalar inputs (input_dim = 1). Returns (B, output_dim).

    Each row of x_batch is processed exactly like LSTMTagger.forward on one
    sequence; batching amortizes launch overhead and fills MXU lanes.
    All weight-layout conversion (transposes, tanh-fusion gate scaling)
    happens here on the host and is fused away by XLA.
    """
    B, T = x_batch.shape
    G, H = whh.shape                  # G = 4H
    O = wtag.shape[0]
    assert wih.shape == (G, 1), "input_dim must be 1 (matches the module)"

    # Pad the batch to a multiple of the tile; padded rows are zeros and are
    # sliced off the result (harmless extra work, keeps blocks lane-dense).
    num_tiles = pl.cdiv(B, batch_tile)
    b_pad = num_tiles * batch_tile
    if b_pad != B:
        x_batch = jnp.pad(x_batch, ((0, b_pad - B), (0, 0)))

    # tanh fusion: scale the candidate-gate (g) rows by 2 so the kernel only
    # needs sigmoid; tanh(z) is recovered as 2*sigmoid(2z) - 1 in-kernel.
    gate_scale = jnp.concatenate([
        jnp.ones((2 * H, 1), jnp.float32),
        jnp.full((H, 1), 2.0, jnp.float32),
        jnp.ones((H, 1), jnp.float32)], axis=0)                  # (4H, 1)

    x_tm = x_batch.T.astype(jnp.float32)                         # (T, B_pad)
    wih_col = wih.reshape(G, 1).astype(jnp.float32) * gate_scale  # (4H, 1)
    whh_s = whh.astype(jnp.float32) * gate_scale                  # (4H, H)
    b_col = b.reshape(G, 1).astype(jnp.float32) * gate_scale      # (4H, 1)
    wtag_f = wtag.astype(jnp.float32)                             # (O, H)
    btag_col = btag.reshape(O, 1).astype(jnp.float32)             # (O, 1)

    out_t = pl.pallas_call(
        lstm_tagger_kernel,
        out_shape=jax.ShapeDtypeStruct((O, b_pad), jnp.float32),
        grid_spec=pltpu.PrefetchScalarGridSpec(
            num_scalar_prefetch=0,
            grid=(num_tiles,),
            in_specs=[
                pl.BlockSpec((T, batch_tile), lambda i: (0, i)),  # x tile
                pl.BlockSpec((G, 1), lambda i: (0, 0)),           # W_ih (resident)
                pl.BlockSpec((G, H), lambda i: (0, 0)),           # W_hh (resident)
                pl.BlockSpec((G, 1), lambda i: (0, 0)),           # bias (resident)
                pl.BlockSpec((O, H), lambda i: (0, 0)),           # W_tag (resident)
                pl.BlockSpec((O, 1), lambda i: (0, 0)),           # b_tag (resident)
            ],
            out_specs=pl.BlockSpec((O, batch_tile), lambda i: (0, i)),
            scratch_shapes=[pltpu.VMEM((T * G, batch_tile), jnp.float32)],
        ),
        compiler_params=pltpu.CompilerParams(
            dimension_semantics=("parallel",)),   # shards tiles across v7x's 2 TCs
    )(x_tm, wih_col, whh_s, b_col, wtag_f, btag_col)

    return out_t.T[:B]                                            # (B, O)


def reference_forward(x_batch, wih, whh, b, wtag, btag):
    """Pure-JAX batched reference matching nn.LSTM + Linear + log_softmax
    applied independently to every sequence (row of x_batch)."""
    B, T = x_batch.shape
    H = whh.shape[1]
    b_row = b.reshape(1, -1)
    h = jnp.zeros((B, H), jnp.float32)
    c = jnp.zeros((B, H), jnp.float32)
    for t in range(T):
        g = x_batch[:, t:t + 1] @ wih.T + h @ whh.T + b_row
        i_g = jax.nn.sigmoid(g[:, 0:H])
        f_g = jax.nn.sigmoid(g[:, H:2 * H])
        g_g = jnp.tanh(g[:, 2 * H:3 * H])
        o_g = jax.nn.sigmoid(g[:, 3 * H:4 * H])
        c = f_g * c + i_g * g_g
        h = o_g * jnp.tanh(c)
    tag = h @ wtag.T + btag.reshape(1, -1)
    return jax.nn.log_softmax(tag, axis=1)


if __name__ == "__main__":
    input_dim, hidden_dim, output_dim = 1, 32, 8
    seq_len, batch = 8, 256          # 2 batch tiles of 128 -> exercises the grid

    key = jax.random.PRNGKey(0)
    keys = jax.random.split(key, 7)
    k = hidden_dim ** -0.5           # PyTorch LSTM/Linear default init range

    wih = jax.random.uniform(keys[0], (4 * hidden_dim, input_dim),
                             jnp.float32, -k, k)
    whh = jax.random.uniform(keys[1], (4 * hidden_dim, hidden_dim),
                             jnp.float32, -k, k)
    b_ih = jax.random.uniform(keys[2], (4 * hidden_dim,), jnp.float32, -k, k)
    b_hh = jax.random.uniform(keys[3], (4 * hidden_dim,), jnp.float32, -k, k)
    b = b_ih + b_hh
    wtag = jax.random.uniform(keys[4], (output_dim, hidden_dim),
                              jnp.float32, -k, k)
    btag = jax.random.uniform(keys[5], (output_dim,), jnp.float32, -k, k)

    # The module feeds a python list of scalar "diff" values per sequence;
    # here: `batch` independent sequences of `seq_len` deterministic scalars.
    inputs = jax.random.normal(keys[6], (batch, seq_len), jnp.float32)

    out = lstm_tagger_forward(inputs, wih, whh, b, wtag, btag, batch_tile=128)
    out = jax.block_until_ready(out)

    ref = reference_forward(inputs, wih, whh, b, wtag, btag)

    assert out.shape == (batch, output_dim)
    # Tolerance slightly relaxed vs 1e-5: tanh is computed as 2*sigmoid(2x)-1
    # in-kernel, which differs from native tanh by a few ulp per step.
    assert jnp.allclose(out, ref, atol=1e-4, rtol=1e-4), \
        float(jnp.max(jnp.abs(out - ref)))

    print("KERNEL_OK")
</pallas_src>

<mosaic_0001>
module attributes {stable_mosaic.version = 11 : i64} {
  func.func @lstm_tagger_kernel(%arg0: i32, %arg1: memref<8x128xf32, #tpu.memory_space<vmem>>, %arg2: memref<128x1xf32, #tpu.memory_space<vmem>>, %arg3: memref<128x32xf32, #tpu.memory_space<vmem>>, %arg4: memref<128x1xf32, #tpu.memory_space<vmem>>, %arg5: memref<8x32xf32, #tpu.memory_space<vmem>>, %arg6: memref<8x1xf32, #tpu.memory_space<vmem>>, %arg7: memref<8x128xf32, #tpu.memory_space<vmem>>, %arg8: memref<1024x128xf32, #tpu.memory_space<vmem>>) attributes {dimension_semantics = [#tpu.dimension_semantics<parallel>], iteration_bounds = array<i64: 2>, scalar_prefetch = 0 : i64, scratch_operands = 1 : i64, tpu.core_type = #tpu.core_type<tc>, window_params = [{transform_indices = @transform_0, window_bounds = array<i64: 8, 128>}, {pipeline_mode = #tpu.pipeline_mode<synchronous>, transform_indices = @transform_1, window_bounds = array<i64: 128, 1>}, {pipeline_mode = #tpu.pipeline_mode<synchronous>, transform_indices = @transform_2, window_bounds = array<i64: 128, 32>}, {pipeline_mode = #tpu.pipeline_mode<synchronous>, transform_indices = @transform_3, window_bounds = array<i64: 128, 1>}, {pipeline_mode = #tpu.pipeline_mode<synchronous>, transform_indices = @transform_4, window_bounds = array<i64: 8, 32>}, {pipeline_mode = #tpu.pipeline_mode<synchronous>, transform_indices = @transform_5, window_bounds = array<i64: 8, 1>}, {transform_indices = @transform_6, window_bounds = array<i64: 8, 128>}]} {
    %c0 = arith.constant 0 : index
    %c0_0 = arith.constant 0 : index
    %0 = vector.load %arg2[%c0, %c0_0] : memref<128x1xf32, #tpu.memory_space<vmem>>, vector<128x1xf32>
    %c0_1 = arith.constant 0 : index
    %c0_2 = arith.constant 0 : index
    %1 = vector.load %arg4[%c0_1, %c0_2] : memref<128x1xf32, #tpu.memory_space<vmem>>, vector<128x1xf32>
    %c0_3 = arith.constant 0 : index
    %c0_4 = arith.constant 0 : index
    %2 = vector.load %arg3[%c0_3, %c0_4] : memref<128x32xf32, #tpu.memory_space<vmem>>, vector<128x32xf32>
    %c0_i32 = arith.constant 0 : i32
    %c8_i32 = arith.constant 8 : i32
    %3 = arith.addi %c0_i32, %c8_i32 : i32
    %c1_i32 = arith.constant 1 : i32
    scf.for %arg9 = %c0_i32 to %3 step %c1_i32  : i32 {
      %c1_i32_66 = arith.constant 1 : i32
      %214 = arith.muli %arg9, %c1_i32_66 : i32
      %c0_i32_67 = arith.constant 0 : i32
      %215 = arith.addi %c0_i32_67, %214 : i32
      %216 = arith.index_cast %215 : i32 to index
      %c0_68 = arith.constant 0 : index
      %217 = vector.load %arg1[%216, %c0_68] : memref<8x128xf32, #tpu.memory_space<vmem>>, vector<1x128xf32>
      %c128_i32_69 = arith.constant 128 : i32
      %218 = arith.muli %215, %c128_i32_69 : i32
      %219 = tpu.assume_multiple %218, 128 : i32
      %220 = vector.broadcast %0 : vector<128x1xf32> to vector<128x128xf32>
      %221 = vector.broadcast %217 : vector<1x128xf32> to vector<128x128xf32>
      %222 = arith.mulf %220, %221 : vector<128x128xf32>
      %223 = vector.broadcast %1 : vector<128x1xf32> to vector<128x128xf32>
      %224 = arith.addf %222, %223 : vector<128x128xf32>
      %225 = arith.index_cast %219 : i32 to index
      %c0_70 = arith.constant 0 : index
      %226 = vector.load %arg8[%225, %c0_70] : memref<1024x128xf32, #tpu.memory_space<vmem>>, vector<128x128xf32>
      tpu.vector_store %arg8[%225, %c0_70], %224 {strides = array<i32>} : memref<1024x128xf32, #tpu.memory_space<vmem>>, vector<128x128xf32>,
    }
    %c8_i32_5 = arith.constant 8 : i32
    %cst = arith.constant 0.000000e+00 : f32
    %4 = vector.broadcast %cst : f32 to vector<32x128xf32>
    %cst_6 = arith.constant 0.000000e+00 : f32
    %5 = vector.broadcast %cst_6 : f32 to vector<32x128xf32>
    %c0_i32_7 = arith.constant 0 : i32
    %c128_i32 = arith.constant 128 : i32
    %6 = arith.muli %c0_i32_7, %c128_i32 : i32
    %7 = tpu.assume_multiple %6, 128 : i32
    %8 = arith.index_cast %7 : i32 to index
    %c0_8 = arith.constant 0 : index
    %9 = vector.load %arg8[%8, %c0_8] : memref<1024x128xf32, #tpu.memory_space<vmem>>, vector<128x128xf32>
    %cst_9 = arith.constant dense<0.000000e+00> : vector<128x128xf32>
    %10 = tpu.matmul %2, %4, %cst_9 {dimension_numbers = #tpu.dot_dimension_numbers<[1], [0], [0], [1], [0, 0, 1, 1], [], []>} : vector<128x32xf32>, vector<32x128xf32>, vector<128x128xf32> -> vector<128x128xf32>
    %11 = arith.addf %9, %10 : vector<128x128xf32>
    %12 = arith.negf %11 : vector<128x128xf32>
    %13 = math.exp %12 : vector<128x128xf32>
    %cst_10 = arith.constant 1.000000e+00 : f32
    %14 = vector.broadcast %cst_10 : f32 to vector<128x128xf32>
    %15 = arith.addf %14, %13 : vector<128x128xf32>
    %16 = arith.divf %14, %15 : vector<128x128xf32>
    %17 = vector.extract_strided_slice %16 {offsets = [0, 0], sizes = [32, 128], strides = [1, 1]} : vector<128x128xf32> to vector<32x128xf32>
    %18 = vector.extract_strided_slice %16 {offsets = [32, 0], sizes = [32, 128], strides = [1, 1]} : vector<128x128xf32> to vector<32x128xf32>
    %19 = vector.extract_strided_slice %16 {offsets = [64, 0], sizes = [32, 128], strides = [1, 1]} : vector<128x128xf32> to vector<32x128xf32>
    %cst_11 = arith.constant 2.000000e+00 : f32
    %20 = vector.broadcast %cst_11 : f32 to vector<32x128xf32>
    %21 = arith.mulf %20, %19 : vector<32x128xf32>
    %cst_12 = arith.constant 1.000000e+00 : f32
    %22 = vector.broadcast %cst_12 : f32 to vector<32x128xf32>
    %23 = arith.subf %21, %22 : vector<32x128xf32>
    %24 = vector.extract_strided_slice %16 {offsets = [96, 0], sizes = [32, 128], strides = [1, 1]} : vector<128x128xf32> to vector<32x128xf32>
    %25 = arith.mulf %18, %5 : vector<32x128xf32>
    %26 = arith.mulf %17, %23 : vector<32x128xf32>
    %27 = arith.addf %25, %26 : vector<32x128xf32>
    %28 = math.tanh %27 : vector<32x128xf32>
    %29 = arith.mulf %24, %28 : vector<32x128xf32>
    %c1_i32_13 = arith.constant 1 : i32
    %c128_i32_14 = arith.constant 128 : i32
    %30 = arith.muli %c1_i32_13, %c128_i32_14 : i32
    %31 = tpu.assume_multiple %30, 128 : i32
    %32 = arith.index_cast %31 : i32 to index
    %c0_15 = arith.constant 0 : index
    %33 = vector.load %arg8[%32, %c0_15] : memref<1024x128xf32, #tpu.memory_space<vmem>>, vector<128x128xf32>
    %cst_16 = arith.constant dense<0.000000e+00> : vector<128x128xf32>
    %34 = tpu.matmul %2, %29, %cst_16 {dimension_numbers = #tpu.dot_dimension_numbers<[1], [0], [0], [1], [0, 0, 1, 1], [], []>} : vector<128x32xf32>, vector<32x128xf32>, vector<128x128xf32> -> vector<128x128xf32>
    %35 = arith.addf %33, %34 : vector<128x128xf32>
    %36 = arith.negf %35 : vector<128x128xf32>
    %37 = math.exp %36 : vector<128x128xf32>
    %cst_17 = arith.constant 1.000000e+00 : f32
    %38 = vector.broadcast %cst_17 : f32 to vector<128x128xf32>
    %39 = arith.addf %38, %37 : vector<128x128xf32>
    %40 = arith.divf %38, %39 : vector<128x128xf32>
    %41 = vector.extract_strided_slice %40 {offsets = [0, 0], sizes = [32, 128], strides = [1, 1]} : vector<128x128xf32> to vector<32x128xf32>
    %42 = vector.extract_strided_slice %40 {offsets = [32, 0], sizes = [32, 128], strides = [1, 1]} : vector<128x128xf32> to vector<32x128xf32>
    %43 = vector.extract_strided_slice %40 {offsets = [64, 0], sizes = [32, 128], strides = [1, 1]} : vector<128x128xf32> to vector<32x128xf32>
    %cst_18 = arith.constant 2.000000e+00 : f32
    %44 = vector.broadcast %cst_18 : f32 to vector<32x128xf32>
    %45 = arith.mulf %44, %43 : vector<32x128xf32>
    %cst_19 = arith.constant 1.000000e+00 : f32
    %46 = vector.broadcast %cst_19 : f32 to vector<32x128xf32>
    %47 = arith.subf %45, %46 : vector<32x128xf32>
    %48 = vector.extract_strided_slice %40 {offsets = [96, 0], sizes = [32, 128], strides = [1, 1]} : vector<128x128xf32> to vector<32x128xf32>
    %49 = arith.mulf %42, %27 : vector<32x128xf32>
    %50 = arith.mulf %41, %47 : vector<32x128xf32>
    %51 = arith.addf %49, %50 : vector<32x128xf32>
    %52 = math.tanh %51 : vector<32x128xf32>
    %53 = arith.mulf %48, %52 : vector<32x128xf32>
    %c2_i32 = arith.constant 2 : i32
    %c128_i32_20 = arith.constant 128 : i32
    %54 = arith.muli %c2_i32, %c128_i32_20 : i32
    %55 = tpu.assume_multiple %54, 128 : i32
    %56 = arith.index_cast %55 : i32 to index
    %c0_21 = arith.constant 0 : index
    %57 = vector.load %arg8[%56, %c0_21] : memref<1024x128xf32, #tpu.memory_space<vmem>>, vector<128x128xf32>
    %cst_22 = arith.constant dense<0.000000e+00> : vector<128x128xf32>
    %58 = tpu.matmul %2, %53, %cst_22 {dimension_numbers = #tpu.dot_dimension_numbers<[1], [0], [0], [1], [0, 0, 1, 1], [], []>} : vector<128x32xf32>, vector<32x128xf32>, vector<128x128xf32> -> vector<128x128xf32>
    %59 = arith.addf %57, %58 : vector<128x128xf32>
    %60 = arith.negf %59 : vector<128x128xf32>
    %61 = math.exp %60 : vector<128x128xf32>
    %cst_23 = arith.constant 1.000000e+00 : f32
    %62 = vector.broadcast %cst_23 : f32 to vector<128x128xf32>
    %63 = arith.addf %62, %61 : vector<128x128xf32>
    %64 = arith.divf %62, %63 : vector<128x128xf32>
    %65 = vector.extract_strided_slice %64 {offsets = [0, 0], sizes = [32, 128], strides = [1, 1]} : vector<128x128xf32> to vector<32x128xf32>
    %66 = vector.extract_strided_slice %64 {offsets = [32, 0], sizes = [32, 128], strides = [1, 1]} : vector<128x128xf32> to vector<32x128xf32>
    %67 = vector.extract_strided_slice %64 {offsets = [64, 0], sizes = [32, 128], strides = [1, 1]} : vector<128x128xf32> to vector<32x128xf32>
    %cst_24 = arith.constant 2.000000e+00 : f32
    %68 = vector.broadcast %cst_24 : f32 to vector<32x128xf32>
    %69 = arith.mulf %68, %67 : vector<32x128xf32>
    %cst_25 = arith.constant 1.000000e+00 : f32
    %70 = vector.broadcast %cst_25 : f32 to vector<32x128xf32>
    %71 = arith.subf %69, %70 : vector<32x128xf32>
    %72 = vector.extract_strided_slice %64 {offsets = [96, 0], sizes = [32, 128], strides = [1, 1]} : vector<128x128xf32> to vector<32x128xf32>
    %73 = arith.mulf %66, %51 : vector<32x128xf32>
    %74 = arith.mulf %65, %71 : vector<32x128xf32>
    %75 = arith.addf %73, %74 : vector<32x128xf32>
    %76 = math.tanh %75 : vector<32x128xf32>
    %77 = arith.mulf %72, %76 : vector<32x128xf32>
    %c3_i32 = arith.constant 3 : i32
    %c128_i32_26 = arith.constant 128 : i32
    %78 = arith.muli %c3_i32, %c128_i32_26 : i32
    %79 = tpu.assume_multiple %78, 128 : i32
    %80 = arith.index_cast %79 : i32 to index
    %c0_27 = arith.constant 0 : index
    %81 = vector.load %arg8[%80, %c0_27] : memref<1024x128xf32, #tpu.memory_space<vmem>>, vector<128x128xf32>
    %cst_28 = arith.constant dense<0.000000e+00> : vector<128x128xf32>
    %82 = tpu.matmul %2, %77, %cst_28 {dimension_numbers = #tpu.dot_dimension_numbers<[1], [0], [0], [1], [0, 0, 1, 1], [], []>} : vector<128x32xf32>, vector<32x128xf32>, vector<128x128xf32> -> vector<128x128xf32>
    %83 = arith.addf %81, %82 : vector<128x128xf32>
    %84 = arith.negf %83 : vector<128x128xf32>
    %85 = math.exp %84 : vector<128x128xf32>
    %cst_29 = arith.constant 1.000000e+00 : f32
    %86 = vector.broadcast %cst_29 : f32 to vector<128x128xf32>
    %87 = arith.addf %86, %85 : vector<128x128xf32>
    %88 = arith.divf %86, %87 : vector<128x128xf32>
    %89 = vector.extract_strided_slice %88 {offsets = [0, 0], sizes = [32, 128], strides = [1, 1]} : vector<128x128xf32> to vector<32x128xf32>
    %90 = vector.extract_strided_slice %88 {offsets = [32, 0], sizes = [32, 128], strides = [1, 1]} : vector<128x128xf32> to vector<32x128xf32>
    %91 = vector.extract_strided_slice %88 {offsets = [64, 0], sizes = [32, 128], strides = [1, 1]} : vector<128x128xf32> to vector<32x128xf32>
    %cst_30 = arith.constant 2.000000e+00 : f32
    %92 = vector.broadcast %cst_30 : f32 to vector<32x128xf32>
    %93 = arith.mulf %92, %91 : vector<32x128xf32>
    %cst_31 = arith.constant 1.000000e+00 : f32
    %94 = vector.broadcast %cst_31 : f32 to vector<32x128xf32>
    %95 = arith.subf %93, %94 : vector<32x128xf32>
    %96 = vector.extract_strided_slice %88 {offsets = [96, 0], sizes = [32, 128], strides = [1, 1]} : vector<128x128xf32> to vector<32x128xf32>
    %97 = arith.mulf %90, %75 : vector<32x128xf32>
    %98 = arith.mulf %89, %95 : vector<32x128xf32>
    %99 = arith.addf %97, %98 : vector<32x128xf32>
    %100 = math.tanh %99 : vector<32x128xf32>
    %101 = arith.mulf %96, %100 : vector<32x128xf32>
    %c4_i32 = arith.constant 4 : i32
    %c128_i32_32 = arith.constant 128 : i32
    %102 = arith.muli %c4_i32, %c128_i32_32 : i32
    %103 = tpu.assume_multiple %102, 128 : i32
    %104 = arith.index_cast %103 : i32 to index
    %c0_33 = arith.constant 0 : index
    %105 = vector.load %arg8[%104, %c0_33] : memref<1024x128xf32, #tpu.memory_space<vmem>>, vector<128x128xf32>
    %cst_34 = arith.constant dense<0.000000e+00> : vector<128x128xf32>
    %106 = tpu.matmul %2, %101, %cst_34 {dimension_numbers = #tpu.dot_dimension_numbers<[1], [0], [0], [1], [0, 0, 1, 1], [], []>} : vector<128x32xf32>, vector<32x128xf32>, vector<128x128xf32> -> vector<128x128xf32>
    %107 = arith.addf %105, %106 : vector<128x128xf32>
    %108 = arith.negf %107 : vector<128x128xf32>
    %109 = math.exp %108 : vector<128x128xf32>
    %cst_35 = arith.constant 1.000000e+00 : f32
    %110 = vector.broadcast %cst_35 : f32 to vector<128x128xf32>
    %111 = arith.addf %110, %109 : vector<128x128xf32>
    %112 = arith.divf %110, %111 : vector<128x128xf32>
    %113 = vector.extract_strided_slice %112 {offsets = [0, 0], sizes = [32, 128], strides = [1, 1]} : vector<128x128xf32> to vector<32x128xf32>
    %114 = vector.extract_strided_slice %112 {offsets = [32, 0], sizes = [32, 128], strides = [1, 1]} : vector<128x128xf32> to vector<32x128xf32>
    %115 = vector.extract_strided_slice %112 {offsets = [64, 0], sizes = [32, 128], strides = [1, 1]} : vector<128x128xf32> to vector<32x128xf32>
    %cst_36 = arith.constant 2.000000e+00 : f32
    %116 = vector.broadcast %cst_36 : f32 to vector<32x128xf32>
    %117 = arith.mulf %116, %115 : vector<32x128xf32>
    %cst_37 = arith.constant 1.000000e+00 : f32
    %118 = vector.broadcast %cst_37 : f32 to vector<32x128xf32>
    %119 = arith.subf %117, %118 : vector<32x128xf32>
    %120 = vector.extract_strided_slice %112 {offsets = [96, 0], sizes = [32, 128], strides = [1, 1]} : vector<128x128xf32> to vector<32x128xf32>
    %121 = arith.mulf %114, %99 : vector<32x128xf32>
    %122 = arith.mulf %113, %119 : vector<32x128xf32>
    %123 = arith.addf %121, %122 : vector<32x128xf32>
    %124 = math.tanh %123 : vector<32x128xf32>
    %125 = arith.mulf %120, %124 : vector<32x128xf32>
    %c5_i32 = arith.constant 5 : i32
    %c128_i32_38 = arith.constant 128 : i32
    %126 = arith.muli %c5_i32, %c128_i32_38 : i32
    %127 = tpu.assume_multiple %126, 128 : i32
    %128 = arith.index_cast %127 : i32 to index
    %c0_39 = arith.constant 0 : index
    %129 = vector.load %arg8[%128, %c0_39] : memref<1024x128xf32, #tpu.memory_space<vmem>>, vector<128x128xf32>
    %cst_40 = arith.constant dense<0.000000e+00> : vector<128x128xf32>
    %130 = tpu.matmul %2, %125, %cst_40 {dimension_numbers = #tpu.dot_dimension_numbers<[1], [0], [0], [1], [0, 0, 1, 1], [], []>} : vector<128x32xf32>, vector<32x128xf32>, vector<128x128xf32> -> vector<128x128xf32>
    %131 = arith.addf %129, %130 : vector<128x128xf32>
    %132 = arith.negf %131 : vector<128x128xf32>
    %133 = math.exp %132 : vector<128x128xf32>
    %cst_41 = arith.constant 1.000000e+00 : f32
    %134 = vector.broadcast %cst_41 : f32 to vector<128x128xf32>
    %135 = arith.addf %134, %133 : vector<128x128xf32>
    %136 = arith.divf %134, %135 : vector<128x128xf32>
    %137 = vector.extract_strided_slice %136 {offsets = [0, 0], sizes = [32, 128], strides = [1, 1]} : vector<128x128xf32> to vector<32x128xf32>
    %138 = vector.extract_strided_slice %136 {offsets = [32, 0], sizes = [32, 128], strides = [1, 1]} : vector<128x128xf32> to vector<32x128xf32>
    %139 = vector.extract_strided_slice %136 {offsets = [64, 0], sizes = [32, 128], strides = [1, 1]} : vector<128x128xf32> to vector<32x128xf32>
    %cst_42 = arith.constant 2.000000e+00 : f32
    %140 = vector.broadcast %cst_42 : f32 to vector<32x128xf32>
    %141 = arith.mulf %140, %139 : vector<32x128xf32>
    %cst_43 = arith.constant 1.000000e+00 : f32
    %142 = vector.broadcast %cst_43 : f32 to vector<32x128xf32>
    %143 = arith.subf %141, %142 : vector<32x128xf32>
    %144 = vector.extract_strided_slice %136 {offsets = [96, 0], sizes = [32, 128], strides = [1, 1]} : vector<128x128xf32> to vector<32x128xf32>
    %145 = arith.mulf %138, %123 : vector<32x128xf32>
    %146 = arith.mulf %137, %143 : vector<32x128xf32>
    %147 = arith.addf %145, %146 : vector<32x128xf32>
    %148 = math.tanh %147 : vector<32x128xf32>
    %149 = arith.mulf %144, %148 : vector<32x128xf32>
    %c6_i32 = arith.constant 6 : i32
    %c128_i32_44 = arith.constant 128 : i32
    %150 = arith.muli %c6_i32, %c128_i32_44 : i32
    %151 = tpu.assume_multiple %150, 128 : i32
    %152 = arith.index_cast %151 : i32 to index
    %c0_45 = arith.constant 0 : index
    %153 = vector.load %arg8[%152, %c0_45] : memref<1024x128xf32, #tpu.memory_space<vmem>>, vector<128x128xf32>
    %cst_46 = arith.constant dense<0.000000e+00> : vector<128x128xf32>
    %154 = tpu.matmul %2, %149, %cst_46 {dimension_numbers = #tpu.dot_dimension_numbers<[1], [0], [0], [1], [0, 0, 1, 1], [], []>} : vector<128x32xf32>, vector<32x128xf32>, vector<128x128xf32> -> vector<128x128xf32>
    %155 = arith.addf %153, %154 : vector<128x128xf32>
    %156 = arith.negf %155 : vector<128x128xf32>
    %157 = math.exp %156 : vector<128x128xf32>
    %cst_47 = arith.constant 1.000000e+00 : f32
    %158 = vector.broadcast %cst_47 : f32 to vector<128x128xf32>
    %159 = arith.addf %158, %157 : vector<128x128xf32>
    %160 = arith.divf %158, %159 : vector<128x128xf32>
    %161 = vector.extract_strided_slice %160 {offsets = [0, 0], sizes = [32, 128], strides = [1, 1]} : vector<128x128xf32> to vector<32x128xf32>
    %162 = vector.extract_strided_slice %160 {offsets = [32, 0], sizes = [32, 128], strides = [1, 1]} : vector<128x128xf32> to vector<32x128xf32>
    %163 = vector.extract_strided_slice %160 {offsets = [64, 0], sizes = [32, 128], strides = [1, 1]} : vector<128x128xf32> to vector<32x128xf32>
    %cst_48 = arith.constant 2.000000e+00 : f32
    %164 = vector.broadcast %cst_48 : f32 to vector<32x128xf32>
    %165 = arith.mulf %164, %163 : vector<32x128xf32>
    %cst_49 = arith.constant 1.000000e+00 : f32
    %166 = vector.broadcast %cst_49 : f32 to vector<32x128xf32>
    %167 = arith.subf %165, %166 : vector<32x128xf32>
    %168 = vector.extract_strided_slice %160 {offsets = [96, 0], sizes = [32, 128], strides = [1, 1]} : vector<128x128xf32> to vector<32x128xf32>
    %169 = arith.mulf %162, %147 : vector<32x128xf32>
    %170 = arith.mulf %161, %167 : vector<32x128xf32>
    %171 = arith.addf %169, %170 : vector<32x128xf32>
    %172 = math.tanh %171 : vector<32x128xf32>
    %173 = arith.mulf %168, %172 : vector<32x128xf32>
    %c7_i32 = arith.constant 7 : i32
    %c128_i32_50 = arith.constant 128 : i32
    %174 = arith.muli %c7_i32, %c128_i32_50 : i32
    %175 = tpu.assume_multiple %174, 128 : i32
    %176 = arith.index_cast %175 : i32 to index
    %c0_51 = arith.constant 0 : index
    %177 = vector.load %arg8[%176, %c0_51] : memref<1024x128xf32, #tpu.memory_space<vmem>>, vector<128x128xf32>
    %cst_52 = arith.constant dense<0.000000e+00> : vector<128x128xf32>
    %178 = tpu.matmul %2, %173, %cst_52 {dimension_numbers = #tpu.dot_dimension_numbers<[1], [0], [0], [1], [0, 0, 1, 1], [], []>} : vector<128x32xf32>, vector<32x128xf32>, vector<128x128xf32> -> vector<128x128xf32>
    %179 = arith.addf %177, %178 : vector<128x128xf32>
    %180 = arith.negf %179 : vector<128x128xf32>
    %181 = math.exp %180 : vector<128x128xf32>
    %cst_53 = arith.constant 1.000000e+00 : f32
    %182 = vector.broadcast %cst_53 : f32 to vector<128x128xf32>
    %183 = arith.addf %182, %181 : vector<128x128xf32>
    %184 = arith.divf %182, %183 : vector<128x128xf32>
    %185 = vector.extract_strided_slice %184 {offsets = [0, 0], sizes = [32, 128], strides = [1, 1]} : vector<128x128xf32> to vector<32x128xf32>
    %186 = vector.extract_strided_slice %184 {offsets = [32, 0], sizes = [32, 128], strides = [1, 1]} : vector<128x128xf32> to vector<32x128xf32>
    %187 = vector.extract_strided_slice %184 {offsets = [64, 0], sizes = [32, 128], strides = [1, 1]} : vector<128x128xf32> to vector<32x128xf32>
    %cst_54 = arith.constant 2.000000e+00 : f32
    %188 = vector.broadcast %cst_54 : f32 to vector<32x128xf32>
    %189 = arith.mulf %188, %187 : vector<32x128xf32>
    %cst_55 = arith.constant 1.000000e+00 : f32
    %190 = vector.broadcast %cst_55 : f32 to vector<32x128xf32>
    %191 = arith.subf %189, %190 : vector<32x128xf32>
    %192 = vector.extract_strided_slice %184 {offsets = [96, 0], sizes = [32, 128], strides = [1, 1]} : vector<128x128xf32> to vector<32x128xf32>
    %193 = arith.mulf %186, %171 : vector<32x128xf32>
    %194 = arith.mulf %185, %191 : vector<32x128xf32>
    %195 = arith.addf %193, %194 : vector<32x128xf32>
    %196 = math.tanh %195 : vector<32x128xf32>
    %197 = arith.mulf %192, %196 : vector<32x128xf32>
    %c8_i32_56 = arith.constant 8 : i32
    %c0_57 = arith.constant 0 : index
    %c0_58 = arith.constant 0 : index
    %198 = vector.load %arg5[%c0_57, %c0_58] : memref<8x32xf32, #tpu.memory_space<vmem>>, vector<8x32xf32>
    %cst_59 = arith.constant dense<0.000000e+00> : vector<8x128xf32>
    %199 = tpu.matmul %198, %197, %cst_59 {dimension_numbers = #tpu.dot_dimension_numbers<[1], [0], [0], [1], [0, 0, 1, 1], [], []>} : vector<8x32xf32>, vector<32x128xf32>, vector<8x128xf32> -> vector<8x128xf32>
    %c0_60 = arith.constant 0 : index
    %c0_61 = arith.constant 0 : index
    %200 = vector.load %arg6[%c0_60, %c0_61] : memref<8x1xf32, #tpu.memory_space<vmem>>, vector<8x1xf32>
    %201 = vector.broadcast %200 : vector<8x1xf32> to vector<8x128xf32>
    %202 = arith.addf %199, %201 : vector<8x128xf32>
    %cst_62 = arith.constant dense<0xFF800000> : vector<128xf32>
    %203 = vector.multi_reduction <maximumf>, %202, %cst_62 [0] : vector<8x128xf32> to vector<128xf32>
    %204 = vector.shape_cast %203 : vector<128xf32> to vector<1x128xf32>
    %205 = vector.broadcast %204 : vector<1x128xf32> to vector<8x128xf32>
    %206 = arith.subf %202, %205 : vector<8x128xf32>
    %207 = math.exp %206 : vector<8x128xf32>
    %cst_63 = arith.constant dense<0.000000e+00> : vector<128xf32>
    %208 = vector.multi_reduction <add>, %207, %cst_63 [0] : vector<8x128xf32> to vector<128xf32>
    %209 = vector.shape_cast %208 : vector<128xf32> to vector<1x128xf32>
    %210 = math.log %209 : vector<1x128xf32>
    %211 = vector.broadcast %210 : vector<1x128xf32> to vector<8x128xf32>
    %212 = arith.subf %206, %211 : vector<8x128xf32>
    %c0_64 = arith.constant 0 : index
    %c0_65 = arith.constant 0 : index
    %213 = vector.load %arg7[%c0_64, %c0_65] : memref<8x128xf32, #tpu.memory_space<vmem>>, vector<8x128xf32>
    tpu.vector_store %arg7[%c0_64, %c0_65], %212 {strides = array<i32>} : memref<8x128xf32, #tpu.memory_space<vmem>>, vector<8x128xf32>,
    return
  }
  func.func @transform_0(%arg0: i32) -> (i32, i32) {
    %c0_i32 = arith.constant 0 : i32
    %c0_i32_0 = arith.constant 0 : i32
    return %c0_i32, %arg0 : i32, i32
  }
  func.func @transform_1(%arg0: i32) -> (i32, i32) {
    %c0_i32 = arith.constant 0 : i32
    %c0_i32_0 = arith.constant 0 : i32
    %c0_i32_1 = arith.constant 0 : i32
    return %c0_i32, %c0_i32_0 : i32, i32
  }
  func.func @transform_2(%arg0: i32) -> (i32, i32) {
    %c0_i32 = arith.constant 0 : i32
    %c0_i32_0 = arith.constant 0 : i32
    %c0_i32_1 = arith.constant 0 : i32
    return %c0_i32, %c0_i32_0 : i32, i32
  }
  func.func @transform_3(%arg0: i32) -> (i32, i32) {
    %c0_i32 = arith.constant 0 : i32
    %c0_i32_0 = arith.constant 0 : i32
    %c0_i32_1 = arith.constant 0 : i32
    return %c0_i32, %c0_i32_0 : i32, i32
  }
  func.func @transform_4(%arg0: i32) -> (i32, i32) {
    %c0_i32 = arith.constant 0 : i32
    %c0_i32_0 = arith.constant 0 : i32
    %c0_i32_1 = arith.constant 0 : i32
    return %c0_i32, %c0_i32_0 : i32, i32
  }
  func.func @transform_5(%arg0: i32) -> (i32, i32) {
    %c0_i32 = arith.constant 0 : i32
    %c0_i32_0 = arith.constant 0 : i32
    %c0_i32_1 = arith.constant 0 : i32
    return %c0_i32, %c0_i32_0 : i32, i32
  }
  func.func @transform_6(%arg0: i32) -> (i32, i32) {
    %c0_i32 = arith.constant 0 : i32
    %c0_i32_0 = arith.constant 0 : i32
    return %c0_i32, %arg0 : i32, i32
  }
}

</mosaic_0001>

<bundles_post_ra>
// kernel: tpu_custom_call.1
= control target key start
LH: loop header
LB: loop body
LE: loop exit
PB: predicated region body
PF: predicated region fallthrough
CT: control target
= control target key end

     0   :  { %11 = vsyncpa [#allocation4], 0  ;;  %s5412_s0 = inlined_call_operand.vmem [shape: f32[8,256], index: 0, kind: input, shape index: {}]   ;;  %s5413_s1 = inlined_call_operand.vmem [shape: f32[128,1], index: 1, kind: input, shape index: {}]   ;;  %s5414_s2 = inlined_call_operand.vmem [shape: f32[128,32], index: 2, kind: input, shape index: {}]   ;;  %s5415_s3 = inlined_call_operand.vmem [shape: f32[128,1], index: 3, kind: input, shape index: {}]   ;;  %s5416_s4 = inlined_call_operand.vmem [shape: f32[8,32], index: 4, kind: input, shape index: {}]   ;;  %s5417_s5 = inlined_call_operand.vmem [shape: f32[8,1], index: 5, kind: input, shape index: {}]   ;;  %s5418_s6 = inlined_call_operand.hbm [shape: f32[8,256], index: 6, kind: output, shape index: {}]  }
   0x1   :  { %13 = vsyncpa [#allocation4 + $0x1], 0  ;;  %s4629_s21 = smov 0   ;;  %s4631_s22 = smov 0  }
   0x2   :  { %s4633_s23 = smov 0   ;;  %s4635_s24 = smov 0  }
   0x3 LB: > { %s4650_s25 = sadd.s32 4294967295, %s4583_s24   ;;  %s3161_s26 = sadd.s32 4294967294, %s4583_s24   ;;  %s4583_s24 = sphi %s4635_s24, %s5450_s24   ;;  %s4579_s23 = sphi %s4633_s23, %s5449_s23   ;;  %s4575_s22 = sphi %s4631_s22, %s5448_s22   ;;  %s4571_s21 = sphi %s4629_s21, %s5447_s21  }
   0x4   : > { %s4654_s27 = sadd.s32 1, %s4583_s24   ;;  %s157_s28 = sadd.s32 1, %s4579_s23 }
   0x5   : > { %s154_s29 = ssub.s32 %s4583_s24, %s4654_s27  ;;  %p167_p0 = scmp.ne.s32.totalorder %s4579_s23, %s4575_s22 }
   0x6   : > { %p155_p1 = scmp.eq.s32.totalorder %s154_s29, 0  ;;  %p168_p2 = scmp.eq.s32.totalorder %s4650_s25, 1 }
   0x7   : > { %p173_p3 = scmp.ne.s32.totalorder %s4575_s22, %s4571_s21  ;;  %p174_p4 = scmp.eq.s32.totalorder %s3161_s26, 1 }
   0x8   : > { %s4665_s30 = scalar_select %p155_p1, %s4579_s23, %s157_s28  }
   0x9   : > { %p4667_p5 = por %p168_p2, %p167_p0  ;;  %p4671_p6 = por %p174_p4, %p173_p3 }
   0xa   : > { %p3164_p7 = scmp.ge.s32.totalorder %s4583_s24, 1  ;;  %p214_p8 = scmp.lt.s32.totalorder %s4583_s24, 3 }
   0xc   : > { %p215_p9 = pnand %p3164_p7, %p214_p8 }
   0xe   : > { %218 = sbr.rel (%p215_p9) target bundleno = 2702 (0xa8e), region = 44 }
  0x13   : > { %s240_s9 = sand.u32 1, %s4575_s22   ;;  %p243_p10 = scmp.lt.s32.totalorder %s4650_s25, 1  ;;  %v4682_v0 = vld [vmem:[%s5413_s1] sm:$0xff]  ;;  %v4687_v1 = vld [vmem:[%s5413_s1 + $0x8] sm:$0xff]  ;;  %v4692_v2 = vld [vmem:[%s5413_s1 + $0x10] sm:$0xff] }
  0x14   : > { %5421 = vst [vmem:[#allocation6_spill] sm:$0xff] %v4682_v0  ;;  %5422 = vst [vmem:[#allocation7_spill] sm:$0xff] %v4687_v1  ;;  %s4696_s16 = sshll.u32 %s240_s9, 3  ;;  %v4701_v3 = vld [vmem:[%s5413_s1 + $0x18] sm:$0xff]  ;;  %v4706_v4 = vld [vmem:[%s5413_s1 + $0x20] sm:$0xff]  ;;  %s4930_s13 = smov 0  }
  0x15   : > { %5423 = vst [vmem:[#allocation8_spill] sm:$0xff] %v4692_v2  ;;  %5424 = vst [vmem:[#allocation9_spill] sm:$0xff] %v4701_v3  ;;  %v4711_v5 = vld [vmem:[%s5413_s1 + $0x28] sm:$0xff]  ;;  %v4716_v6 = vld [vmem:[%s5413_s1 + $0x30] sm:$0xff]  ;;  %s244_s15 = scalar_select %p243_p10, %s4650_s25, 1 }
  0x16   : > { %5425 = vst [vmem:[#allocation10_spill] sm:$0xff] %v4706_v4  ;;  %5426 = vst [vmem:[#allocation11_spill] sm:$0xff] %v4711_v5  ;;  %v4721_v7 = vld [vmem:[%s5413_s1 + $0x38] sm:$0xff]  ;;  %v4726_v8 = vld [vmem:[%s5413_s1 + $0x40] sm:$0xff] }
  0x17   : > { %5427 = vst [vmem:[#allocation12_spill] sm:$0xff] %v4716_v6  ;;  %5428 = vst [vmem:[#allocation13_spill] sm:$0xff] %v4721_v7  ;;  %v4732_v9 = vld [vmem:[%s5413_s1 + $0x48] sm:$0xff]  ;;  %v4737_v10 = vld [vmem:[%s5413_s1 + $0x50] sm:$0xff]  ;;  %s3166_s17 = sshll.u32 %s244_s15, 3  ;;  %s242_s15 = scalar_lea.vmem [#allocation3], %s4696_s16 }
  0x18   : > { %5429 = vst [vmem:[#allocation14_spill] sm:$0xff] %v4726_v8  ;;  %5430 = vst [vmem:[#allocation15_spill] sm:$0xff] %v4732_v9  ;;  %v4742_v11 = vld [vmem:[%s5413_s1 + $0x58] sm:$0xff]  ;;  %v4747_v12 = vld [vmem:[%s5413_s1 + $0x60] sm:$0xff]  ;;  %s4777_s12 = scalar_lea.vmem %s5412_s0, %s3166_s17 }
  0x19   : > { %5431 = vst [vmem:[#allocation16_spill] sm:$0xff] %v4737_v10  ;;  %5432 = vst [vmem:[#allocation17_spill] sm:$0xff] %v4742_v11  ;;  %v4752_v13 = vld [vmem:[%s5413_s1 + $0x68] sm:$0xff]  ;;  %v4757_v14 = vld [vmem:[%s5413_s1 + $0x70] sm:$0xff] }
  0x1a   : > { %5433 = vst [vmem:[#allocation18_spill] sm:$0xff] %v4747_v12  ;;  %v4762_v15 = vld [vmem:[%s5413_s1 + $0x78] sm:$0xff]  ;;  %v4767_v16 = vld [vmem:[%s5415_s3] sm:$0xff]  ;;  %v4772_v17 = vld [vmem:[%s5415_s3 + $0x8] sm:$0xff] }
  0x1b   : > { %v4782_v18 = vld [vmem:[%s5415_s3 + $0x10] sm:$0xff]  ;;  %v4787_v19 = vld [vmem:[%s5415_s3 + $0x18] sm:$0xff]  ;;  %v4792_v20 = vld [vmem:[%s5415_s3 + $0x20] sm:$0xff] }
  0x1c   : > { %v4797_v21 = vld [vmem:[%s5415_s3 + $0x28] sm:$0xff]  ;;  %v4802_v22 = vld [vmem:[%s5415_s3 + $0x30] sm:$0xff]  ;;  %v4807_v23 = vld [vmem:[%s5415_s3 + $0x38] sm:$0xff] }
  0x1d   : > { %v4812_v24 = vld [vmem:[%s5415_s3 + $0x40] sm:$0xff]  ;;  %v4817_v25 = vld [vmem:[%s5415_s3 + $0x48] sm:$0xff]  ;;  %v4822_v26 = vld [vmem:[%s5415_s3 + $0x50] sm:$0xff] }
  0x1e   : > { %v4827_v27 = vld [vmem:[%s5415_s3 + $0x58] sm:$0xff]  ;;  %v4832_v28 = vld [vmem:[%s5415_s3 + $0x60] sm:$0xff]  ;;  %v4837_v29 = vld [vmem:[%s5415_s3 + $0x68] sm:$0xff] }
  0x1f   : > { %v4842_v30 = vld [vmem:[%s5415_s3 + $0x70] sm:$0xff]  ;;  %v4847_v31 = vld [vmem:[%s5415_s3 + $0x78] sm:$0xff]  ;;  %v4852_v32 = vld [vmem:[%s5414_s2] sm:$0xff] }
  0x20   : > { %v4857_v33 = vld [vmem:[%s5414_s2 + $0x8] sm:$0xff]  ;;  %v4862_v34 = vld [vmem:[%s5414_s2 + $0x10] sm:$0xff]  ;;  %v4867_v35 = vld [vmem:[%s5414_s2 + $0x18] sm:$0xff] }
  0x21   : > { %v4872_v36 = vld [vmem:[%s5414_s2 + $0x20] sm:$0xff]  ;;  %v4877_v37 = vld [vmem:[%s5414_s2 + $0x28] sm:$0xff]  ;;  %v4882_v38 = vld [vmem:[%s5414_s2 + $0x30] sm:$0xff] }
  0x22   : > { %v4887_v39 = vld [vmem:[%s5414_s2 + $0x38] sm:$0xff]  ;;  %v4892_v40 = vld [vmem:[%s5414_s2 + $0x40] sm:$0xff]  ;;  %v4897_v41 = vld [vmem:[%s5414_s2 + $0x48] sm:$0xff] }
  0x23   : > { %v4902_v42 = vld [vmem:[%s5414_s2 + $0x50] sm:$0xff]  ;;  %v4907_v43 = vld [vmem:[%s5414_s2 + $0x58] sm:$0xff]  ;;  %v4912_v44 = vld [vmem:[%s5414_s2 + $0x60] sm:$0xff] }
  0x24   : > { %v4917_v45 = vld [vmem:[%s5414_s2 + $0x68] sm:$0xff]  ;;  %v4922_v46 = vld [vmem:[%s5414_s2 + $0x70] sm:$0xff]  ;;  %v4927_v47 = vld [vmem:[%s5414_s2 + $0x78] sm:$0xff] }
  0x25 LB: >> { %v4589_v48 = vmov 0   ;;  %v5434_v2 = vld [vmem:[#allocation8_spill] sm:$0xff]  ;;  %v5435_v0 = vld [vmem:[#allocation6_spill] sm:$0xff]  ;;  %v5436_v3 = vld [vmem:[#allocation9_spill] sm:$0xff]  ;;  %s301_s14 = scalar_lea.vmem %s4777_s12, %s4587_s13  ;;  %s3167_s18 = sshll.u32 %s4587_s13, 7  ;;  %s4587_s13 = sphi %s4930_s13, %s300_s13  }
  0x26   : >> { %3937 = vset.pattern.permute.xlu1 %v4589_v48  ;;  %3936 = vset.pattern.permute.xlu0 %v4589_v48  ;;  %v5437_v1 = vld [vmem:[#allocation7_spill] sm:$0xff]  ;;  %v5439_v4 = vld [vmem:[#allocation10_spill] sm:$0xff]  ;;  %v5440_v7 = vld [vmem:[#allocation13_spill] sm:$0xff]  ;;  %s4970_s19 = scalar_lea.vmem [#allocation2], %s3167_s18  ;;  %s300_s13 = sadd.s32 1, %s4587_s13  }
  0x27   : >> { %316 = vperm.xlu1 %3937, %v5434_v2   ;;  %306 = vperm.xlu0 %3936, %v5435_v0   ;;  %v5438_v5 = vld [vmem:[#allocation11_spill] sm:$0xff]  ;;  %v5441_v6 = vld [vmem:[#allocation12_spill] sm:$0xff]  ;;  %v5443_v8 = vld [vmem:[#allocation14_spill] sm:$0xff]  ;;  %p297_p11 = scmp.ge.s32.totalorder %s300_s13, 8  }
  0x28   : >> { %v5442_v9 = vld [vmem:[#allocation15_spill] sm:$0xff]  ;;  %v5444_v11 = vld [vmem:[#allocation17_spill] sm:$0xff]  ;;  %v5445_v10 = vld [vmem:[#allocation16_spill] sm:$0xff]  ;;  %vm533_vm0 = vcmask (%p297_p11), 261120   ;;  %vm4591_vm1 = vmmov (%p297_p11), 0   ;;  %s3459_s17 = sshll.u32 (%p297_p11), %s4650_s25, 7 }
  0x29   : >> { %v5446_v12 = vld [vmem:[#allocation18_spill] sm:$0xff]  ;;  %v3168_v63 = vld [vmem:[%s301_s14] ss:$0 sm:$0xff]  ;;  %3626 = vmatprep.mubr.msk.f32.mxu0 (%p297_p11), %vm533_vm0, %v4852_v32  ;;  %3658 = vmatprep.mubr.msk.f32.mxu1 (%p297_p11), %vm533_vm0, %v4852_v32  ;;  %s3094_s29 = sshll.u32 (%p297_p11), %s242_s15, 4  ;;  %s3092_s13 = scalar_lea.hbm (%p297_p11), %s5418_s6, %s3459_s17  ;;  %s3095_s29 = int_to_ptr.vmem [resolvable:$true] %s3094_s29 }
  0x2a   : > { %s3081_s14 = scalar_lea.sflag (%p297_p11), [#allocation4], %s240_s9  ;;  %s4519_s18 = scalar_lea.vmem (%p297_p11), %s3095_s29, 128 }
  0x2b   : >> { %321 = vperm.xlu1 %3937, %v5436_v3   ;;  %311 = vperm.xlu0 %3936, %v5437_v1   ;;  %p4520_p12 = scmp.ne.s32.totalorder (%p297_p11), %s3095_s29, %s4519_s18 }
  0x2d   : > { %p4521_p13 = pnand (%p297_p11), %p4520_p12, %p4667_p5 }
  0x2f   : >> { %331 = vperm.xlu1 %3937, %v5438_v5   ;;  %326 = vperm.xlu0 %3936, %v5439_v4   ;;  %p4522_p0 = pneg (%p297_p11), %p4521_p13 }
  0x33   : >> { %341 = vperm.xlu1 %3937, %v5440_v7   ;;  %336 = vperm.xlu0 %3936, %v5441_v6  }
  0x37   : >> { %351 = vperm.xlu1 %3937, %v5442_v9   ;;  %346 = vperm.xlu0 %3936, %v5443_v8  }
  0x3b   : >> { %361 = vperm.xlu1 %3937, %v5444_v11   ;;  %356 = vperm.xlu0 %3936, %v5445_v10  }
  0x3f   : >> { %371 = vperm.xlu1 %3937, %v4752_v13   ;;  %366 = vperm.xlu0 %3936, %v5446_v12  }
  0x43   : >> { %381 = vperm.xlu1 %3937, %v4762_v15   ;;  %376 = vperm.xlu0 %3936, %v4757_v14  }
  0x47   : >> { %411 = vperm.xlu1 %3937, %v4772_v17   ;;  %406 = vperm.xlu0 %3936, %v4767_v16  }
  0x4b   : >> { %421 = vperm.xlu1 %3937, %v4787_v19   ;;  %416 = vperm.xlu0 %3936, %v4782_v18  }
  0x4f   : >> { %431 = vperm.xlu1 %3937, %v4797_v21   ;;  %426 = vperm.xlu0 %3936, %v4792_v20  }
  0x53   : >> { %441 = vperm.xlu1 %3937, %v4807_v23   ;;  %436 = vperm.xlu0 %3936, %v4802_v22  }
  0x57   : >> { %451 = vperm.xlu1 %3937, %v4817_v25   ;;  %446 = vperm.xlu0 %3936, %v4812_v24  }
  0x5b   : >> { %461 = vperm.xlu1 %3937, %v4827_v27   ;;  %456 = vperm.xlu0 %3936, %v4822_v26  }
  0x5f   : >> { %471 = vperm.xlu1 %3937, %v4837_v29   ;;  %466 = vperm.xlu0 %3936, %v4832_v28  }
  0x63   : >> { %481 = vperm.xlu1 %3937, %v4847_v31   ;;  %476 = vperm.xlu0 %3936, %v4842_v30  }
  0xa2   : >> { %v317_v49 = vpop.permute.xlu1 %316  ;;  %v307_v50 = vpop.permute.xlu0 %306 }
  0xa3   : >> { %v388_v1 = vmul.f32 %v3168_v63, %v307_v50  ;;  %v390_v7 = vmul.f32 %v3168_v63, %v317_v49 }
  0xa6   : >> { %v322_v51 = vpop.permute.xlu1 %321  ;;  %v312_v52 = vpop.permute.xlu0 %311 }
  0xa7   : >> { %v389_v2 = vmul.f32 %v3168_v63, %v312_v52  ;;  %v391_v8 = vmul.f32 %v3168_v63, %v322_v51 }
  0xaa   : >> { %v332_v53 = vpop.permute.xlu1 %331  ;;  %v327_v54 = vpop.permute.xlu0 %326 }
  0xab   : >> { %v393_v11 = vmul.f32 %v3168_v63, %v332_v53  ;;  %v392_v12 = vmul.f32 %v3168_v63, %v327_v54 }
  0xae   : >> { %v342_v55 = vpop.permute.xlu1 %341  ;;  %v337_v56 = vpop.permute.xlu0 %336 }
  0xaf   : >> { %v395_v49 = vmul.f32 %v3168_v63, %v342_v55  ;;  %v394_v51 = vmul.f32 %v3168_v63, %v337_v56 }
  0xb2   : >> { %v352_v57 = vpop.permute.xlu1 %351  ;;  %v347_v58 = vpop.permute.xlu0 %346 }
  0xb6   : >> { %v362_v59 = vpop.permute.xlu1 %361  ;;  %v357_v60 = vpop.permute.xlu0 %356 }
  0xb7   : >> { %v399_v55 = vmul.f32 %v3168_v63, %v362_v59  ;;  %v398_v56 = vmul.f32 %v3168_v63, %v357_v60 }
  0xba   : >> { %v372_v61 = vpop.permute.xlu1 %371  ;;  %v367_v62 = vpop.permute.xlu0 %366 }
  0xbe   : >> { %v382_v48 = vpop.permute.xlu1 %381  ;;  %v377_v0 = vpop.permute.xlu0 %376 }
  0xbf   : >> { %v403_v59 = vmul.f32 %v3168_v63, %v382_v48  ;;  %v402_v60 = vmul.f32 %v3168_v63, %v377_v0 }
  0xc2   : >> { %v412_v3 = vpop.permute.xlu1 %411  ;;  %v407_v4 = vpop.permute.xlu0 %406 }
  0xc3   : >> { %v485_v5 = vadd.f32 %v412_v3, %v389_v2  ;;  %v484_v6 = vadd.f32 %v407_v4, %v388_v1 }
  0xc5   : >> { %502 = vst [vmem:[%s4970_s19 + $0x8] sm:$0xff] %v485_v5  ;;  %501 = vst [vmem:[%s4970_s19] sm:$0xff] %v484_v6 }
  0xc6   : >> { %v422_v9 = vpop.permute.xlu1 %421  ;;  %v417_v10 = vpop.permute.xlu0 %416 }
  0xc7   : >> { %v487_v50 = vadd.f32 %v422_v9, %v391_v8  ;;  %v486_v52 = vadd.f32 %v417_v10, %v390_v7  ;;  %v397_v9 = vmul.f32 %v3168_v63, %v352_v57  ;;  %v396_v10 = vmul.f32 %v3168_v63, %v347_v58 }
  0xc8   : >> { %v401_v57 = vmul.f32 %v3168_v63, %v372_v61  ;;  %v400_v58 = vmul.f32 %v3168_v63, %v367_v62  ;;  %v4590_v61 = vmov (%p297_p11), 0.0  }
  0xc9   : >> { %504 = vst [vmem:[%s4970_s19 + $0x18] sm:$0xff] %v487_v50  ;;  %503 = vst [vmem:[%s4970_s19 + $0x10] sm:$0xff] %v486_v52  ;;  %3624 = vmatprep.subr.mxu0 (%p297_p11), %v4590_v61 }
  0xca   : >> { %v432_v1 = vpop.permute.xlu1 %431  ;;  %v427_v2 = vpop.permute.xlu0 %426  ;;  %3625 = vmatpush3.msra.mxu0 (%p297_p11), %v4590_v61 }
  0xcb   : >> { %v489_v3 = vadd.f32 %v432_v1, %v393_v11  ;;  %v488_v4 = vadd.f32 %v427_v2, %v392_v12  ;;  %3627 = vmatmul.mubr.msk.f32.vlgmr.msra.gmra.mxu0 (%p297_p11), %vm533_vm0, %v4857_v33 }
  0xcc   : > { %3629 = vmatprep.mubr.msk.f32.mxu0 (%p297_p11), %vm533_vm0, %v4862_v34 }
  0xcd   : >> { %506 = vst [vmem:[%s4970_s19 + $0x28] sm:$0xff] %v489_v3  ;;  %505 = vst [vmem:[%s4970_s19 + $0x20] sm:$0xff] %v488_v4 }
  0xce   : >> { %v442_v5 = vpop.permute.xlu1 %441  ;;  %v437_v6 = vpop.permute.xlu0 %436 }
  0xcf   : >> { %v491_v8 = vadd.f32 %v442_v5, %v395_v49  ;;  %v490_v7 = vadd.f32 %v437_v6, %v394_v51  ;;  %3630 = vmatmul.mubr.msk.f32.gmra.mxu0 (%p297_p11), %vm533_vm0, %v4867_v35 }
  0xd0   : > { %3632 = vmatprep.mubr.msk.f32.mxu0 (%p297_p11), %vm533_vm0, %v4872_v36 }
  0xd1   : >> { %508 = vst [vmem:[%s4970_s19 + $0x38] sm:$0xff] %v491_v8  ;;  %507 = vst [vmem:[%s4970_s19 + $0x30] sm:$0xff] %v490_v7 }
  0xd2   : >> { %v452_v53 = vpop.permute.xlu1 %451  ;;  %v447_v54 = vpop.permute.xlu0 %446 }
  0xd3   : >> { %v493_v11 = vadd.f32 %v452_v53, %v397_v9  ;;  %v492_v12 = vadd.f32 %v447_v54, %v396_v10  ;;  %3633 = vmatmul.mubr.msk.f32.gmra.mxu0 (%p297_p11), %vm533_vm0, %v4877_v37 }
  0xd4   : > { %3635 = vmatprep.mubr.msk.f32.mxu0 (%p297_p11), %vm533_vm0, %v4882_v38 }
  0xd5   : >> { %510 = vst [vmem:[%s4970_s19 + $0x48] sm:$0xff] %v493_v11  ;;  %509 = vst [vmem:[%s4970_s19 + $0x40] sm:$0xff] %v492_v12 }
  0xd6   : >> { %v462_v50 = vpop.permute.xlu1 %461  ;;  %v457_v52 = vpop.permute.xlu0 %456 }
  0xd7   : >> { %v495_v1 = vadd.f32 %v462_v50, %v399_v55  ;;  %v494_v2 = vadd.f32 %v457_v52, %v398_v56  ;;  %3636 = vmatmul.mubr.msk.f32.gmra.mxu0 (%p297_p11), %vm533_vm0, %v4887_v39 }
  0xd8   : > { %3638 = vmatprep.mubr.msk.f32.mxu0 (%p297_p11), %vm533_vm0, %v4892_v40 }
  0xd9   : >> { %512 = vst [vmem:[%s4970_s19 + $0x58] sm:$0xff] %v495_v1  ;;  %511 = vst [vmem:[%s4970_s19 + $0x50] sm:$0xff] %v494_v2 }
  0xda   : >> { %v472_v3 = vpop.permute.xlu1 %471  ;;  %v467_v4 = vpop.permute.xlu0 %466 }
  0xdb   : >> { %v497_v49 = vadd.f32 %v472_v3, %v401_v57  ;;  %v496_v51 = vadd.f32 %v467_v4, %v400_v58  ;;  %3639 = vmatmul.mubr.msk.f32.gmra.mxu0 (%p297_p11), %vm533_vm0, %v4897_v41 }
  0xdc   : > { %3641 = vmatprep.mubr.msk.f32.mxu0 (%p297_p11), %vm533_vm0, %v4902_v42 }
  0xdd   : >> { %514 = vst [vmem:[%s4970_s19 + $0x68] sm:$0xff] %v497_v49  ;;  %513 = vst [vmem:[%s4970_s19 + $0x60] sm:$0xff] %v496_v51  ;;  %299 = sbr.rel (!%p297_p11) target bundleno = 37 (0x25), region = 95 }
  0xde   : >> { %v482_v5 = vpop.permute.xlu1 %481  ;;  %v477_v6 = vpop.permute.xlu0 %476 }
  0xdf   : >> { %v499_v8 = vadd.f32 %v482_v5, %v403_v59  ;;  %v498_v7 = vadd.f32 %v477_v6, %v402_v60  ;;  %3642 = vmatmul.mubr.msk.f32.gmra.mxu0 (%p297_p11), %vm533_vm0, %v4907_v43 }
  0xe0   : > { %3644 = vmatprep.mubr.msk.f32.mxu0 (%p297_p11), %vm533_vm0, %v4912_v44 }
  0xe1   : >> { %516 = vst [vmem:[%s4970_s19 + $0x78] sm:$0xff] %v499_v8  ;;  %515 = vst [vmem:[%s4970_s19 + $0x70] sm:$0xff] %v498_v7  ;;  %s4593_s19 = smov (%p297_p11), [#allocation3]  }
  0xe2   : > { %s4523_s25 = sshll.u32 %s4593_s19, 4  ;;  %s4524_s25 = int_to_ptr.vmem [resolvable:$false] %s4523_s25 }
  0xe3   : > { %3645 = vmatmul.mubr.msk.f32.gmra.mxu0 %vm533_vm0, %v4917_v45  ;;  %s4525_s12 = scalar_lea.vmem %s4524_s25, 256  ;;  %p4526_p1 = scmp.lt.s32.totalorder %s3095_s29, %s4524_s25 }
  0xe4   : > { %3647 = vmatprep.mubr.msk.f32.mxu0 %vm533_vm0, %v4922_v46  ;;  %p4527_p2 = scmp.lt.s32.totalorder %s4525_s12, %s4519_s18 }
  0xe6   : > { %p4528_p3 = por %p4527_p2, %p4526_p1 }
  0xe7   : > { %3648 = vmatmul.mubr.msk.f32.gmra.mxu0 %vm533_vm0, %v4927_v47 }
  0xe8   : > { %3690 = vmatprep.mubr.msk.f32.mxu0 %vm533_vm0, %v4852_v32  ;;  %v518_v13 = vld [vmem:[#allocation2 + $0x8] sm:$0xff]  ;;  %v517_v15 = vld [vmem:[#allocation2] sm:$0xff]  ;;  %v520_v16 = vld [vmem:[#allocation2 + $0x18] sm:$0xff]  ;;  %p4529_p4 = pnand %p4528_p3, %p4522_p0 }
  0xe9   : > { %v522_v21 = vld [vmem:[#allocation2 + $0x28] sm:$0xff]  ;;  %v524_v28 = vld [vmem:[#allocation2 + $0x38] sm:$0xff]  ;;  %v521_v31 = vld [vmem:[#allocation2 + $0x20] sm:$0xff] }
  0xea   : > { %v523_v48 = vld [vmem:[#allocation2 + $0x30] sm:$0xff]  ;;  %v526_v10 = vld [vmem:[#allocation2 + $0x48] sm:$0xff]  ;;  %v525_v55 = vld [vmem:[#allocation2 + $0x40] sm:$0xff] }
  0xeb   : > { %v519_v53 = vld [vmem:[#allocation2 + $0x10] sm:$0xff]  ;;  %v528_v2 = vld [vmem:[#allocation2 + $0x58] sm:$0xff] }
  0xec   : > { %v527_v49 = vld [vmem:[#allocation2 + $0x50] sm:$0xff] }
 0x18b   : > { %v3628_v0 = vpop.f32.mrf.mxu0 }
 0x18c   : > { %v728_v18 = vadd.f32 %v3628_v0, %v518_v13 }
 0x18d   : > { %v648_v14 = vpop.f32.mrf.mxu0 }
 0x18e   : > { %v727_v19 = vadd.f32 %v648_v14, %v517_v15  ;;  %v3186_v24 = vmul.f32 -1.442695, %v728_v18  ;;  %v530_v15 = vld [vmem:[#allocation2 + $0x68] sm:$0xff] }
 0x18f   : > { %v3631_v17 = vpop.f32.mrf.mxu0 }
 0x190   : > { %v730_v22 = vadd.f32 %v3631_v17, %v520_v16  ;;  %v3185_v26 = vmul.f32 -1.442695, %v727_v19  ;;  %3939 = vpow2.f32 %v3186_v24  ;;  %v532_v24 = vld [vmem:[#allocation2 + $0x78] sm:$0xff] }
 0x191   : > { %v658_v20 = vpop.f32.mrf.mxu0 }
 0x192   : > { %v3188_v29 = vmul.f32 -1.442695, %v730_v22  ;;  %3941 = vpow2.f32 %v3185_v26  ;;  %v729_v52 = vadd.f32 %v658_v20, %v519_v53 }
 0x193   : > { %v3634_v23 = vpop.f32.mrf.mxu0 }
 0x194   : > { %v732_v25 = vadd.f32 %v3634_v23, %v522_v21  ;;  %3943 = vpow2.f32 %v3188_v29  ;;  %v3187_v6 = vmul.f32 -1.442695, %v729_v52 }
 0x195   : > { %v668_v27 = vpop.f32.mrf.mxu0 }
 0x196   : > { %v3190_v30 = vmul.f32 -1.442695, %v732_v25  ;;  %v731_v54 = vadd.f32 %v668_v27, %v521_v31 }
 0x197   : > { %v3637_v62 = vpop.f32.mrf.mxu0 }
 0x198   : > { %v734_v63 = vadd.f32 %v3637_v62, %v524_v28  ;;  %3945 = vpow2.f32 %v3190_v30  ;;  %v3189_v57 = vmul.f32 -1.442695, %v731_v54  ;;  %v531_v28 = vld [vmem:[#allocation2 + $0x70] sm:$0xff] }
 0x199   : > { %v678_v9 = vpop.f32.mrf.mxu0 }
 0x19a   : > { %v3192_v11 = vmul.f32 -1.442695, %v734_v63  ;;  %v733_v56 = vadd.f32 %v678_v9, %v523_v48 }
 0x19b   : > { %v3640_v12 = vpop.f32.mrf.mxu0 }
 0x19c   : > { %v736_v50 = vadd.f32 %v3640_v12, %v526_v10  ;;  %3947 = vpow2.f32 %v3192_v11  ;;  %v3191_v51 = vmul.f32 -1.442695, %v733_v56  ;;  %v529_v56 = vld [vmem:[#allocation2 + $0x60] sm:$0xff] }
 0x19d   : > { %v688_v1 = vpop.f32.mrf.mxu0  ;;  %v3940_v14 = vpop.eup %3939 }
 0x19e   : > { %v3194_v58 = vmul.f32 -1.442695, %v736_v50  ;;  %v735_v3 = vadd.f32 %v688_v1, %v525_v55  ;;  %v792_v21 = vadd.f32 1.0, %v3940_v14 }
 0x19f   : > { %v3643_v4 = vpop.f32.mrf.mxu0  ;;  %v3942_v17 = vpop.eup %3941 }
 0x1a0   : > { %v3193_v59 = vmul.f32 -1.442695, %v735_v3  ;;  %v738_v60 = vadd.f32 %v3643_v4, %v528_v2  ;;  %3949 = vpow2.f32 %v3194_v58  ;;  %v791_v23 = vadd.f32 1.0, %v3942_v17 }
 0x1a1   : > { %v698_v5 = vpop.f32.mrf.mxu0  ;;  %3951 = vpow2.f32 %v3189_v57  ;;  %v3944_v18 = vpop.eup %3943 }
 0x1a2   : > { %v3196_v8 = vmul.f32 -1.442695, %v738_v60  ;;  %v737_v7 = vadd.f32 %v698_v5, %v527_v49  ;;  %3953 = vpow2.f32 %v3193_v59  ;;  %v794_v25 = vadd.f32 1.0, %v3944_v18 }
 0x1a3   : > { %v3646_v0 = vpop.f32.mrf.mxu0  ;;  %3955 = vpow2.f32 %v3191_v51 }
 0x1a4   : > { %v3195_v13 = vmul.f32 -1.442695, %v737_v7  ;;  %3957 = vpow2.f32 %v3196_v8  ;;  %v740_v22 = vadd.f32 %v3646_v0, %v530_v15 }
 0x1a5   : > { %v708_v16 = vpop.f32.mrf.mxu0  ;;  %3959 = vpow2.f32 %v3187_v6  ;;  %v3946_v20 = vpop.eup %3945 }
 0x1a6   : > { %3961 = vpow2.f32 %v3195_v13  ;;  %v796_v27 = vadd.f32 1.0, %v3946_v20  ;;  %v3198_v30 = vmul.f32 -1.442695, %v740_v22  ;;  %v739_v4 = vadd.f32 %v708_v16, %v529_v56 }
 0x1a7   : > { %v3649_v19 = vpop.f32.mrf.mxu0  ;;  %3963 = vrcp.f32 %v792_v21 }
 0x1a8   : > { %v742_v31 = vadd.f32 %v3649_v19, %v532_v24  ;;  %3965 = vrcp.f32 %v791_v23  ;;  %v3197_v59 = vmul.f32 -1.442695, %v739_v4 }
 0x1a9   : > { %v3948_v26 = vpop.eup %3947  ;;  %v718_v29 = vpop.f32.mrf.mxu0  ;;  %3967 = vrcp.f32 %v794_v25 }
 0x1aa   : > { %v798_v63 = vadd.f32 1.0, %v3948_v26  ;;  %v741_v48 = vadd.f32 %v718_v29, %v531_v28  ;;  %3969 = vrcp.f32 %v796_v27  ;;  %v3200_v54 = vmul.f32 -1.442695, %v742_v31 }
 0x1ab   : > { %3971 = vpow2.f32 %v3198_v30 }
 0x1ac   : > { %v3199_v50 = vmul.f32 -1.442695, %v741_v48 }
 0x1ad   : > { %v3950_v62 = vpop.eup %3949 }
 0x1ae   : > { %v3952_v9 = vpop.eup %3951  ;;  %v800_v10 = vadd.f32 1.0, %v3950_v62 }
 0x1af   : > { %v3954_v53 = vpop.eup %3953  ;;  %v795_v57 = vadd.f32 1.0, %v3952_v9 }
 0x1b0   : > { %v3956_v11 = vpop.eup %3955  ;;  %3973 = vrcp.f32 %v800_v10  ;;  %v799_v12 = vadd.f32 1.0, %v3954_v53 }
 0x1b1   : > { %v3958_v55 = vpop.eup %3957  ;;  %3975 = vrcp.f32 %v798_v63  ;;  %v797_v58 = vadd.f32 1.0, %v3956_v11 }
 0x1b2   : > { %v3960_v52 = vpop.eup %3959  ;;  %3977 = vrcp.f32 %v799_v12  ;;  %v802_v1 = vadd.f32 1.0, %v3958_v55 }
 0x1b3   : > { %v3962_v2 = vpop.eup %3961  ;;  %3979 = vpow2.f32 %v3200_v54  ;;  %v793_v49 = vadd.f32 1.0, %v3960_v52 }
 0x1b4   : > { %3981 = vrcp.f32 %v802_v1  ;;  %v801_v3 = vadd.f32 1.0, %v3962_v2  ;;  %v3964_v51 = vpop.eup %3963 }
 0x1b5   : > { %3983 = vpow2.f32 %v3199_v50  ;;  %v3966_v60 = vpop.eup %3965 }
 0x1b6   : > { %3985 = vrcp.f32 %v801_v3  ;;  %v3968_v5 = vpop.eup %3967 }
 0x1b7   : > { %3987 = vrcp.f32 %v795_v57  ;;  %v3970_v6 = vpop.eup %3969 }
 0x1b8   : > { %3989 = vrcp.f32 %v797_v58  ;;  %v3972_v8 = vpop.eup %3971  ;;  %v848_v30 = vmul.f32 0.0, %v3970_v6 }
 0x1b9   : > { %3991 = vrcp.f32 %v793_v49  ;;  %v804_v24 = vadd.f32 1.0, %v3972_v8 }
 0x1ba   : > { %3993 = vpow2.f32 %v3197_v59 }
 0x1bb   : > { %3995 = vrcp.f32 %v804_v24 }
 0x1bd   : > { %v3974_v7 = vpop.eup %3973 }
 0x1be   : > { %v3976_v0 = vpop.eup %3975  ;;  %v840_v13 = vmul.f32 2.0, %v3974_v7 }
 0x1bf   : > { %v3978_v14 = vpop.eup %3977  ;;  %v850_v62 = vmul.f32 0.0, %v3976_v0  ;;  %v869_v0 = vld [vmem:[#allocation2 + $0x88] sm:$0xff] }
 0x1c0   : > { %v3980_v15 = vpop.eup %3979  ;;  %v3202_v17 = vadd.f32 -1.0, %v840_v13  ;;  %v839_v16 = vmul.f32 2.0, %v3978_v14  ;;  %v868_v14 = vld [vmem:[#allocation2 + $0x80] sm:$0xff] }
 0x1c1   : > { %v3982_v18 = vpop.eup %3981  ;;  %v806_v28 = vadd.f32 1.0, %v3980_v15  ;;  %v871_v15 = vld [vmem:[#allocation2 + $0x98] sm:$0xff] }
 0x1c2   : > { %v3984_v19 = vpop.eup %3983  ;;  %v3201_v20 = vadd.f32 -1.0, %v839_v16  ;;  %v842_v21 = vmul.f32 2.0, %v3982_v18  ;;  %v852_v23 = vmul.f32 %v3964_v51, %v3202_v17 }
 0x1c3   : > { %v3986_v22 = vpop.eup %3985  ;;  %v805_v31 = vadd.f32 1.0, %v3984_v19  ;;  %3997 = vrcp.f32 %v806_v28 }
 0x1c4   : > { %v3988_v25 = vpop.eup %3987  ;;  %v3204_v26 = vadd.f32 -1.0, %v842_v21  ;;  %v841_v27 = vmul.f32 2.0, %v3986_v22  ;;  %v851_v63 = vmul.f32 %v3966_v60, %v3201_v20  ;;  %v5029_v54 = vadd.f32 %v852_v23, %v848_v30  ;;  %v873_v20 = vld [vmem:[#allocation2 + $0xa8] sm:$0xff]  ;;  %v872_v30 = vld [vmem:[#allocation2 + $0xa0] sm:$0xff] }
 0x1c5   : > { %v3990_v29 = vpop.eup %3989  ;;  %v847_v53 = vmul.f32 0.0, %v3988_v25  ;;  %3999 = vrcp.f32 %v805_v31 }
 0x1c6   : > { %v854_v48 = vmul.f32 %v3968_v5, %v3204_v26  ;;  %v3203_v9 = vadd.f32 -1.0, %v841_v27  ;;  %v3992_v10 = vpop.eup %3991  ;;  %v849_v11 = vmul.f32 0.0, %v3990_v29  ;;  %v875_v27 = vld [vmem:[#allocation2 + $0xb8] sm:$0xff] }
 0x1c7   : > { %v3994_v56 = vpop.eup %3993  ;;  %v5033_v50 = vadd.f32 %v851_v63, %v847_v53  ;;  %v874_v63 = vld [vmem:[#allocation2 + $0xb0] sm:$0xff] }
 0x1c8   : > { %v5031_v12 = vadd.f32 %v854_v48, %v850_v62  ;;  %v853_v55 = vmul.f32 %v3992_v10, %v3203_v9  ;;  %v803_v1 = vadd.f32 1.0, %v3994_v56  ;;  %v3996_v2 = vpop.eup %3995  ;;  %v877_v9 = vld [vmem:[#allocation2 + $0xc8] sm:$0xff]  ;;  %v870_v10 = vld [vmem:[#allocation2 + $0x90] sm:$0xff]  ;;  %v876_v56 = vld [vmem:[#allocation2 + $0xc0] sm:$0xff] }
 0x1ca   : > { %v5035_v52 = vadd.f32 %v853_v55, %v849_v11  ;;  %4001 = vtanh.f32 %v5031_v12 }
 0x1cb   : > { %4003 = vtanh.f32 %v5029_v54 }
 0x1cc   : > { %4005 = vtanh.f32 %v5035_v52 }
 0x1cd   : > { %4007 = vtanh.f32 %v5033_v50 }
 0x1ce   : > { %4009 = vrcp.f32 %v803_v1 }
 0x1d0   : > { %v3998_v57 = vpop.eup %3997 }
 0x1d2   : > { %v4000_v58 = vpop.eup %3999 }
 0x1d7   : > { %v4002_v3 = vpop.eup %4001 }
 0x1d8   : > { %v4004_v4 = vpop.eup %4003  ;;  %v866_v49 = vmul.f32 %v4002_v3, %v3998_v57  ;;  %v879_v3 = vld [vmem:[#allocation2 + $0xd8] sm:$0xff] }
 0x1d9   : > { %v4006_v51 = vpop.eup %4005  ;;  %v864_v5 = vmul.f32 %v4004_v4, %v3996_v2 }
 0x1da   : > { %3650 = vmatprep.subr.mxu1 %v866_v49  ;;  %v865_v59 = vmul.f32 %v4006_v51, %v4000_v58  ;;  %v4008_v60 = vpop.eup %4007 }
 0x1db   : > { %3651 = vmatpush3.msra.mxu1 %v866_v49  ;;  %v4010_v6 = vpop.eup %4009 }
 0x1dc   : > { %3652 = vmatprep.subr.mxu1 %v865_v59  ;;  %v863_v8 = vmul.f32 %v4010_v6, %v4008_v60  ;;  %v878_v60 = vld [vmem:[#allocation2 + $0xd0] sm:$0xff] }
 0x1dd   : > { %3653 = vmatpush3.msra.mxu1 %v865_v59 }
 0x1de   : > { %3654 = vmatprep.subr.mxu1 %v864_v5 }
 0x1df   : > { %3655 = vmatpush3.msra.mxu1 %v864_v5 }
 0x1e0   : > { %3656 = vmatprep.subr.mxu1 %v863_v8 }
 0x1e1   : > { %3657 = vmatpush3.msra.mxu1 %v863_v8 }
 0x1e2   : > { %3659 = vmatmul.mubr.msk.f32.vlgmr.msra.gmra.mxu1 %vm533_vm0, %v4857_v33 }
 0x1e3   : > { %3661 = vmatprep.mubr.msk.f32.mxu1 %vm533_vm0, %v4862_v34 }
 0x1e6   : > { %3662 = vmatmul.mubr.msk.f32.gmra.mxu1 %vm533_vm0, %v4867_v35 }
 0x1e7   : > { %3664 = vmatprep.mubr.msk.f32.mxu1 %vm533_vm0, %v4872_v36 }
 0x1ea   : > { %3665 = vmatmul.mubr.msk.f32.gmra.mxu1 %vm533_vm0, %v4877_v37 }
 0x1eb   : > { %3667 = vmatprep.mubr.msk.f32.mxu1 %vm533_vm0, %v4882_v38 }
 0x1ee   : > { %3668 = vmatmul.mubr.msk.f32.gmra.mxu1 %vm533_vm0, %v4887_v39 }
 0x1ef   : > { %3670 = vmatprep.mubr.msk.f32.mxu1 %vm533_vm0, %v4892_v40 }
 0x1f2   : > { %3671 = vmatmul.mubr.msk.f32.gmra.mxu1 %vm533_vm0, %v4897_v41 }
 0x1f3   : > { %3673 = vmatprep.mubr.msk.f32.mxu1 %vm533_vm0, %v4902_v42 }
 0x1f6   : > { %3674 = vmatmul.mubr.msk.f32.gmra.mxu1 %vm533_vm0, %v4907_v43 }
 0x1f7   : > { %3676 = vmatprep.mubr.msk.f32.mxu1 %vm533_vm0, %v4912_v44 }
 0x1fa   : > { %3677 = vmatmul.mubr.msk.f32.gmra.mxu1 %vm533_vm0, %v4917_v45 }
 0x1fb   : > { %3679 = vmatprep.mubr.msk.f32.mxu1 %vm533_vm0, %v4922_v46 }
 0x1fe   : > { %3680 = vmatmul.mubr.msk.f32.gmra.mxu1 %vm533_vm0, %v4927_v47 }
 0x1ff   : > { %3722 = vmatprep.mubr.msk.f32.mxu1 %vm533_vm0, %v4852_v32 }
 0x2a2   : > { %v3660_v7 = vpop.f32.mrf.mxu1 }
 0x2a3   : > { %v1030_v16 = vadd.f32 %v3660_v7, %v869_v0 }
 0x2a4   : > { %v950_v13 = vpop.f32.mrf.mxu1 }
 0x2a5   : > { %v1029_v18 = vadd.f32 %v950_v13, %v868_v14  ;;  %v3222_v23 = vmul.f32 -1.442695, %v1030_v16 }
 0x2a6   : > { %v3663_v17 = vpop.f32.mrf.mxu1 }
 0x2a7   : > { %v1032_v21 = vadd.f32 %v3663_v17, %v871_v15  ;;  %v3221_v25 = vmul.f32 -1.442695, %v1029_v18  ;;  %4011 = vpow2.f32 %v3222_v23  ;;  %v881_v18 = vld [vmem:[#allocation2 + $0xe8] sm:$0xff] }
 0x2a8   : > { %v960_v19 = vpop.f32.mrf.mxu1 }
 0x2a9   : > { %v3224_v28 = vmul.f32 -1.442695, %v1032_v21  ;;  %4013 = vpow2.f32 %v3221_v25  ;;  %v1031_v57 = vadd.f32 %v960_v19, %v870_v10 }
 0x2aa   : > { %v3666_v22 = vpop.f32.mrf.mxu1 }
 0x2ab   : > { %v1034_v24 = vadd.f32 %v3666_v22, %v873_v20  ;;  %4015 = vpow2.f32 %v3224_v28  ;;  %v3223_v0 = vmul.f32 -1.442695, %v1031_v57 }
 0x2ac   : > { %v970_v26 = vpop.f32.mrf.mxu1 }
 0x2ad   : > { %v3226_v29 = vmul.f32 -1.442695, %v1034_v24  ;;  %v1033_v53 = vadd.f32 %v970_v26, %v872_v30 }
 0x2ae   : > { %v3669_v31 = vpop.f32.mrf.mxu1 }
 0x2af   : > { %v1036_v62 = vadd.f32 %v3669_v31, %v875_v27  ;;  %4017 = vpow2.f32 %v3226_v29  ;;  %v3225_v4 = vmul.f32 -1.442695, %v1033_v53  ;;  %v883_v27 = vld [vmem:[#allocation2 + $0xf8] sm:$0xff]  ;;  %v882_v31 = vld [vmem:[#allocation2 + $0xf0] sm:$0xff] }
 0x2b0   : > { %v980_v48 = vpop.f32.mrf.mxu1 }
 0x2b1   : > { %v3228_v11 = vmul.f32 -1.442695, %v1036_v62  ;;  %v1035_v1 = vadd.f32 %v980_v48, %v874_v63 }
 0x2b2   : > { %v3672_v55 = vpop.f32.mrf.mxu1 }
 0x2b3   : > { %v1038_v2 = vadd.f32 %v3672_v55, %v877_v9  ;;  %4019 = vpow2.f32 %v3228_v11  ;;  %v3227_v5 = vmul.f32 -1.442695, %v1035_v1 }
 0x2b4   : > { %v990_v58 = vpop.f32.mrf.mxu1  ;;  %v4012_v16 = vpop.eup %4011 }
 0x2b5   : > { %v3230_v49 = vmul.f32 -1.442695, %v1038_v2  ;;  %v1037_v51 = vadd.f32 %v990_v58, %v876_v56  ;;  %v1094_v24 = vadd.f32 1.0, %v4012_v16 }
 0x2b6   : > { %v3675_v59 = vpop.f32.mrf.mxu1  ;;  %v4014_v20 = vpop.eup %4013 }
 0x2b7   : > { %v3229_v6 = vmul.f32 -1.442695, %v1037_v51  ;;  %v1040_v8 = vadd.f32 %v3675_v59, %v879_v3  ;;  %4021 = vpow2.f32 %v3230_v49  ;;  %v1093_v26 = vadd.f32 1.0, %v4014_v20  ;;  %v880_v3 = vld [vmem:[#allocation2 + $0xe0] sm:$0xff] }
 0x2b8   : > { %v1000_v7 = vpop.f32.mrf.mxu1  ;;  %4023 = vpow2.f32 %v3225_v4  ;;  %v4016_v21 = vpop.eup %4015 }
 0x2b9   : > { %v3232_v13 = vmul.f32 -1.442695, %v1040_v8  ;;  %v1039_v14 = vadd.f32 %v1000_v7, %v878_v60  ;;  %4025 = vpow2.f32 %v3229_v6  ;;  %v1096_v28 = vadd.f32 1.0, %v4016_v21 }
 0x2ba   : > { %v3678_v15 = vpop.f32.mrf.mxu1  ;;  %4027 = vpow2.f32 %v3227_v5 }
 0x2bb   : > { %v3231_v17 = vmul.f32 -1.442695, %v1039_v14  ;;  %4029 = vpow2.f32 %v3232_v13  ;;  %v1042_v25 = vadd.f32 %v3678_v15, %v881_v18 }
 0x2bc   : > { %v1010_v19 = vpop.f32.mrf.mxu1  ;;  %4031 = vpow2.f32 %v3223_v0  ;;  %v4018_v23 = vpop.eup %4017 }
 0x2bd   : > { %4033 = vpow2.f32 %v3231_v17  ;;  %v1098_v30 = vadd.f32 1.0, %v4018_v23  ;;  %v3234_v63 = vmul.f32 -1.442695, %v1042_v25  ;;  %v1041_v8 = vadd.f32 %v1010_v19, %v880_v3 }
 0x2be   : > { %v3681_v22 = vpop.f32.mrf.mxu1  ;;  %4035 = vrcp.f32 %v1094_v24 }
 0x2bf   : > { %v1044_v48 = vadd.f32 %v3681_v22, %v883_v27  ;;  %4037 = vrcp.f32 %v1093_v26  ;;  %v3233_v13 = vmul.f32 -1.442695, %v1041_v8 }
 0x2c0   : > { %v4020_v29 = vpop.eup %4019  ;;  %v1020_v62 = vpop.f32.mrf.mxu1  ;;  %4039 = vrcp.f32 %v1096_v28 }
 0x2c1   : > { %v1100_v10 = vadd.f32 1.0, %v4020_v29  ;;  %v1043_v53 = vadd.f32 %v1020_v62, %v882_v31  ;;  %4041 = vrcp.f32 %v1098_v30  ;;  %v3236_v1 = vmul.f32 -1.442695, %v1044_v48 }
 0x2c2   : > { %4043 = vpow2.f32 %v3234_v63 }
 0x2c3   : > { %v3235_v4 = vmul.f32 -1.442695, %v1043_v53 }
 0x2c4   : > { %v4022_v9 = vpop.eup %4021 }
 0x2c5   : > { %v4024_v11 = vpop.eup %4023  ;;  %v1102_v55 = vadd.f32 1.0, %v4022_v9 }
 0x2c6   : > { %v4026_v56 = vpop.eup %4025  ;;  %v1097_v60 = vadd.f32 1.0, %v4024_v11 }
 0x2c7   : > { %v4028_v2 = vpop.eup %4027  ;;  %4045 = vrcp.f32 %v1102_v55  ;;  %v1101_v57 = vadd.f32 1.0, %v4026_v56 }
 0x2c8   : > { %v4030_v58 = vpop.eup %4029  ;;  %4047 = vrcp.f32 %v1100_v10  ;;  %v1099_v5 = vadd.f32 1.0, %v4028_v2 }
 0x2c9   : > { %v4032_v49 = vpop.eup %4031  ;;  %4049 = vrcp.f32 %v1101_v57  ;;  %v1104_v51 = vadd.f32 1.0, %v4030_v58 }
 0x2ca   : > { %v4034_v59 = vpop.eup %4033  ;;  %4051 = vpow2.f32 %v3236_v1  ;;  %v1095_v7 = vadd.f32 1.0, %v4032_v49 }
 0x2cb   : > { %4053 = vrcp.f32 %v1104_v51  ;;  %v1103_v6 = vadd.f32 1.0, %v4034_v59  ;;  %v4036_v0 = vpop.eup %4035 }
 0x2cc   : > { %4055 = vpow2.f32 %v3235_v4  ;;  %v4038_v14 = vpop.eup %4037 }
 0x2cd   : > { %4057 = vrcp.f32 %v1103_v6  ;;  %v4040_v15 = vpop.eup %4039 }
 0x2ce   : > { %4059 = vrcp.f32 %v1097_v60  ;;  %v4042_v17 = vpop.eup %4041 }
 0x2cf   : > { %4061 = vrcp.f32 %v1099_v5  ;;  %v4044_v16 = vpop.eup %4043  ;;  %v1150_v53 = vmul.f32 %v4042_v17, %v5029_v54 }
 0x2d0   : > { %4063 = vrcp.f32 %v1095_v7  ;;  %v1106_v31 = vadd.f32 1.0, %v4044_v16 }
 0x2d1   : > { %4065 = vpow2.f32 %v3233_v13 }
 0x2d2   : > { %4067 = vrcp.f32 %v1106_v31 }
 0x2d4   : > { %v4046_v18 = vpop.eup %4045 }
 0x2d5   : > { %v4048_v20 = vpop.eup %4047  ;;  %v1142_v21 = vmul.f32 2.0, %v4046_v18 }
 0x2d6   : > { %v4050_v22 = vpop.eup %4049  ;;  %v1152_v56 = vmul.f32 %v4048_v20, %v5031_v12  ;;  %v1171_v20 = vld [vmem:[#allocation2 + $0x108] sm:$0xff] }
 0x2d7   : > { %v4052_v23 = vpop.eup %4051  ;;  %v3238_v24 = vadd.f32 -1.0, %v1142_v21  ;;  %v1141_v19 = vmul.f32 2.0, %v4050_v22  ;;  %v1170_v22 = vld [vmem:[#allocation2 + $0x100] sm:$0xff] }
 0x2d8   : > { %v4054_v25 = vpop.eup %4053  ;;  %v1108_v9 = vadd.f32 1.0, %v4052_v23  ;;  %v1173_v23 = vld [vmem:[#allocation2 + $0x118] sm:$0xff] }
 0x2d9   : > { %v4056_v26 = vpop.eup %4055  ;;  %v3237_v27 = vadd.f32 -1.0, %v1141_v19  ;;  %v1144_v28 = vmul.f32 2.0, %v4054_v25  ;;  %v1154_v30 = vmul.f32 %v4036_v0, %v3238_v24 }
 0x2da   : > { %v4058_v29 = vpop.eup %4057  ;;  %v1107_v11 = vadd.f32 1.0, %v4056_v26  ;;  %4069 = vrcp.f32 %v1108_v9 }
 0x2db   : > { %v4060_v62 = vpop.eup %4059  ;;  %v3240_v63 = vadd.f32 -1.0, %v1144_v28  ;;  %v1143_v48 = vmul.f32 2.0, %v4058_v29  ;;  %v1153_v55 = vmul.f32 %v4038_v14, %v3237_v27  ;;  %v5075_v58 = vadd.f32 %v1154_v30, %v1150_v53  ;;  %v1175_v27 = vld [vmem:[#allocation2 + $0x128] sm:$0xff]  ;;  %v1174_v53 = vld [vmem:[#allocation2 + $0x120] sm:$0xff] }
 0x2dc   : > { %v4062_v10 = vpop.eup %4061  ;;  %v1149_v3 = vmul.f32 %v4060_v62, %v5033_v50  ;;  %4071 = vrcp.f32 %v1107_v11 }
 0x2dd   : > { %v1156_v1 = vmul.f32 %v4040_v15, %v3240_v63  ;;  %v3239_v2 = vadd.f32 -1.0, %v1143_v48  ;;  %v4064_v57 = vpop.eup %4063  ;;  %v1151_v49 = vmul.f32 %v4062_v10, %v5035_v52  ;;  %v1177_v48 = vld [vmem:[#allocation2 + $0x138] sm:$0xff] }
 0x2de   : > { %v4066_v59 = vpop.eup %4065  ;;  %v5081_v54 = vadd.f32 %v1153_v55, %v1149_v3 }
 0x2df   : > { %v5078_v4 = vadd.f32 %v1156_v1, %v1152_v56  ;;  %v1155_v51 = vmul.f32 %v4064_v57, %v3239_v2  ;;  %v1105_v50 = vadd.f32 1.0, %v4066_v59  ;;  %v4068_v60 = vpop.eup %4067  ;;  %v1176_v56 = vld [vmem:[#allocation2 + $0x130] sm:$0xff]  ;;  %v1179_v2 = vld [vmem:[#allocation2 + $0x148] sm:$0xff]  ;;  %v1178_v59 = vld [vmem:[#allocation2 + $0x140] sm:$0xff] }
 0x2e0   : > { %v1172_v57 = vld [vmem:[#allocation2 + $0x110] sm:$0xff] }
 0x2e1   : > { %4073 = vtanh.f32 %v5078_v4  ;;  %v5084_v12 = vadd.f32 %v1155_v51, %v1151_v49 }
 0x2e2   : > { %4075 = vtanh.f32 %v5075_v58 }
 0x2e3   : > { %4077 = vtanh.f32 %v5084_v12 }
 0x2e4   : > { %4079 = vtanh.f32 %v5081_v54 }
 0x2e5   : > { %4081 = vrcp.f32 %v1105_v50 }
 0x2e7   : > { %v4070_v52 = vpop.eup %4069 }
 0x2e9   : > { %v4072_v5 = vpop.eup %4071 }
 0x2ee   : > { %v4074_v6 = vpop.eup %4073 }
 0x2ef   : > { %v4076_v8 = vpop.eup %4075  ;;  %v1168_v7 = vmul.f32 %v4074_v6, %v4070_v52  ;;  %v1181_v6 = vld [vmem:[#allocation2 + $0x158] sm:$0xff] }
 0x2f0   : > { %v4078_v0 = vpop.eup %4077  ;;  %v1166_v15 = vmul.f32 %v4076_v8, %v4068_v60 }
 0x2f1   : > { %3682 = vmatprep.subr.mxu0 %v1168_v7  ;;  %v1167_v13 = vmul.f32 %v4078_v0, %v4072_v5  ;;  %v4080_v14 = vpop.eup %4079 }
 0x2f2   : > { %3683 = vmatpush3.msra.mxu0 %v1168_v7  ;;  %v4082_v17 = vpop.eup %4081 }
 0x2f3   : > { %3684 = vmatprep.subr.mxu0 %v1167_v13  ;;  %v1165_v16 = vmul.f32 %v4082_v17, %v4080_v14  ;;  %v1180_v14 = vld [vmem:[#allocation2 + $0x150] sm:$0xff] }
 0x2f4   : > { %3685 = vmatpush3.msra.mxu0 %v1167_v13 }
 0x2f5   : > { %3686 = vmatprep.subr.mxu0 %v1166_v15 }
 0x2f6   : > { %3687 = vmatpush3.msra.mxu0 %v1166_v15 }
 0x2f7   : > { %3688 = vmatprep.subr.mxu0 %v1165_v16 }
 0x2f8   : > { %3689 = vmatpush3.msra.mxu0 %v1165_v16 }
 0x2f9   : > { %3691 = vmatmul.mubr.msk.f32.vlgmr.msra.gmra.mxu0 %vm533_vm0, %v4857_v33 }
 0x2fa   : > { %3693 = vmatprep.mubr.msk.f32.mxu0 %vm533_vm0, %v4862_v34 }
 0x2fd   : > { %3694 = vmatmul.mubr.msk.f32.gmra.mxu0 %vm533_vm0, %v4867_v35 }
 0x2fe   : > { %3696 = vmatprep.mubr.msk.f32.mxu0 %vm533_vm0, %v4872_v36 }
 0x301   : > { %3697 = vmatmul.mubr.msk.f32.gmra.mxu0 %vm533_vm0, %v4877_v37 }
 0x302   : > { %3699 = vmatprep.mubr.msk.f32.mxu0 %vm533_vm0, %v4882_v38 }
 0x305   : > { %3700 = vmatmul.mubr.msk.f32.gmra.mxu0 %vm533_vm0, %v4887_v39 }
 0x306   : > { %3702 = vmatprep.mubr.msk.f32.mxu0 %vm533_vm0, %v4892_v40 }
 0x309   : > { %3703 = vmatmul.mubr.msk.f32.gmra.mxu0 %vm533_vm0, %v4897_v41 }
 0x30a   : > { %3705 = vmatprep.mubr.msk.f32.mxu0 %vm533_vm0, %v4902_v42 }
 0x30d   : > { %3706 = vmatmul.mubr.msk.f32.gmra.mxu0 %vm533_vm0, %v4907_v43 }
 0x30e   : > { %3708 = vmatprep.mubr.msk.f32.mxu0 %vm533_vm0, %v4912_v44 }
 0x311   : > { %3709 = vmatmul.mubr.msk.f32.gmra.mxu0 %vm533_vm0, %v4917_v45 }
 0x312   : > { %3711 = vmatprep.mubr.msk.f32.mxu0 %vm533_vm0, %v4922_v46 }
 0x315   : > { %3712 = vmatmul.mubr.msk.f32.gmra.mxu0 %vm533_vm0, %v4927_v47 }
 0x316   : > { %3754 = vmatprep.mubr.msk.f32.mxu0 %vm533_vm0, %v4852_v32 }
 0x3b9   : > { %v3692_v18 = vpop.f32.mrf.mxu0 }
 0x3ba   : > { %v1332_v19 = vadd.f32 %v3692_v18, %v1171_v20 }
 0x3bb   : > { %v1252_v21 = vpop.f32.mrf.mxu0 }
 0x3bc   : > { %v1331_v25 = vadd.f32 %v1252_v21, %v1170_v22  ;;  %v3258_v30 = vmul.f32 -1.442695, %v1332_v19 }
 0x3bd   : > { %v3695_v24 = vpop.f32.mrf.mxu0 }
 0x3be   : > { %v1334_v28 = vadd.f32 %v3695_v24, %v1173_v23  ;;  %v3257_v62 = vmul.f32 -1.442695, %v1331_v25  ;;  %4083 = vpow2.f32 %v3258_v30  ;;  %v1183_v25 = vld [vmem:[#allocation2 + $0x168] sm:$0xff] }
 0x3bf   : > { %v1262_v26 = vpop.f32.mrf.mxu0 }
 0x3c0   : > { %v3260_v9 = vmul.f32 -1.442695, %v1334_v28  ;;  %4085 = vpow2.f32 %v3257_v62  ;;  %v1333_v52 = vadd.f32 %v1262_v26, %v1172_v57 }
 0x3c1   : > { %v3698_v29 = vpop.f32.mrf.mxu0 }
 0x3c2   : > { %v1336_v31 = vadd.f32 %v3698_v29, %v1175_v27  ;;  %4087 = vpow2.f32 %v3260_v9  ;;  %v3259_v20 = vmul.f32 -1.442695, %v1333_v52 }
 0x3c3   : > { %v1272_v63 = vpop.f32.mrf.mxu0 }
 0x3c4   : > { %v3262_v10 = vmul.f32 -1.442695, %v1336_v31  ;;  %v1335_v3 = vadd.f32 %v1272_v63, %v1174_v53 }
 0x3c5   : > { %v3701_v11 = vpop.f32.mrf.mxu0 }
 0x3c6   : > { %v1338_v55 = vadd.f32 %v3701_v11, %v1177_v48  ;;  %4089 = vpow2.f32 %v3262_v10  ;;  %v3261_v8 = vmul.f32 -1.442695, %v1335_v3  ;;  %v1185_v48 = vld [vmem:[#allocation2 + $0x178] sm:$0xff]  ;;  %v1184_v11 = vld [vmem:[#allocation2 + $0x170] sm:$0xff] }
 0x3c7   : > { %v1282_v1 = vpop.f32.mrf.mxu0 }
 0x3c8   : > { %v3264_v49 = vmul.f32 -1.442695, %v1338_v55  ;;  %v1337_v50 = vadd.f32 %v1282_v1, %v1176_v56 }
 0x3c9   : > { %v3704_v51 = vpop.f32.mrf.mxu0 }
 0x3ca   : > { %v1340_v60 = vadd.f32 %v3704_v51, %v1179_v2  ;;  %4091 = vpow2.f32 %v3264_v49  ;;  %v3263_v15 = vmul.f32 -1.442695, %v1337_v50 }
 0x3cb   : > { %v1292_v5 = vpop.f32.mrf.mxu0  ;;  %v4084_v19 = vpop.eup %4083 }
 0x3cc   : > { %v3266_v7 = vmul.f32 -1.442695, %v1340_v60  ;;  %v1339_v0 = vadd.f32 %v1292_v5, %v1178_v59  ;;  %v1396_v31 = vadd.f32 1.0, %v4084_v19 }
 0x3cd   : > { %v3707_v13 = vpop.f32.mrf.mxu0  ;;  %v4086_v27 = vpop.eup %4085 }
 0x3ce   : > { %v3265_v17 = vmul.f32 -1.442695, %v1339_v0  ;;  %v1342_v16 = vadd.f32 %v3707_v13, %v1181_v6  ;;  %4093 = vpow2.f32 %v3266_v7  ;;  %v1395_v63 = vadd.f32 1.0, %v4086_v27  ;;  %v1182_v6 = vld [vmem:[#allocation2 + $0x160] sm:$0xff] }
 0x3cf   : > { %v1302_v18 = vpop.f32.mrf.mxu0  ;;  %4095 = vpow2.f32 %v3261_v8  ;;  %v4088_v28 = vpop.eup %4087 }
 0x3d0   : > { %v3268_v21 = vmul.f32 -1.442695, %v1342_v16  ;;  %v1341_v22 = vadd.f32 %v1302_v18, %v1180_v14  ;;  %4097 = vpow2.f32 %v3265_v17  ;;  %v1398_v9 = vadd.f32 1.0, %v4088_v28 }
 0x3d1   : > { %v3710_v23 = vpop.f32.mrf.mxu0  ;;  %4099 = vpow2.f32 %v3263_v15 }
 0x3d2   : > { %v3267_v24 = vmul.f32 -1.442695, %v1341_v22  ;;  %4101 = vpow2.f32 %v3268_v21  ;;  %v1344_v62 = vadd.f32 %v3710_v23, %v1183_v25 }
 0x3d3   : > { %v1312_v26 = vpop.f32.mrf.mxu0  ;;  %4103 = vpow2.f32 %v3259_v20  ;;  %v4090_v30 = vpop.eup %4089 }
 0x3d4   : > { %4105 = vpow2.f32 %v3267_v24  ;;  %v1400_v53 = vadd.f32 1.0, %v4090_v30  ;;  %v3270_v56 = vmul.f32 -1.442695, %v1344_v62  ;;  %v1343_v16 = vadd.f32 %v1312_v26, %v1182_v6 }
 0x3d5   : > { %v3713_v29 = vpop.f32.mrf.mxu0  ;;  %4107 = vrcp.f32 %v1396_v31 }
 0x3d6   : > { %v1346_v1 = vadd.f32 %v3713_v29, %v1185_v48  ;;  %4109 = vrcp.f32 %v1395_v63  ;;  %v3269_v21 = vmul.f32 -1.442695, %v1343_v16 }
 0x3d7   : > { %v4092_v10 = vpop.eup %4091  ;;  %v1322_v55 = vpop.f32.mrf.mxu0  ;;  %4111 = vrcp.f32 %v1398_v9 }
 0x3d8   : > { %v1402_v57 = vadd.f32 1.0, %v4092_v10  ;;  %v1345_v3 = vadd.f32 %v1322_v55, %v1184_v11  ;;  %4113 = vrcp.f32 %v1400_v53  ;;  %v3272_v50 = vmul.f32 -1.442695, %v1346_v1 }
 0x3d9   : > { %4115 = vpow2.f32 %v3270_v56 }
 0x3da   : > { %v3271_v8 = vmul.f32 -1.442695, %v1345_v3 }
 0x3db   : > { %v4094_v2 = vpop.eup %4093 }
 0x3dc   : > { %v4096_v49 = vpop.eup %4095  ;;  %v1404_v51 = vadd.f32 1.0, %v4094_v2 }
 0x3dd   : > { %v4098_v59 = vpop.eup %4097  ;;  %v1399_v14 = vadd.f32 1.0, %v4096_v49 }
 0x3de   : > { %v4100_v60 = vpop.eup %4099  ;;  %4117 = vrcp.f32 %v1404_v51  ;;  %v1403_v52 = vadd.f32 1.0, %v4098_v59 }
 0x3df   : > { %v4102_v5 = vpop.eup %4101  ;;  %4119 = vrcp.f32 %v1402_v57  ;;  %v1401_v15 = vadd.f32 1.0, %v4100_v60 }
 0x3e0   : > { %v4104_v7 = vpop.eup %4103  ;;  %4121 = vrcp.f32 %v1403_v52  ;;  %v1406_v0 = vadd.f32 1.0, %v4102_v5 }
 0x3e1   : > { %v4106_v13 = vpop.eup %4105  ;;  %4123 = vpow2.f32 %v3272_v50  ;;  %v1397_v18 = vadd.f32 1.0, %v4104_v7 }
 0x3e2   : > { %4125 = vrcp.f32 %v1406_v0  ;;  %v1405_v17 = vadd.f32 1.0, %v4106_v13  ;;  %v4108_v20 = vpop.eup %4107 }
 0x3e3   : > { %4127 = vpow2.f32 %v3271_v8  ;;  %v4110_v22 = vpop.eup %4109 }
 0x3e4   : > { %4129 = vrcp.f32 %v1405_v17  ;;  %v4112_v23 = vpop.eup %4111 }
 0x3e5   : > { %4131 = vrcp.f32 %v1399_v14  ;;  %v4114_v24 = vpop.eup %4113 }
 0x3e6   : > { %4133 = vrcp.f32 %v1401_v15  ;;  %v4116_v19 = vpop.eup %4115  ;;  %v1452_v3 = vmul.f32 %v4114_v24, %v5075_v58 }
 0x3e7   : > { %4135 = vrcp.f32 %v1397_v18  ;;  %v1408_v11 = vadd.f32 1.0, %v4116_v19 }
 0x3e8   : > { %4137 = vpow2.f32 %v3269_v21 }
 0x3e9   : > { %4139 = vrcp.f32 %v1408_v11 }
 0x3eb   : > { %v4118_v25 = vpop.eup %4117 }
 0x3ec   : > { %v4120_v27 = vpop.eup %4119  ;;  %v1444_v28 = vmul.f32 2.0, %v4118_v25 }
 0x3ed   : > { %v4122_v29 = vpop.eup %4121  ;;  %v1454_v59 = vmul.f32 %v4120_v27, %v5078_v4  ;;  %v1473_v27 = vld [vmem:[#allocation2 + $0x188] sm:$0xff] }
 0x3ee   : > { %v4124_v30 = vpop.eup %4123  ;;  %v3274_v31 = vadd.f32 -1.0, %v1444_v28  ;;  %v1443_v26 = vmul.f32 2.0, %v4122_v29  ;;  %v1472_v29 = vld [vmem:[#allocation2 + $0x180] sm:$0xff] }
 0x3ef   : > { %v4126_v62 = vpop.eup %4125  ;;  %v1410_v2 = vadd.f32 1.0, %v4124_v30  ;;  %v1475_v30 = vld [vmem:[#allocation2 + $0x198] sm:$0xff] }
 0x3f0   : > { %v4128_v63 = vpop.eup %4127  ;;  %v3273_v48 = vadd.f32 -1.0, %v1443_v26  ;;  %v1446_v9 = vmul.f32 2.0, %v4126_v62  ;;  %v1456_v53 = vmul.f32 %v4108_v20, %v3274_v31 }
 0x3f1   : > { %v4130_v10 = vpop.eup %4129  ;;  %v1409_v49 = vadd.f32 1.0, %v4128_v63  ;;  %4141 = vrcp.f32 %v1410_v2 }
 0x3f2   : > { %v4132_v55 = vpop.eup %4131  ;;  %v3276_v56 = vadd.f32 -1.0, %v1446_v9  ;;  %v1445_v1 = vmul.f32 2.0, %v4130_v10  ;;  %v1455_v51 = vmul.f32 %v4110_v22, %v3273_v48  ;;  %v5123_v5 = vadd.f32 %v1456_v53, %v1452_v3  ;;  %v1477_v48 = vld [vmem:[#allocation2 + $0x1a8] sm:$0xff]  ;;  %v1476_v3 = vld [vmem:[#allocation2 + $0x1a0] sm:$0xff] }
 0x3f3   : > { %v4134_v57 = vpop.eup %4133  ;;  %v1451_v6 = vmul.f32 %v4132_v55, %v5081_v54  ;;  %4143 = vrcp.f32 %v1409_v49 }
 0x3f4   : > { %v1458_v50 = vmul.f32 %v4112_v23, %v3276_v56  ;;  %v3275_v60 = vadd.f32 -1.0, %v1445_v1  ;;  %v4136_v52 = vpop.eup %4135  ;;  %v1453_v7 = vmul.f32 %v4134_v57, %v5084_v12  ;;  %v1479_v1 = vld [vmem:[#allocation2 + $0x1b8] sm:$0xff] }
 0x3f5   : > { %v4138_v13 = vpop.eup %4137  ;;  %v5129_v58 = vadd.f32 %v1455_v51, %v1451_v6 }
 0x3f6   : > { %v5126_v8 = vadd.f32 %v1458_v50, %v1454_v59  ;;  %v1457_v0 = vmul.f32 %v4136_v52, %v3275_v60  ;;  %v1407_v54 = vadd.f32 1.0, %v4138_v13  ;;  %v4140_v14 = vpop.eup %4139  ;;  %v1478_v59 = vld [vmem:[#allocation2 + $0x1b0] sm:$0xff]  ;;  %v1481_v60 = vld [vmem:[#allocation2 + $0x1c8] sm:$0xff]  ;;  %v1480_v13 = vld [vmem:[#allocation2 + $0x1c0] sm:$0xff] }
 0x3f7   : > { %v1474_v52 = vld [vmem:[#allocation2 + $0x190] sm:$0xff] }
 0x3f8   : > { %4145 = vtanh.f32 %v5126_v8  ;;  %v5132_v4 = vadd.f32 %v1457_v0, %v1453_v7 }
 0x3f9   : > { %4147 = vtanh.f32 %v5123_v5 }
 0x3fa   : > { %4149 = vtanh.f32 %v5132_v4 }
 0x3fb   : > { %4151 = vtanh.f32 %v5129_v58 }
 0x3fc   : > { %4153 = vrcp.f32 %v1407_v54 }
 0x3fe   : > { %v4142_v12 = vpop.eup %4141 }
 0x400   : > { %v4144_v15 = vpop.eup %4143 }
 0x405   : > { %v4146_v17 = vpop.eup %4145 }
 0x406   : > { %v4148_v16 = vpop.eup %4147  ;;  %v1470_v18 = vmul.f32 %v4146_v17, %v4142_v12  ;;  %v1483_v17 = vld [vmem:[#allocation2 + $0x1d8] sm:$0xff] }
 0x407   : > { %v4150_v20 = vpop.eup %4149  ;;  %v1468_v23 = vmul.f32 %v4148_v16, %v4140_v14 }
 0x408   : > { %3714 = vmatprep.subr.mxu1 %v1470_v18  ;;  %v1469_v21 = vmul.f32 %v4150_v20, %v4144_v15  ;;  %v4152_v22 = vpop.eup %4151 }
 0x409   : > { %3715 = vmatpush3.msra.mxu1 %v1470_v18  ;;  %v4154_v24 = vpop.eup %4153 }
 0x40a   : > { %3716 = vmatprep.subr.mxu1 %v1469_v21  ;;  %v1467_v19 = vmul.f32 %v4154_v24, %v4152_v22  ;;  %v1482_v22 = vld [vmem:[#allocation2 + $0x1d0] sm:$0xff] }
 0x40b   : > { %3717 = vmatpush3.msra.mxu1 %v1469_v21 }
 0x40c   : > { %3718 = vmatprep.subr.mxu1 %v1468_v23 }
 0x40d   : > { %3719 = vmatpush3.msra.mxu1 %v1468_v23 }
 0x40e   : > { %3720 = vmatprep.subr.mxu1 %v1467_v19 }
 0x40f   : > { %3721 = vmatpush3.msra.mxu1 %v1467_v19 }
 0x410   : > { %3723 = vmatmul.mubr.msk.f32.vlgmr.msra.gmra.mxu1 %vm533_vm0, %v4857_v33 }
 0x411   : > { %3725 = vmatprep.mubr.msk.f32.mxu1 %vm533_vm0, %v4862_v34 }
 0x414   : > { %3726 = vmatmul.mubr.msk.f32.gmra.mxu1 %vm533_vm0, %v4867_v35 }
 0x415   : > { %3728 = vmatprep.mubr.msk.f32.mxu1 %vm533_vm0, %v4872_v36 }
 0x418   : > { %3729 = vmatmul.mubr.msk.f32.gmra.mxu1 %vm533_vm0, %v4877_v37 }
 0x419   : > { %3731 = vmatprep.mubr.msk.f32.mxu1 %vm533_vm0, %v4882_v38 }
 0x41c   : > { %3732 = vmatmul.mubr.msk.f32.gmra.mxu1 %vm533_vm0, %v4887_v39 }
 0x41d   : > { %3734 = vmatprep.mubr.msk.f32.mxu1 %vm533_vm0, %v4892_v40 }
 0x420   : > { %3735 = vmatmul.mubr.msk.f32.gmra.mxu1 %vm533_vm0, %v4897_v41 }
 0x421   : > { %3737 = vmatprep.mubr.msk.f32.mxu1 %vm533_vm0, %v4902_v42 }
 0x424   : > { %3738 = vmatmul.mubr.msk.f32.gmra.mxu1 %vm533_vm0, %v4907_v43 }
 0x425   : > { %3740 = vmatprep.mubr.msk.f32.mxu1 %vm533_vm0, %v4912_v44 }
 0x428   : > { %3741 = vmatmul.mubr.msk.f32.gmra.mxu1 %vm533_vm0, %v4917_v45 }
 0x429   : > { %3743 = vmatprep.mubr.msk.f32.mxu1 %vm533_vm0, %v4922_v46 }
 0x42c   : > { %3744 = vmatmul.mubr.msk.f32.gmra.mxu1 %vm533_vm0, %v4927_v47 }
 0x42d   : > { %3786 = vmatprep.mubr.msk.f32.mxu1 %vm533_vm0, %v4852_v32 }
 0x4d0   : > { %v3724_v25 = vpop.f32.mrf.mxu1 }
 0x4d1   : > { %v1634_v26 = vadd.f32 %v3724_v25, %v1473_v27 }
 0x4d2   : > { %v1554_v28 = vpop.f32.mrf.mxu1 }
 0x4d3   : > { %v1633_v62 = vadd.f32 %v1554_v28, %v1472_v29  ;;  %v3294_v53 = vmul.f32 -1.442695, %v1634_v26 }
 0x4d4   : > { %v3727_v31 = vpop.f32.mrf.mxu1 }
 0x4d5   : > { %v1636_v9 = vadd.f32 %v3727_v31, %v1475_v30  ;;  %v3293_v55 = vmul.f32 -1.442695, %v1633_v62  ;;  %4155 = vpow2.f32 %v3294_v53  ;;  %v1485_v62 = vld [vmem:[#allocation2 + $0x1e8] sm:$0xff] }
 0x4d6   : > { %v1564_v63 = vpop.f32.mrf.mxu1 }
 0x4d7   : > { %v3296_v2 = vmul.f32 -1.442695, %v1636_v9  ;;  %4157 = vpow2.f32 %v3293_v55  ;;  %v1635_v12 = vadd.f32 %v1564_v63, %v1474_v52 }
 0x4d8   : > { %v3730_v10 = vpop.f32.mrf.mxu1 }
 0x4d9   : > { %v1638_v11 = vadd.f32 %v3730_v10, %v1477_v48  ;;  %4159 = vpow2.f32 %v3296_v2  ;;  %v3295_v27 = vmul.f32 -1.442695, %v1635_v12 }
 0x4da   : > { %v1574_v56 = vpop.f32.mrf.mxu1 }
 0x4db   : > { %v3298_v57 = vmul.f32 -1.442695, %v1638_v11  ;;  %v1637_v6 = vadd.f32 %v1574_v56, %v1476_v3 }
 0x4dc   : > { %v3733_v49 = vpop.f32.mrf.mxu1 }
 0x4dd   : > { %v1640_v51 = vadd.f32 %v3733_v49, %v1479_v1  ;;  %4161 = vpow2.f32 %v3298_v57  ;;  %v3297_v16 = vmul.f32 -1.442695, %v1637_v6  ;;  %v1487_v1 = vld [vmem:[#allocation2 + $0x1f8] sm:$0xff]  ;;  %v1486_v49 = vld [vmem:[#allocation2 + $0x1f0] sm:$0xff] }
 0x4de   : > { %v1584_v50 = vpop.f32.mrf.mxu1 }
 0x4df   : > { %v3300_v7 = vmul.f32 -1.442695, %v1640_v51  ;;  %v1639_v54 = vadd.f32 %v1584_v50, %v1478_v59 }
 0x4e0   : > { %v3736_v0 = vpop.f32.mrf.mxu1 }
 0x4e1   : > { %v1642_v14 = vadd.f32 %v3736_v0, %v1481_v60  ;;  %4163 = vpow2.f32 %v3300_v7  ;;  %v3299_v23 = vmul.f32 -1.442695, %v1639_v54 }
 0x4e2   : > { %v1594_v15 = vpop.f32.mrf.mxu1  ;;  %v4156_v26 = vpop.eup %4155 }
 0x4e3   : > { %v3302_v18 = vmul.f32 -1.442695, %v1642_v14  ;;  %v1641_v20 = vadd.f32 %v1594_v15, %v1480_v13  ;;  %v1698_v11 = vadd.f32 1.0, %v4156_v26 }
 0x4e4   : > { %v3739_v21 = vpop.f32.mrf.mxu1  ;;  %v4158_v48 = vpop.eup %4157 }
 0x4e5   : > { %v3301_v24 = vmul.f32 -1.442695, %v1641_v20  ;;  %v1644_v19 = vadd.f32 %v3739_v21, %v1483_v17  ;;  %4165 = vpow2.f32 %v3302_v18  ;;  %v1697_v56 = vadd.f32 1.0, %v4158_v48  ;;  %v1484_v17 = vld [vmem:[#allocation2 + $0x1e0] sm:$0xff] }
 0x4e6   : > { %v1604_v25 = vpop.f32.mrf.mxu1  ;;  %4167 = vpow2.f32 %v3297_v16  ;;  %v4160_v9 = vpop.eup %4159 }
 0x4e7   : > { %v3304_v28 = vmul.f32 -1.442695, %v1644_v19  ;;  %v1643_v29 = vadd.f32 %v1604_v25, %v1482_v22  ;;  %4169 = vpow2.f32 %v3301_v24  ;;  %v1700_v2 = vadd.f32 1.0, %v4160_v9 }
 0x4e8   : > { %v3742_v30 = vpop.f32.mrf.mxu1  ;;  %4171 = vpow2.f32 %v3299_v23 }
 0x4e9   : > { %v3303_v31 = vmul.f32 -1.442695, %v1643_v29  ;;  %4173 = vpow2.f32 %v3304_v28  ;;  %v1646_v55 = vadd.f32 %v3742_v30, %v1485_v62 }
 0x4ea   : > { %v1614_v63 = vpop.f32.mrf.mxu1  ;;  %4175 = vpow2.f32 %v3295_v27  ;;  %v4162_v53 = vpop.eup %4161 }
 0x4eb   : > { %4177 = vpow2.f32 %v3303_v31  ;;  %v1702_v3 = vadd.f32 1.0, %v4162_v53  ;;  %v3306_v59 = vmul.f32 -1.442695, %v1646_v55  ;;  %v1645_v19 = vadd.f32 %v1614_v63, %v1484_v17 }
 0x4ec   : > { %v3745_v10 = vpop.f32.mrf.mxu1  ;;  %4179 = vrcp.f32 %v1698_v11 }
 0x4ed   : > { %v1648_v50 = vadd.f32 %v3745_v10, %v1487_v1  ;;  %4181 = vrcp.f32 %v1697_v56  ;;  %v3305_v28 = vmul.f32 -1.442695, %v1645_v19 }
 0x4ee   : > { %v4164_v57 = vpop.eup %4163  ;;  %v1624_v51 = vpop.f32.mrf.mxu1  ;;  %4183 = vrcp.f32 %v1700_v2 }
 0x4ef   : > { %v1704_v52 = vadd.f32 1.0, %v4164_v57  ;;  %v1647_v6 = vadd.f32 %v1624_v51, %v1486_v49  ;;  %4185 = vrcp.f32 %v1702_v3  ;;  %v3308_v54 = vmul.f32 -1.442695, %v1648_v50 }
 0x4f0   : > { %4187 = vpow2.f32 %v3306_v59 }
 0x4f1   : > { %v3307_v16 = vmul.f32 -1.442695, %v1647_v6 }
 0x4f2   : > { %v4166_v60 = vpop.eup %4165 }
 0x4f3   : > { %v4168_v7 = vpop.eup %4167  ;;  %v1706_v0 = vadd.f32 1.0, %v4166_v60 }
 0x4f4   : > { %v4170_v13 = vpop.eup %4169  ;;  %v1701_v22 = vadd.f32 1.0, %v4168_v7 }
 0x4f5   : > { %v4172_v14 = vpop.eup %4171  ;;  %4189 = vrcp.f32 %v1706_v0  ;;  %v1705_v12 = vadd.f32 1.0, %v4170_v13 }
 0x4f6   : > { %v4174_v15 = vpop.eup %4173  ;;  %4191 = vrcp.f32 %v1704_v52  ;;  %v1703_v23 = vadd.f32 1.0, %v4172_v14 }
 0x4f7   : > { %v4176_v18 = vpop.eup %4175  ;;  %4193 = vrcp.f32 %v1705_v12  ;;  %v1708_v20 = vadd.f32 1.0, %v4174_v15 }
 0x4f8   : > { %v4178_v21 = vpop.eup %4177  ;;  %4195 = vpow2.f32 %v3308_v54  ;;  %v1699_v25 = vadd.f32 1.0, %v4176_v18 }
 0x4f9   : > { %4197 = vrcp.f32 %v1708_v20  ;;  %v1707_v24 = vadd.f32 1.0, %v4178_v21  ;;  %v4180_v27 = vpop.eup %4179 }
 0x4fa   : > { %4199 = vpow2.f32 %v3307_v16  ;;  %v4182_v29 = vpop.eup %4181 }
 0x4fb   : > { %4201 = vrcp.f32 %v1707_v24  ;;  %v4184_v30 = vpop.eup %4183 }
 0x4fc   : > { %4203 = vrcp.f32 %v1701_v22  ;;  %v4186_v31 = vpop.eup %4185 }
 0x4fd   : > { %4205 = vrcp.f32 %v1703_v23  ;;  %v4188_v26 = vpop.eup %4187  ;;  %v1754_v6 = vmul.f32 %v4186_v31, %v5123_v5 }
 0x4fe   : > { %4207 = vrcp.f32 %v1699_v25  ;;  %v1710_v49 = vadd.f32 1.0, %v4188_v26 }
 0x4ff   : > { %4209 = vpow2.f32 %v3305_v28 }
 0x500   : > { %4211 = vrcp.f32 %v1710_v49 }
 0x502   : > { %v4190_v62 = vpop.eup %4189 }
 0x503   : > { %v4192_v48 = vpop.eup %4191  ;;  %v1746_v9 = vmul.f32 2.0, %v4190_v62 }
 0x504   : > { %v4194_v10 = vpop.eup %4193  ;;  %v1756_v13 = vmul.f32 %v4192_v48, %v5126_v8  ;;  %v1775_v48 = vld [vmem:[#allocation2 + $0x208] sm:$0xff] }
 0x505   : > { %v4196_v53 = vpop.eup %4195  ;;  %v3310_v11 = vadd.f32 -1.0, %v1746_v9  ;;  %v1745_v63 = vmul.f32 2.0, %v4194_v10  ;;  %v1774_v10 = vld [vmem:[#allocation2 + $0x200] sm:$0xff] }
 0x506   : > { %v4198_v55 = vpop.eup %4197  ;;  %v1712_v60 = vadd.f32 1.0, %v4196_v53  ;;  %v1777_v53 = vld [vmem:[#allocation2 + $0x218] sm:$0xff] }
 0x507   : > { %v4200_v56 = vpop.eup %4199  ;;  %v3309_v1 = vadd.f32 -1.0, %v1745_v63  ;;  %v1748_v2 = vmul.f32 2.0, %v4198_v55  ;;  %v1758_v3 = vmul.f32 %v4180_v27, %v3310_v11 }
 0x508   : > { %v4202_v57 = vpop.eup %4201  ;;  %v1711_v7 = vadd.f32 1.0, %v4200_v56  ;;  %4213 = vrcp.f32 %v1712_v60 }
 0x509   : > { %v4204_v51 = vpop.eup %4203  ;;  %v3312_v59 = vadd.f32 -1.0, %v1748_v2  ;;  %v1747_v50 = vmul.f32 2.0, %v4202_v57  ;;  %v1757_v0 = vmul.f32 %v4182_v29, %v3309_v1  ;;  %v5171_v15 = vadd.f32 %v1758_v3, %v1754_v6  ;;  %v1779_v1 = vld [vmem:[#allocation2 + $0x228] sm:$0xff]  ;;  %v1778_v6 = vld [vmem:[#allocation2 + $0x220] sm:$0xff] }
 0x50a   : > { %v4206_v52 = vpop.eup %4205  ;;  %v1753_v17 = vmul.f32 %v4204_v51, %v5129_v58  ;;  %4215 = vrcp.f32 %v1711_v7 }
 0x50b   : > { %v1760_v54 = vmul.f32 %v4184_v30, %v3312_v59  ;;  %v3311_v14 = vadd.f32 -1.0, %v1747_v50  ;;  %v4208_v12 = vpop.eup %4207  ;;  %v1755_v18 = vmul.f32 %v4206_v52, %v5132_v4  ;;  %v1781_v50 = vld [vmem:[#allocation2 + $0x238] sm:$0xff] }
 0x50c   : > { %v4210_v21 = vpop.eup %4209  ;;  %v5177_v5 = vadd.f32 %v1757_v0, %v1753_v17 }
 0x50d   : > { %v5174_v16 = vadd.f32 %v1760_v54, %v1756_v13  ;;  %v1759_v20 = vmul.f32 %v4208_v12, %v3311_v14  ;;  %v1709_v58 = vadd.f32 1.0, %v4210_v21  ;;  %v4212_v22 = vpop.eup %4211  ;;  %v1780_v13 = vld [vmem:[#allocation2 + $0x230] sm:$0xff]  ;;  %v1783_v14 = vld [vmem:[#allocation2 + $0x248] sm:$0xff]  ;;  %v1782_v21 = vld [vmem:[#allocation2 + $0x240] sm:$0xff] }
 0x50e   : > { %v1776_v12 = vld [vmem:[#allocation2 + $0x210] sm:$0xff] }
 0x50f   : > { %4217 = vtanh.f32 %v5174_v16  ;;  %v5180_v8 = vadd.f32 %v1759_v20, %v1755_v18 }
 0x510   : > { %4219 = vtanh.f32 %v5171_v15 }
 0x511   : > { %4221 = vtanh.f32 %v5180_v8 }
 0x512   : > { %4223 = vtanh.f32 %v5177_v5 }
 0x513   : > { %4225 = vrcp.f32 %v1709_v58 }
 0x515   : > { %v4214_v4 = vpop.eup %4213 }
 0x517   : > { %v4216_v23 = vpop.eup %4215 }
 0x51c   : > { %v4218_v24 = vpop.eup %4217 }
 0x51d   : > { %v4220_v19 = vpop.eup %4219  ;;  %v1772_v25 = vmul.f32 %v4218_v24, %v4214_v4  ;;  %v1785_v24 = vld [vmem:[#allocation2 + $0x258] sm:$0xff] }
 0x51e   : > { %v4222_v27 = vpop.eup %4221  ;;  %v1770_v30 = vmul.f32 %v4220_v19, %v4212_v22 }
 0x51f   : > { %3746 = vmatprep.subr.mxu0 %v1772_v25  ;;  %v1771_v28 = vmul.f32 %v4222_v27, %v4216_v23  ;;  %v4224_v29 = vpop.eup %4223 }
 0x520   : > { %3747 = vmatpush3.msra.mxu0 %v1772_v25  ;;  %v4226_v31 = vpop.eup %4225 }
 0x521   : > { %3748 = vmatprep.subr.mxu0 %v1771_v28  ;;  %v1769_v26 = vmul.f32 %v4226_v31, %v4224_v29  ;;  %v1784_v29 = vld [vmem:[#allocation2 + $0x250] sm:$0xff] }
 0x522   : > { %3749 = vmatpush3.msra.mxu0 %v1771_v28 }
 0x523   : > { %3750 = vmatprep.subr.mxu0 %v1770_v30 }
 0x524   : > { %3751 = vmatpush3.msra.mxu0 %v1770_v30 }
 0x525   : > { %3752 = vmatprep.subr.mxu0 %v1769_v26 }
 0x526   : > { %3753 = vmatpush3.msra.mxu0 %v1769_v26 }
 0x527   : > { %3755 = vmatmul.mubr.msk.f32.vlgmr.msra.gmra.mxu0 %vm533_vm0, %v4857_v33 }
 0x528   : > { %3757 = vmatprep.mubr.msk.f32.mxu0 %vm533_vm0, %v4862_v34 }
 0x52b   : > { %3758 = vmatmul.mubr.msk.f32.gmra.mxu0 %vm533_vm0, %v4867_v35 }
 0x52c   : > { %3760 = vmatprep.mubr.msk.f32.mxu0 %vm533_vm0, %v4872_v36 }
 0x52f   : > { %3761 = vmatmul.mubr.msk.f32.gmra.mxu0 %vm533_vm0, %v4877_v37 }
 0x530   : > { %3763 = vmatprep.mubr.msk.f32.mxu0 %vm533_vm0, %v4882_v38 }
 0x533   : > { %3764 = vmatmul.mubr.msk.f32.gmra.mxu0 %vm533_vm0, %v4887_v39 }
 0x534   : > { %3766 = vmatprep.mubr.msk.f32.mxu0 %vm533_vm0, %v4892_v40 }
 0x537   : > { %3767 = vmatmul.mubr.msk.f32.gmra.mxu0 %vm533_vm0, %v4897_v41 }
 0x538   : > { %3769 = vmatprep.mubr.msk.f32.mxu0 %vm533_vm0, %v4902_v42 }
 0x53b   : > { %3770 = vmatmul.mubr.msk.f32.gmra.mxu0 %vm533_vm0, %v4907_v43 }
 0x53c   : > { %3772 = vmatprep.mubr.msk.f32.mxu0 %vm533_vm0, %v4912_v44 }
 0x53f   : > { %3773 = vmatmul.mubr.msk.f32.gmra.mxu0 %vm533_vm0, %v4917_v45 }
 0x540   : > { %3775 = vmatprep.mubr.msk.f32.mxu0 %vm533_vm0, %v4922_v46 }
 0x543   : > { %3776 = vmatmul.mubr.msk.f32.gmra.mxu0 %vm533_vm0, %v4927_v47 }
 0x544   : > { %3818 = vmatprep.mubr.msk.f32.mxu0 %vm533_vm0, %v4852_v32 }
 0x5e7   : > { %v3756_v62 = vpop.f32.mrf.mxu0 }
 0x5e8   : > { %v1936_v63 = vadd.f32 %v3756_v62, %v1775_v48 }
 0x5e9   : > { %v1856_v9 = vpop.f32.mrf.mxu0 }
 0x5ea   : > { %v1935_v55 = vadd.f32 %v1856_v9, %v1774_v10  ;;  %v3330_v3 = vmul.f32 -1.442695, %v1936_v63 }
 0x5eb   : > { %v3759_v11 = vpop.f32.mrf.mxu0 }
 0x5ec   : > { %v1938_v2 = vadd.f32 %v3759_v11, %v1777_v53  ;;  %v3329_v51 = vmul.f32 -1.442695, %v1935_v55  ;;  %4227 = vpow2.f32 %v3330_v3  ;;  %v1787_v55 = vld [vmem:[#allocation2 + $0x268] sm:$0xff] }
 0x5ed   : > { %v1866_v56 = vpop.f32.mrf.mxu0 }
 0x5ee   : > { %v3332_v60 = vmul.f32 -1.442695, %v1938_v2  ;;  %4229 = vpow2.f32 %v3329_v51  ;;  %v1937_v4 = vadd.f32 %v1866_v56, %v1776_v12 }
 0x5ef   : > { %v3762_v57 = vpop.f32.mrf.mxu0 }
 0x5f0   : > { %v1940_v49 = vadd.f32 %v3762_v57, %v1779_v1  ;;  %4231 = vpow2.f32 %v3332_v60  ;;  %v3331_v48 = vmul.f32 -1.442695, %v1937_v4 }
 0x5f1   : > { %v1876_v59 = vpop.f32.mrf.mxu0 }
 0x5f2   : > { %v3334_v52 = vmul.f32 -1.442695, %v1940_v49  ;;  %v1939_v17 = vadd.f32 %v1876_v59, %v1778_v6 }
 0x5f3   : > { %v3765_v7 = vpop.f32.mrf.mxu0 }
 0x5f4   : > { %v1942_v0 = vadd.f32 %v3765_v7, %v1781_v50  ;;  %4233 = vpow2.f32 %v3334_v52  ;;  %v3333_v19 = vmul.f32 -1.442695, %v1939_v17  ;;  %v1789_v50 = vld [vmem:[#allocation2 + $0x278] sm:$0xff]  ;;  %v1788_v7 = vld [vmem:[#allocation2 + $0x270] sm:$0xff] }
 0x5f5   : > { %v1886_v54 = vpop.f32.mrf.mxu0 }
 0x5f6   : > { %v3336_v18 = vmul.f32 -1.442695, %v1942_v0  ;;  %v1941_v58 = vadd.f32 %v1886_v54, %v1780_v13 }
 0x5f7   : > { %v3768_v20 = vpop.f32.mrf.mxu0 }
 0x5f8   : > { %v1944_v22 = vadd.f32 %v3768_v20, %v1783_v14  ;;  %4235 = vpow2.f32 %v3336_v18  ;;  %v3335_v30 = vmul.f32 -1.442695, %v1941_v58 }
 0x5f9   : > { %v1896_v23 = vpop.f32.mrf.mxu0  ;;  %v4228_v63 = vpop.eup %4227 }
 0x5fa   : > { %v3338_v25 = vmul.f32 -1.442695, %v1944_v22  ;;  %v1943_v27 = vadd.f32 %v1896_v23, %v1782_v21  ;;  %v2000_v49 = vadd.f32 1.0, %v4228_v63 }
 0x5fb   : > { %v3771_v28 = vpop.f32.mrf.mxu0  ;;  %v4230_v1 = vpop.eup %4229 }
 0x5fc   : > { %v3337_v31 = vmul.f32 -1.442695, %v1943_v27  ;;  %v1946_v26 = vadd.f32 %v3771_v28, %v1785_v24  ;;  %4237 = vpow2.f32 %v3338_v25  ;;  %v1999_v59 = vadd.f32 1.0, %v4230_v1  ;;  %v1786_v24 = vld [vmem:[#allocation2 + $0x260] sm:$0xff] }
 0x5fd   : > { %v1906_v62 = vpop.f32.mrf.mxu0  ;;  %4239 = vpow2.f32 %v3333_v19  ;;  %v4232_v2 = vpop.eup %4231 }
 0x5fe   : > { %v3340_v9 = vmul.f32 -1.442695, %v1946_v26  ;;  %v1945_v10 = vadd.f32 %v1906_v62, %v1784_v29  ;;  %4241 = vpow2.f32 %v3337_v31  ;;  %v2002_v60 = vadd.f32 1.0, %v4232_v2 }
 0x5ff   : > { %v3774_v53 = vpop.f32.mrf.mxu0  ;;  %4243 = vpow2.f32 %v3335_v30 }
 0x600   : > { %v3339_v11 = vmul.f32 -1.442695, %v1945_v10  ;;  %4245 = vpow2.f32 %v3340_v9  ;;  %v1948_v51 = vadd.f32 %v3774_v53, %v1787_v55 }
 0x601   : > { %v1916_v56 = vpop.f32.mrf.mxu0  ;;  %4247 = vpow2.f32 %v3331_v48  ;;  %v4234_v3 = vpop.eup %4233 }
 0x602   : > { %4249 = vpow2.f32 %v3339_v11  ;;  %v2004_v6 = vadd.f32 1.0, %v4234_v3  ;;  %v3342_v13 = vmul.f32 -1.442695, %v1948_v51  ;;  %v1947_v26 = vadd.f32 %v1916_v56, %v1786_v24 }
 0x603   : > { %v3777_v57 = vpop.f32.mrf.mxu0  ;;  %4251 = vrcp.f32 %v2000_v49 }
 0x604   : > { %v1950_v54 = vadd.f32 %v3777_v57, %v1789_v50  ;;  %4253 = vrcp.f32 %v1999_v59  ;;  %v3341_v9 = vmul.f32 -1.442695, %v1947_v26 }
 0x605   : > { %v4236_v52 = vpop.eup %4235  ;;  %v1926_v0 = vpop.f32.mrf.mxu0  ;;  %4255 = vrcp.f32 %v2002_v60 }
 0x606   : > { %v2006_v12 = vadd.f32 1.0, %v4236_v52  ;;  %v1949_v17 = vadd.f32 %v1926_v0, %v1788_v7  ;;  %4257 = vrcp.f32 %v2004_v6  ;;  %v3344_v58 = vmul.f32 -1.442695, %v1950_v54 }
 0x607   : > { %4259 = vpow2.f32 %v3342_v13 }
 0x608   : > { %v3343_v19 = vmul.f32 -1.442695, %v1949_v17 }
 0x609   : > { %v4238_v14 = vpop.eup %4237 }
 0x60a   : > { %v4240_v18 = vpop.eup %4239  ;;  %v2008_v20 = vadd.f32 1.0, %v4238_v14 }
 0x60b   : > { %v4242_v21 = vpop.eup %4241  ;;  %v2003_v29 = vadd.f32 1.0, %v4240_v18 }
 0x60c   : > { %v4244_v22 = vpop.eup %4243  ;;  %4261 = vrcp.f32 %v2008_v20  ;;  %v2007_v4 = vadd.f32 1.0, %v4242_v21 }
 0x60d   : > { %v4246_v23 = vpop.eup %4245  ;;  %4263 = vrcp.f32 %v2006_v12  ;;  %v2005_v30 = vadd.f32 1.0, %v4244_v22 }
 0x60e   : > { %v4248_v25 = vpop.eup %4247  ;;  %4265 = vrcp.f32 %v2007_v4  ;;  %v2010_v27 = vadd.f32 1.0, %v4246_v23 }
 0x60f   : > { %v4250_v28 = vpop.eup %4249  ;;  %4267 = vpow2.f32 %v3344_v58  ;;  %v2001_v62 = vadd.f32 1.0, %v4248_v25 }
 0x610   : > { %4269 = vrcp.f32 %v2010_v27  ;;  %v2009_v31 = vadd.f32 1.0, %v4250_v28  ;;  %v4252_v48 = vpop.eup %4251 }
 0x611   : > { %4271 = vpow2.f32 %v3343_v19  ;;  %v4254_v10 = vpop.eup %4253 }
 0x612   : > { %4273 = vrcp.f32 %v2009_v31  ;;  %v4256_v53 = vpop.eup %4255 }
 0x613   : > { %4275 = vrcp.f32 %v2003_v29  ;;  %v4258_v11 = vpop.eup %4257 }
 0x614   : > { %4277 = vrcp.f32 %v2005_v30  ;;  %v4260_v63 = vpop.eup %4259  ;;  %v2056_v17 = vmul.f32 %v4258_v11, %v5171_v15 }
 0x615   : > { %4279 = vrcp.f32 %v2001_v62  ;;  %v2012_v7 = vadd.f32 1.0, %v4260_v63 }
 0x616   : > { %4281 = vpow2.f32 %v3341_v9 }
 0x617   : > { %4283 = vrcp.f32 %v2012_v7 }
 0x619   : > { %v4262_v55 = vpop.eup %4261 }
 0x61a   : > { %v4264_v1 = vpop.eup %4263  ;;  %v2048_v2 = vmul.f32 2.0, %v4262_v55 }
 0x61b   : > { %v4266_v57 = vpop.eup %4265  ;;  %v2058_v21 = vmul.f32 %v4264_v1, %v5174_v16  ;;  %v2077_v1 = vld [vmem:[#allocation2 + $0x288] sm:$0xff] }
 0x61c   : > { %v4268_v3 = vpop.eup %4267  ;;  %v3346_v49 = vadd.f32 -1.0, %v2048_v2  ;;  %v2047_v56 = vmul.f32 2.0, %v4266_v57  ;;  %v2076_v57 = vld [vmem:[#allocation2 + $0x280] sm:$0xff] }
 0x61d   : > { %v4270_v51 = vpop.eup %4269  ;;  %v2014_v14 = vadd.f32 1.0, %v4268_v3  ;;  %v2079_v3 = vld [vmem:[#allocation2 + $0x298] sm:$0xff] }
 0x61e   : > { %v4272_v59 = vpop.eup %4271  ;;  %v3345_v50 = vadd.f32 -1.0, %v2047_v56  ;;  %v2050_v60 = vmul.f32 2.0, %v4270_v51  ;;  %v2060_v6 = vmul.f32 %v4252_v48, %v3346_v49 }
 0x61f   : > { %v4274_v52 = vpop.eup %4273  ;;  %v2013_v18 = vadd.f32 1.0, %v4272_v59  ;;  %4285 = vrcp.f32 %v2014_v14 }
 0x620   : > { %v4276_v0 = vpop.eup %4275  ;;  %v3348_v13 = vadd.f32 -1.0, %v2050_v60  ;;  %v2049_v54 = vmul.f32 2.0, %v4274_v52  ;;  %v2059_v20 = vmul.f32 %v4254_v10, %v3345_v50  ;;  %v5219_v23 = vadd.f32 %v2060_v6, %v2056_v17  ;;  %v2081_v50 = vld [vmem:[#allocation2 + $0x2a8] sm:$0xff] }
 0x621   : > { %v4278_v12 = vpop.eup %4277  ;;  %v2055_v24 = vmul.f32 %v4276_v0, %v5177_v5  ;;  %4287 = vrcp.f32 %v2013_v18 }
 0x622   : > { %v2062_v58 = vmul.f32 %v4256_v53, %v3348_v13  ;;  %v3347_v22 = vadd.f32 -1.0, %v2049_v54  ;;  %v4280_v4 = vpop.eup %4279  ;;  %v2057_v25 = vmul.f32 %v4278_v12, %v5180_v8  ;;  %v2083_v54 = vld [vmem:[#allocation2 + $0x2b8] sm:$0xff] }
 0x623   : > { %v4282_v28 = vpop.eup %4281  ;;  %v5225_v15 = vadd.f32 %v2059_v20, %v2055_v24  ;;  %v2082_v20 = vld [vmem:[#allocation2 + $0x2b0] sm:$0xff] }
 0x624   : > { %v5222_v19 = vadd.f32 %v2062_v58, %v2058_v21  ;;  %v2061_v27 = vmul.f32 %v4280_v4, %v3347_v22  ;;  %v2011_v5 = vadd.f32 1.0, %v4282_v28  ;;  %v4284_v29 = vpop.eup %4283  ;;  %v2085_v58 = vld [vmem:[#allocation2 + $0x2c8] sm:$0xff]  ;;  %v2078_v22 = vld [vmem:[#allocation2 + $0x290] sm:$0xff] }
 0x626   : > { %4289 = vtanh.f32 %v5222_v19  ;;  %v5228_v16 = vadd.f32 %v2061_v27, %v2057_v25  ;;  %v2084_v27 = vld [vmem:[#allocation2 + $0x2c0] sm:$0xff] }
 0x627   : > { %4291 = vtanh.f32 %v5219_v23 }
 0x628   : > { %4293 = vtanh.f32 %v5228_v16 }
 0x629   : > { %4295 = vtanh.f32 %v5225_v15 }
 0x62a   : > { %4297 = vrcp.f32 %v2011_v5 }
 0x62c   : > { %v4286_v8 = vpop.eup %4285 }
 0x62e   : > { %v4288_v30 = vpop.eup %4287 }
 0x633   : > { %v4290_v31 = vpop.eup %4289 }
 0x634   : > { %v4292_v26 = vpop.eup %4291  ;;  %v2074_v62 = vmul.f32 %v4290_v31, %v4286_v8 }
 0x635   : > { %v4294_v48 = vpop.eup %4293  ;;  %v2072_v53 = vmul.f32 %v4292_v26, %v4284_v29 }
 0x636   : > { %3778 = vmatprep.subr.mxu1 %v2074_v62  ;;  %v2073_v9 = vmul.f32 %v4294_v48, %v4288_v30  ;;  %v4296_v10 = vpop.eup %4295  ;;  %v2087_v30 = vld [vmem:[#allocation2 + $0x2d8] sm:$0xff] }
 0x637   : > { %3779 = vmatpush3.msra.mxu1 %v2074_v62  ;;  %v4298_v11 = vpop.eup %4297 }
 0x638   : > { %3780 = vmatprep.subr.mxu1 %v2073_v9  ;;  %v2071_v63 = vmul.f32 %v4298_v11, %v4296_v10 }
 0x639   : > { %3781 = vmatpush3.msra.mxu1 %v2073_v9  ;;  %v2086_v9 = vld [vmem:[#allocation2 + $0x2d0] sm:$0xff] }
 0x63a   : > { %3782 = vmatprep.subr.mxu1 %v2072_v53 }
 0x63b   : > { %3783 = vmatpush3.msra.mxu1 %v2072_v53 }
 0x63c   : > { %3784 = vmatprep.subr.mxu1 %v2071_v63 }
 0x63d   : > { %3785 = vmatpush3.msra.mxu1 %v2071_v63 }
 0x63e   : > { %3787 = vmatmul.mubr.msk.f32.vlgmr.msra.gmra.mxu1 %vm533_vm0, %v4857_v33 }
 0x63f   : > { %3789 = vmatprep.mubr.msk.f32.mxu1 %vm533_vm0, %v4862_v34 }
 0x642   : > { %3790 = vmatmul.mubr.msk.f32.gmra.mxu1 %vm533_vm0, %v4867_v35 }
 0x643   : > { %3792 = vmatprep.mubr.msk.f32.mxu1 %vm533_vm0, %v4872_v36 }
 0x646   : > { %3793 = vmatmul.mubr.msk.f32.gmra.mxu1 %vm533_vm0, %v4877_v37 }
 0x647   : > { %3795 = vmatprep.mubr.msk.f32.mxu1 %vm533_vm0, %v4882_v38 }
 0x64a   : > { %3796 = vmatmul.mubr.msk.f32.gmra.mxu1 %vm533_vm0, %v4887_v39 }
 0x64b   : > { %3798 = vmatprep.mubr.msk.f32.mxu1 %vm533_vm0, %v4892_v40 }
 0x64e   : > { %3799 = vmatmul.mubr.msk.f32.gmra.mxu1 %vm533_vm0, %v4897_v41 }
 0x64f   : > { %3801 = vmatprep.mubr.msk.f32.mxu1 %vm533_vm0, %v4902_v42 }
 0x652   : > { %3802 = vmatmul.mubr.msk.f32.gmra.mxu1 %vm533_vm0, %v4907_v43 }
 0x653   : > { %3804 = vmatprep.mubr.msk.f32.mxu1 %vm533_vm0, %v4912_v44 }
 0x656   : > { %3805 = vmatmul.mubr.msk.f32.gmra.mxu1 %vm533_vm0, %v4917_v45 }
 0x657   : > { %3807 = vmatprep.mubr.msk.f32.mxu1 %vm533_vm0, %v4922_v46 }
 0x65a   : > { %3808 = vmatmul.mubr.msk.f32.gmra.mxu1 %vm533_vm0, %v4927_v47 }
 0x65b   : > { %3850 = vmatprep.mubr.msk.f32.mxu1 %vm533_vm0, %v4852_v32  ;;  %v2080_v32 = vld [vmem:[#allocation2 + $0x2a0] sm:$0xff] }
 0x6fe   : > { %v3788_v55 = vpop.f32.mrf.mxu1 }
 0x6ff   : > { %v2238_v56 = vadd.f32 %v3788_v55, %v2077_v1 }
 0x700   : > { %v2158_v2 = vpop.f32.mrf.mxu1 }
 0x701   : > { %v2237_v51 = vadd.f32 %v2158_v2, %v2076_v57  ;;  %v3366_v6 = vmul.f32 -1.442695, %v2238_v56  ;;  %v2089_v56 = vld [vmem:[#allocation2 + $0x2e8] sm:$0xff] }
 0x702   : > { %v3791_v49 = vpop.f32.mrf.mxu1 }
 0x703   : > { %v2240_v60 = vadd.f32 %v3791_v49, %v2079_v3  ;;  %v3365_v0 = vmul.f32 -1.442695, %v2237_v51  ;;  %4299 = vpow2.f32 %v3366_v6 }
 0x704   : > { %v2168_v59 = vpop.f32.mrf.mxu1 }
 0x705   : > { %v3368_v14 = vmul.f32 -1.442695, %v2240_v60  ;;  %4301 = vpow2.f32 %v3365_v0  ;;  %v2239_v29 = vadd.f32 %v2168_v59, %v2078_v22 }
 0x706   : > { %v3794_v52 = vpop.f32.mrf.mxu1 }
 0x707   : > { %v2242_v7 = vadd.f32 %v3794_v52, %v2081_v50  ;;  %4303 = vpow2.f32 %v3368_v14  ;;  %v3367_v55 = vmul.f32 -1.442695, %v2239_v29 }
 0x708   : > { %v2178_v13 = vpop.f32.mrf.mxu1 }
 0x709   : > { %v3370_v12 = vmul.f32 -1.442695, %v2242_v7  ;;  %v2241_v4 = vadd.f32 %v2178_v13, %v2080_v32  ;;  %v2091_v13 = vld [vmem:[#allocation2 + $0x2f8] sm:$0xff]  ;;  %v2090_v32 = vld [vmem:[#allocation2 + $0x2f0] sm:$0xff] }
 0x70a   : > { %v3797_v17 = vpop.f32.mrf.mxu1 }
 0x70b   : > { %v2244_v18 = vadd.f32 %v3797_v17, %v2083_v54  ;;  %4305 = vpow2.f32 %v3370_v12  ;;  %v3369_v31 = vmul.f32 -1.442695, %v2241_v4 }
 0x70c   : > { %v2188_v21 = vpop.f32.mrf.mxu1 }
 0x70d   : > { %v3372_v24 = vmul.f32 -1.442695, %v2244_v18  ;;  %v2243_v28 = vadd.f32 %v2188_v21, %v2082_v20 }
 0x70e   : > { %v3800_v25 = vpop.f32.mrf.mxu1 }
 0x70f   : > { %v2246_v5 = vadd.f32 %v3800_v25, %v2085_v58  ;;  %4307 = vpow2.f32 %v3372_v24  ;;  %v3371_v10 = vmul.f32 -1.442695, %v2243_v28 }
 0x710   : > { %v2198_v8 = vpop.f32.mrf.mxu1  ;;  %v4300_v49 = vpop.eup %4299 }
 0x711   : > { %v3374_v26 = vmul.f32 -1.442695, %v2246_v5  ;;  %v2245_v62 = vadd.f32 %v2198_v8, %v2084_v27  ;;  %v2302_v6 = vadd.f32 1.0, %v4300_v49  ;;  %v2088_v8 = vld [vmem:[#allocation2 + $0x2e0] sm:$0xff] }
 0x712   : > { %v3803_v48 = vpop.f32.mrf.mxu1  ;;  %v4302_v59 = vpop.eup %4301 }
 0x713   : > { %v3373_v53 = vmul.f32 -1.442695, %v2245_v62  ;;  %v2248_v11 = vadd.f32 %v3803_v48, %v2087_v30  ;;  %4309 = vpow2.f32 %v3374_v26  ;;  %v2301_v0 = vadd.f32 1.0, %v4302_v59 }
 0x714   : > { %v2208_v63 = vpop.f32.mrf.mxu1  ;;  %4311 = vpow2.f32 %v3369_v31  ;;  %v4304_v50 = vpop.eup %4303 }
 0x715   : > { %v3376_v1 = vmul.f32 -1.442695, %v2248_v11  ;;  %v2247_v2 = vadd.f32 %v2208_v63, %v2086_v9  ;;  %4313 = vpow2.f32 %v3373_v53  ;;  %v2304_v54 = vadd.f32 1.0, %v4304_v50 }
 0x716   : > { %v3806_v57 = vpop.f32.mrf.mxu1  ;;  %4315 = vpow2.f32 %v3371_v10 }
 0x717   : > { %v3375_v3 = vmul.f32 -1.442695, %v2247_v2  ;;  %4317 = vpow2.f32 %v3376_v1  ;;  %v2250_v7 = vadd.f32 %v3806_v57, %v2089_v56 }
 0x718   : > { %v2218_v51 = vpop.f32.mrf.mxu1  ;;  %4319 = vpow2.f32 %v3367_v55  ;;  %v4306_v52 = vpop.eup %4305 }
 0x719   : > { %4321 = vpow2.f32 %v3375_v3  ;;  %v2306_v12 = vadd.f32 1.0, %v4306_v52  ;;  %v3378_v18 = vmul.f32 -1.442695, %v2250_v7  ;;  %v2249_v53 = vadd.f32 %v2218_v51, %v2088_v8 }
 0x71a   : > { %v3809_v60 = vpop.f32.mrf.mxu1  ;;  %4323 = vrcp.f32 %v2302_v6 }
 0x71b   : > { %v2252_v20 = vadd.f32 %v3809_v60, %v2091_v13  ;;  %4325 = vrcp.f32 %v2301_v0  ;;  %v3377_v55 = vmul.f32 -1.442695, %v2249_v53 }
 0x71c   : > { %v4308_v14 = vpop.eup %4307  ;;  %v2228_v17 = vpop.f32.mrf.mxu1  ;;  %4327 = vrcp.f32 %v2304_v54 }
 0x71d   : > { %v2308_v58 = vadd.f32 1.0, %v4308_v14  ;;  %v2251_v22 = vadd.f32 %v2228_v17, %v2090_v32  ;;  %4329 = vrcp.f32 %v2306_v12  ;;  %v3380_v27 = vmul.f32 -1.442695, %v2252_v20 }
 0x71e   : > { %4331 = vpow2.f32 %v3378_v18 }
 0x71f   : > { %v3379_v30 = vmul.f32 -1.442695, %v2251_v22 }
 0x720   : > { %v4310_v21 = vpop.eup %4309 }
 0x721   : > { %v4312_v4 = vpop.eup %4311  ;;  %v2310_v24 = vadd.f32 1.0, %v4310_v21 }
 0x722   : > { %v4314_v25 = vpop.eup %4313  ;;  %v2305_v48 = vadd.f32 1.0, %v4312_v4 }
 0x723   : > { %v4316_v28 = vpop.eup %4315  ;;  %4333 = vrcp.f32 %v2310_v24  ;;  %v2309_v5 = vadd.f32 1.0, %v4314_v25 }
 0x724   : > { %v4318_v29 = vpop.eup %4317  ;;  %4335 = vrcp.f32 %v2308_v58  ;;  %v2307_v9 = vadd.f32 1.0, %v4316_v28 }
 0x725   : > { %v4320_v31 = vpop.eup %4319  ;;  %4337 = vrcp.f32 %v2309_v5  ;;  %v2312_v26 = vadd.f32 1.0, %v4318_v29 }
 0x726   : > { %v4322_v62 = vpop.eup %4321  ;;  %4339 = vpow2.f32 %v3380_v27  ;;  %v2303_v11 = vadd.f32 1.0, %v4320_v31 }
 0x727   : > { %4341 = vrcp.f32 %v2312_v26  ;;  %v2311_v10 = vadd.f32 1.0, %v4322_v62  ;;  %v4324_v63 = vpop.eup %4323 }
 0x728   : > { %4343 = vpow2.f32 %v3379_v30  ;;  %v4326_v1 = vpop.eup %4325 }
 0x729   : > { %4345 = vrcp.f32 %v2311_v10  ;;  %v4328_v2 = vpop.eup %4327 }
 0x72a   : > { %4347 = vrcp.f32 %v2305_v48  ;;  %v4330_v57 = vpop.eup %4329 }
 0x72b   : > { %4349 = vrcp.f32 %v2307_v9  ;;  %v4332_v3 = vpop.eup %4331  ;;  %v2358_v58 = vmul.f32 %v4330_v57, %v5219_v23 }
 0x72c   : > { %4351 = vrcp.f32 %v2303_v11  ;;  %v2314_v12 = vadd.f32 1.0, %v4332_v3 }
 0x72d   : > { %4353 = vpow2.f32 %v3377_v55 }
 0x72e   : > { %4355 = vrcp.f32 %v2314_v12 }
 0x730   : > { %v4334_v49 = vpop.eup %4333 }
 0x731   : > { %v4336_v56 = vpop.eup %4335  ;;  %v2350_v59 = vmul.f32 2.0, %v4334_v49  ;;  %v2379_v49 = vld [vmem:[#allocation2 + $0x308] sm:$0xff] }
 0x732   : > { %v4338_v50 = vpop.eup %4337  ;;  %v2360_v24 = vmul.f32 %v4336_v56, %v5222_v19 }
 0x733   : > { %v4340_v60 = vpop.eup %4339  ;;  %v3382_v52 = vadd.f32 -1.0, %v2350_v59  ;;  %v2349_v51 = vmul.f32 2.0, %v4338_v50  ;;  %v2378_v59 = vld [vmem:[#allocation2 + $0x300] sm:$0xff]  ;;  %v2381_v50 = vld [vmem:[#allocation2 + $0x318] sm:$0xff] }
 0x734   : > { %v4342_v6 = vpop.eup %4341  ;;  %v2316_v20 = vadd.f32 1.0, %v4340_v60 }
 0x735   : > { %v4344_v7 = vpop.eup %4343  ;;  %v3381_v0 = vadd.f32 -1.0, %v2349_v51  ;;  %v2352_v13 = vmul.f32 2.0, %v4342_v6  ;;  %v2362_v14 = vmul.f32 %v4324_v63, %v3382_v52 }
 0x736   : > { %v4346_v54 = vpop.eup %4345  ;;  %v2315_v22 = vadd.f32 1.0, %v4344_v7  ;;  %4357 = vrcp.f32 %v2316_v20  ;;  %v2383_v7 = vld [vmem:[#allocation2 + $0x328] sm:$0xff] }
 0x737   : > { %v4348_v32 = vpop.eup %4347  ;;  %v3384_v17 = vadd.f32 -1.0, %v2352_v13  ;;  %v2351_v18 = vmul.f32 2.0, %v4346_v54  ;;  %v2361_v4 = vmul.f32 %v4326_v1, %v3381_v0  ;;  %v5267_v5 = vadd.f32 %v2362_v14, %v2358_v58 }
 0x738   : > { %v4350_v21 = vpop.eup %4349  ;;  %v2357_v29 = vmul.f32 %v4348_v32, %v5225_v15  ;;  %4359 = vrcp.f32 %v2315_v22 }
 0x739   : > { %v2364_v25 = vmul.f32 %v4328_v2, %v3384_v17  ;;  %v3383_v27 = vadd.f32 -1.0, %v2351_v18  ;;  %v4352_v28 = vpop.eup %4351  ;;  %v2359_v30 = vmul.f32 %v4350_v21, %v5228_v16  ;;  %v2385_v17 = vld [vmem:[#allocation2 + $0x338] sm:$0xff]  ;;  %v2382_v21 = vld [vmem:[#allocation2 + $0x320] sm:$0xff] }
 0x73a   : > { %v4354_v26 = vpop.eup %4353  ;;  %v5273_v23 = vadd.f32 %v2361_v4, %v2357_v29  ;;  %v2384_v4 = vld [vmem:[#allocation2 + $0x330] sm:$0xff] }
 0x73b   : > { %v5270_v8 = vadd.f32 %v2364_v25, %v2360_v24  ;;  %v2363_v31 = vmul.f32 %v4352_v28, %v3383_v27  ;;  %v2313_v15 = vadd.f32 1.0, %v4354_v26  ;;  %v4356_v62 = vpop.eup %4355  ;;  %v2387_v25 = vld [vmem:[#allocation2 + $0x348] sm:$0xff]  ;;  %v2380_v27 = vld [vmem:[#allocation2 + $0x310] sm:$0xff] }
 0x73d   : > { %4361 = vtanh.f32 %v5270_v8  ;;  %v5276_v19 = vadd.f32 %v2363_v31, %v2359_v30  ;;  %v2386_v31 = vld [vmem:[#allocation2 + $0x340] sm:$0xff] }
 0x73e   : > { %4363 = vtanh.f32 %v5267_v5 }
 0x73f   : > { %4365 = vtanh.f32 %v5276_v19 }
 0x740   : > { %4367 = vtanh.f32 %v5273_v23 }
 0x741   : > { %4369 = vrcp.f32 %v2313_v15 }
 0x743   : > { %v4358_v16 = vpop.eup %4357 }
 0x745   : > { %v4360_v48 = vpop.eup %4359 }
 0x74a   : > { %v4362_v9 = vpop.eup %4361 }
 0x74b   : > { %v4364_v10 = vpop.eup %4363  ;;  %v2376_v53 = vmul.f32 %v4362_v9, %v4358_v16 }
 0x74c   : > { %v4366_v11 = vpop.eup %4365  ;;  %v2374_v1 = vmul.f32 %v4364_v10, %v4356_v62 }
 0x74d   : > { %3810 = vmatprep.subr.mxu0 %v2376_v53  ;;  %v2375_v63 = vmul.f32 %v4366_v11, %v4360_v48  ;;  %v4368_v55 = vpop.eup %4367  ;;  %v2389_v48 = vld [vmem:[#allocation2 + $0x358] sm:$0xff] }
 0x74e   : > { %3811 = vmatpush3.msra.mxu0 %v2376_v53  ;;  %v4370_v2 = vpop.eup %4369 }
 0x74f   : > { %3812 = vmatprep.subr.mxu0 %v2375_v63  ;;  %v2373_v57 = vmul.f32 %v4370_v2, %v4368_v55 }
 0x750   : > { %3813 = vmatpush3.msra.mxu0 %v2375_v63  ;;  %v2388_v63 = vld [vmem:[#allocation2 + $0x350] sm:$0xff] }
 0x751   : > { %3814 = vmatprep.subr.mxu0 %v2374_v1 }
 0x752   : > { %3815 = vmatpush3.msra.mxu0 %v2374_v1 }
 0x753   : > { %3816 = vmatprep.subr.mxu0 %v2373_v57 }
 0x754   : > { %3817 = vmatpush3.msra.mxu0 %v2373_v57 }
 0x755   : > { %3819 = vmatmul.mubr.msk.f32.vlgmr.msra.gmra.mxu0 %vm533_vm0, %v4857_v33  ;;  %3874 = vmatprep.subr.mxu0 %v4590_v61 }
 0x756   : > { %3821 = vmatprep.mubr.msk.f32.mxu0 %vm533_vm0, %v4862_v34 }
 0x759   : > { %3822 = vmatmul.mubr.msk.f32.gmra.mxu0 %vm533_vm0, %v4867_v35 }
 0x75a   : > { %3824 = vmatprep.mubr.msk.f32.mxu0 %vm533_vm0, %v4872_v36 }
 0x75d   : > { %3825 = vmatmul.mubr.msk.f32.gmra.mxu0 %vm533_vm0, %v4877_v37 }
 0x75e   : > { %3827 = vmatprep.mubr.msk.f32.mxu0 %vm533_vm0, %v4882_v38 }
 0x761   : > { %3828 = vmatmul.mubr.msk.f32.gmra.mxu0 %vm533_vm0, %v4887_v39 }
 0x762   : > { %3830 = vmatprep.mubr.msk.f32.mxu0 %vm533_vm0, %v4892_v40 }
 0x765   : > { %3831 = vmatmul.mubr.msk.f32.gmra.mxu0 %vm533_vm0, %v4897_v41 }
 0x766   : > { %3833 = vmatprep.mubr.msk.f32.mxu0 %vm533_vm0, %v4902_v42 }
 0x769   : > { %3834 = vmatmul.mubr.msk.f32.gmra.mxu0 %vm533_vm0, %v4907_v43 }
 0x76a   : > { %3836 = vmatprep.mubr.msk.f32.mxu0 %vm533_vm0, %v4912_v44 }
 0x76d   : > { %3837 = vmatmul.mubr.msk.f32.gmra.mxu0 %vm533_vm0, %v4917_v45 }
 0x76e   : > { %3839 = vmatprep.mubr.msk.f32.mxu0 %vm533_vm0, %v4922_v46 }
 0x771   : > { %3840 = vmatmul.mubr.msk.f32.gmra.mxu0 %vm533_vm0, %v4927_v47 }
 0x772   : > { %3882 = vmatprep.mubr.msk.f32.mxu0 %vm4591_vm1, %v4590_v61 }
 0x815   : > { %v3820_v3 = vpop.f32.mrf.mxu0 }
 0x816   : > { %v2540_v52 = vadd.f32 %v3820_v3, %v2379_v49 }
 0x817   : > { %v2460_v56 = vpop.f32.mrf.mxu0 }
 0x818   : > { %v2539_v51 = vadd.f32 %v2460_v56, %v2378_v59  ;;  %v3402_v54 = vmul.f32 -1.442695, %v2540_v52  ;;  %v2391_v52 = vld [vmem:[#allocation2 + $0x368] sm:$0xff] }
 0x819   : > { %v3823_v60 = vpop.f32.mrf.mxu0 }
 0x81a   : > { %v2542_v0 = vadd.f32 %v3823_v60, %v2381_v50  ;;  %v3401_v12 = vmul.f32 -1.442695, %v2539_v51  ;;  %4371 = vpow2.f32 %v3402_v54 }
 0x81b   : > { %v2470_v6 = vpop.f32.mrf.mxu0 }
 0x81c   : > { %v3404_v18 = vmul.f32 -1.442695, %v2542_v0  ;;  %4373 = vpow2.f32 %v3401_v12  ;;  %v2541_v62 = vadd.f32 %v2470_v6, %v2380_v27 }
 0x81d   : > { %v3826_v13 = vpop.f32.mrf.mxu0 }
 0x81e   : > { %v2544_v14 = vadd.f32 %v3826_v13, %v2383_v7  ;;  %4375 = vpow2.f32 %v3404_v18  ;;  %v3403_v3 = vmul.f32 -1.442695, %v2541_v62 }
 0x81f   : > { %v2480_v32 = vpop.f32.mrf.mxu0 }
 0x820   : > { %v3406_v20 = vmul.f32 -1.442695, %v2544_v14  ;;  %v2543_v28 = vadd.f32 %v2480_v32, %v2382_v21  ;;  %v2393_v32 = vld [vmem:[#allocation2 + $0x378] sm:$0xff]  ;;  %v2392_v21 = vld [vmem:[#allocation2 + $0x370] sm:$0xff] }
 0x821   : > { %v3829_v58 = vpop.f32.mrf.mxu0 }
 0x822   : > { %v2546_v22 = vadd.f32 %v3829_v58, %v2385_v17  ;;  %4377 = vpow2.f32 %v3406_v20  ;;  %v3405_v9 = vmul.f32 -1.442695, %v2543_v28 }
 0x823   : > { %v2490_v24 = vpop.f32.mrf.mxu0 }
 0x824   : > { %v3408_v29 = vmul.f32 -1.442695, %v2546_v22  ;;  %v2545_v26 = vadd.f32 %v2490_v24, %v2384_v4 }
 0x825   : > { %v3832_v30 = vpop.f32.mrf.mxu0 }
 0x826   : > { %v2548_v15 = vadd.f32 %v3832_v30, %v2387_v25  ;;  %4379 = vpow2.f32 %v3408_v29  ;;  %v3407_v55 = vmul.f32 -1.442695, %v2545_v26 }
 0x827   : > { %v2500_v16 = vpop.f32.mrf.mxu0  ;;  %v4372_v60 = vpop.eup %4371 }
 0x828   : > { %v3410_v10 = vmul.f32 -1.442695, %v2548_v15  ;;  %v2547_v53 = vadd.f32 %v2500_v16, %v2386_v31  ;;  %v2604_v54 = vadd.f32 1.0, %v4372_v60  ;;  %v2390_v16 = vld [vmem:[#allocation2 + $0x360] sm:$0xff] }
 0x829   : > { %v3835_v11 = vpop.f32.mrf.mxu0  ;;  %v4374_v6 = vpop.eup %4373 }
 0x82a   : > { %v3409_v1 = vmul.f32 -1.442695, %v2547_v53  ;;  %v2550_v2 = vadd.f32 %v3835_v11, %v2389_v48  ;;  %4381 = vpow2.f32 %v3410_v10  ;;  %v2603_v12 = vadd.f32 1.0, %v4374_v6 }
 0x82b   : > { %v2510_v57 = vpop.f32.mrf.mxu0  ;;  %4383 = vpow2.f32 %v3405_v9  ;;  %v4376_v7 = vpop.eup %4375 }
 0x82c   : > { %v3412_v49 = vmul.f32 -1.442695, %v2550_v2  ;;  %v2549_v56 = vadd.f32 %v2510_v57, %v2388_v63  ;;  %4385 = vpow2.f32 %v3409_v1  ;;  %v2606_v17 = vadd.f32 1.0, %v4376_v7 }
 0x82d   : > { %v3838_v59 = vpop.f32.mrf.mxu0  ;;  %4387 = vpow2.f32 %v3407_v55 }
 0x82e   : > { %v3411_v50 = vmul.f32 -1.442695, %v2549_v56  ;;  %4389 = vpow2.f32 %v3412_v49  ;;  %v2552_v14 = vadd.f32 %v3838_v59, %v2391_v52 }
 0x82f   : > { %v2520_v51 = vpop.f32.mrf.mxu0  ;;  %4391 = vpow2.f32 %v3403_v3  ;;  %v4378_v13 = vpop.eup %4377 }
 0x830   : > { %4393 = vpow2.f32 %v3411_v50  ;;  %v2608_v20 = vadd.f32 1.0, %v4378_v13  ;;  %v3414_v22 = vmul.f32 -1.442695, %v2552_v14  ;;  %v2551_v1 = vadd.f32 %v2520_v51, %v2390_v16 }
 0x831   : > { %v3841_v0 = vpop.f32.mrf.mxu0  ;;  %4395 = vrcp.f32 %v2604_v54 }
 0x832   : > { %v2554_v4 = vadd.f32 %v3841_v0, %v2393_v32  ;;  %4397 = vrcp.f32 %v2603_v12  ;;  %v3413_v3 = vmul.f32 -1.442695, %v2551_v1 }
 0x833   : > { %v4380_v18 = vpop.eup %4379  ;;  %v2530_v58 = vpop.f32.mrf.mxu0  ;;  %4399 = vrcp.f32 %v2606_v17 }
 0x834   : > { %v2610_v25 = vadd.f32 1.0, %v4380_v18  ;;  %v2553_v27 = vadd.f32 %v2530_v58, %v2392_v21  ;;  %4401 = vrcp.f32 %v2608_v20  ;;  %v3416_v31 = vmul.f32 -1.442695, %v2554_v4 }
 0x835   : > { %4403 = vpow2.f32 %v3414_v22 }
 0x836   : > { %v3415_v48 = vmul.f32 -1.442695, %v2553_v27 }
 0x837   : > { %v4382_v24 = vpop.eup %4381 }
 0x838   : > { %v4384_v28 = vpop.eup %4383  ;;  %v2612_v29 = vadd.f32 1.0, %v4382_v24 }
 0x839   : > { %v4386_v30 = vpop.eup %4385  ;;  %v2607_v11 = vadd.f32 1.0, %v4384_v28 }
 0x83a   : > { %v4388_v26 = vpop.eup %4387  ;;  %4405 = vrcp.f32 %v2612_v29  ;;  %v2611_v15 = vadd.f32 1.0, %v4386_v30 }
 0x83b   : > { %v4390_v62 = vpop.eup %4389  ;;  %4407 = vrcp.f32 %v2610_v25  ;;  %v2609_v63 = vadd.f32 1.0, %v4388_v26 }
 0x83c   : > { %v4392_v9 = vpop.eup %4391  ;;  %4409 = vrcp.f32 %v2611_v15  ;;  %v2614_v10 = vadd.f32 1.0, %v4390_v62 }
 0x83d   : > { %v4394_v53 = vpop.eup %4393  ;;  %4411 = vpow2.f32 %v3416_v31  ;;  %v2605_v2 = vadd.f32 1.0, %v4392_v9 }
 0x83e   : > { %4413 = vrcp.f32 %v2614_v10  ;;  %v2613_v55 = vadd.f32 1.0, %v4394_v53  ;;  %v4396_v57 = vpop.eup %4395 }
 0x83f   : > { %4415 = vpow2.f32 %v3415_v48  ;;  %v4398_v49 = vpop.eup %4397 }
 0x840   : > { %4417 = vrcp.f32 %v2613_v55  ;;  %v4400_v56 = vpop.eup %4399 }
 0x841   : > { %4419 = vrcp.f32 %v2607_v11  ;;  %v4402_v59 = vpop.eup %4401 }
 0x842   : > { %4421 = vrcp.f32 %v2609_v63  ;;  %v4404_v50 = vpop.eup %4403  ;;  %v2660_v25 = vmul.f32 %v4402_v59, %v5267_v5 }
 0x843   : > { %4423 = vrcp.f32 %v2605_v2  ;;  %v2616_v20 = vadd.f32 1.0, %v4404_v50 }
 0x844   : > { %4425 = vpow2.f32 %v3413_v3 }
 0x845   : > { %4427 = vrcp.f32 %v2616_v20 }
 0x847   : > { %v4406_v60 = vpop.eup %4405 }
 0x848   : > { %v4408_v52 = vpop.eup %4407  ;;  %v2652_v6 = vmul.f32 2.0, %v4406_v60 }
 0x849   : > { %v4410_v7 = vpop.eup %4409  ;;  %v2662_v29 = vmul.f32 %v4408_v52, %v5270_v8 }
 0x84a   : > { %v4412_v0 = vpop.eup %4411  ;;  %v3418_v13 = vadd.f32 -1.0, %v2652_v6  ;;  %v2651_v51 = vmul.f32 2.0, %v4410_v7  ;;  %v2687_v6 = vld [vmem:[#allocation2 + $0x3b8] sm:$0xff] }
 0x84b   : > { %v4414_v54 = vpop.eup %4413  ;;  %v2618_v4 = vadd.f32 1.0, %v4412_v0 }
 0x84c   : > { %v4416_v14 = vpop.eup %4415  ;;  %v3417_v12 = vadd.f32 -1.0, %v2651_v51  ;;  %v2654_v32 = vmul.f32 2.0, %v4414_v54  ;;  %v2664_v18 = vmul.f32 %v4396_v57, %v3418_v13  ;;  %v2684_v13 = vld [vmem:[#allocation2 + $0x3a0] sm:$0xff] }
 0x84d   : > { %v4418_v17 = vpop.eup %4417  ;;  %v2617_v27 = vadd.f32 1.0, %v4416_v14  ;;  %4429 = vrcp.f32 %v2618_v4  ;;  %v2686_v14 = vld [vmem:[#allocation2 + $0x3b0] sm:$0xff] }
 0x84e   : > { %v4420_v21 = vpop.eup %4419  ;;  %v3420_v58 = vadd.f32 -1.0, %v2654_v32  ;;  %v2653_v22 = vmul.f32 2.0, %v4418_v17  ;;  %v2663_v28 = vmul.f32 %v4398_v49, %v3417_v12  ;;  %v5314_v15 = vadd.f32 %v2664_v18, %v2660_v25  ;;  %v2689_v32 = vld [vmem:[#allocation2 + $0x3c8] sm:$0xff]  ;;  %v2682_v17 = vld [vmem:[#allocation2 + $0x390] sm:$0xff] }
 0x84f   : > { %v4422_v24 = vpop.eup %4421  ;;  %v2659_v62 = vmul.f32 %v4420_v21, %v5273_v23  ;;  %4431 = vrcp.f32 %v2617_v27  ;;  %v2691_v27 = vld [vmem:[#allocation2 + $0x3d8] sm:$0xff] }
 0x850   : > { %v2666_v30 = vmul.f32 %v4400_v56, %v3420_v58  ;;  %v3419_v31 = vadd.f32 -1.0, %v2653_v22  ;;  %v4424_v26 = vpop.eup %4423  ;;  %v2661_v48 = vmul.f32 %v4422_v24, %v5276_v19  ;;  %v2688_v58 = vld [vmem:[#allocation2 + $0x3c0] sm:$0xff] }
 0x851   : > { %v4426_v10 = vpop.eup %4425  ;;  %v5320_v5 = vadd.f32 %v2663_v28, %v2659_v62 }
 0x852   : > { %v5317_v16 = vadd.f32 %v2666_v30, %v2662_v29  ;;  %v2665_v9 = vmul.f32 %v4424_v26, %v3419_v31  ;;  %v2615_v23 = vadd.f32 1.0, %v4426_v10  ;;  %v4428_v53 = vpop.eup %4427  ;;  %v2690_v26 = vld [vmem:[#allocation2 + $0x3d0] sm:$0xff] }
 0x854   : > { %4433 = vtanh.f32 %v5317_v16  ;;  %v5323_v8 = vadd.f32 %v2665_v9, %v2661_v48 }
 0x855   : > { %4435 = vtanh.f32 %v5314_v15 }
 0x856   : > { %4437 = vtanh.f32 %v5323_v8 }
 0x857   : > { %4439 = vtanh.f32 %v5320_v5 }
 0x858   : > { %4441 = vrcp.f32 %v2615_v23 }
 0x85a   : > { %v4430_v19 = vpop.eup %4429 }
 0x85c   : > { %v4432_v11 = vpop.eup %4431 }
 0x861   : > { %v4434_v63 = vpop.eup %4433 }
 0x862   : > { %v4436_v55 = vpop.eup %4435  ;;  %v2678_v1 = vmul.f32 %v4434_v63, %v4430_v19 }
 0x863   : > { %v4438_v2 = vpop.eup %4437  ;;  %v2676_v49 = vmul.f32 %v4436_v55, %v4428_v53 }
 0x864   : > { %3842 = vmatprep.subr.mxu1 %v2678_v1  ;;  %v2677_v57 = vmul.f32 %v4438_v2, %v4432_v11  ;;  %v4440_v3 = vpop.eup %4439 }
 0x865   : > { %3843 = vmatpush3.msra.mxu1 %v2678_v1  ;;  %v4442_v56 = vpop.eup %4441  ;;  %v2693_v1 = vld [vmem:[#allocation2 + $0x3e8] sm:$0xff] }
 0x866   : > { %3844 = vmatprep.subr.mxu1 %v2677_v57  ;;  %v2675_v59 = vmul.f32 %v4442_v56, %v4440_v3 }
 0x867   : > { %3845 = vmatpush3.msra.mxu1 %v2677_v57 }
 0x868   : > { %3846 = vmatprep.subr.mxu1 %v2676_v49 }
 0x869   : > { %3847 = vmatpush3.msra.mxu1 %v2676_v49 }
 0x86a   : > { %3848 = vmatprep.subr.mxu1 %v2675_v59 }
 0x86b   : > { %3849 = vmatpush3.msra.mxu1 %v2675_v59 }
 0x86c   : > { %3851 = vmatmul.mubr.msk.f32.vlgmr.msra.gmra.mxu1 %vm533_vm0, %v4857_v33  ;;  %v2982_v33 = vld [vmem:[%s5417_s5] sm:$0xff] }
 0x86d   : > { %3853 = vmatprep.mubr.msk.f32.mxu1 %vm533_vm0, %v4862_v34  ;;  %v4592_v34 = vmov 0  }
 0x86e   : > { %3938 = vset.pattern.permute.xlu0 %v4592_v34 }
 0x86f   : > { %2985 = vperm.xlu0 %3938, %v2982_v33  }
 0x870   : > { %3854 = vmatmul.mubr.msk.f32.gmra.mxu1 %vm533_vm0, %v4867_v35 }
 0x871   : > { %3856 = vmatprep.mubr.msk.f32.mxu1 %vm533_vm0, %v4872_v36  ;;  %v2681_v36 = vld [vmem:[#allocation2 + $0x388] sm:$0xff] }
 0x874   : > { %3857 = vmatmul.mubr.msk.f32.gmra.mxu1 %vm533_vm0, %v4877_v37 }
 0x875   : > { %3859 = vmatprep.mubr.msk.f32.mxu1 %vm533_vm0, %v4882_v38  ;;  %v2680_v38 = vld [vmem:[#allocation2 + $0x380] sm:$0xff] }
 0x878   : > { %3860 = vmatmul.mubr.msk.f32.gmra.mxu1 %vm533_vm0, %v4887_v39  ;;  %v2683_v39 = vld [vmem:[#allocation2 + $0x398] sm:$0xff] }
 0x879   : > { %3862 = vmatprep.mubr.msk.f32.mxu1 %vm533_vm0, %v4892_v40 }
 0x87c   : > { %3863 = vmatmul.mubr.msk.f32.gmra.mxu1 %vm533_vm0, %v4897_v41 }
 0x87d   : > { %3865 = vmatprep.mubr.msk.f32.mxu1 %vm533_vm0, %v4902_v42 }
 0x880   : > { %3866 = vmatmul.mubr.msk.f32.gmra.mxu1 %vm533_vm0, %v4907_v43 }
 0x881   : > { %3868 = vmatprep.mubr.msk.f32.mxu1 %vm533_vm0, %v4912_v44  ;;  %v2685_v44 = vld [vmem:[#allocation2 + $0x3a8] sm:$0xff] }
 0x884   : > { %3869 = vmatmul.mubr.msk.f32.gmra.mxu1 %vm533_vm0, %v4917_v45 }
 0x885   : > { %3871 = vmatprep.mubr.msk.f32.mxu1 %vm533_vm0, %v4922_v46 }
 0x888   : > { %3872 = vmatmul.mubr.msk.f32.gmra.mxu1 %vm533_vm0, %v4927_v47 }
 0x92c   : > { %v3852_v35 = vpop.f32.mrf.mxu1 }
 0x92d   : > { %v2842_v41 = vadd.f32 %v3852_v35, %v2681_v36  ;;  %v2695_v35 = vld [vmem:[#allocation2 + $0x3f8] sm:$0xff] }
 0x92e   : > { %v2762_v37 = vpop.f32.mrf.mxu1 }
 0x92f   : > { %v2841_v42 = vadd.f32 %v2762_v37, %v2680_v38  ;;  %v3438_v47 = vmul.f32 -1.442695, %v2842_v41 }
 0x930   : > { %v3855_v40 = vpop.f32.mrf.mxu1 }
 0x931   : > { %v2844_v45 = vadd.f32 %v3855_v40, %v2683_v39  ;;  %v3437_v60 = vmul.f32 -1.442695, %v2841_v42  ;;  %4443 = vpow2.f32 %v3438_v47  ;;  %v2694_v39 = vld [vmem:[#allocation2 + $0x3f0] sm:$0xff] }
 0x932   : > { %v2772_v43 = vpop.f32.mrf.mxu1 }
 0x933   : > { %v3440_v7 = vmul.f32 -1.442695, %v2844_v45  ;;  %4445 = vpow2.f32 %v3437_v60  ;;  %v2843_v24 = vadd.f32 %v2772_v43, %v2682_v17 }
 0x934   : > { %v3858_v46 = vpop.f32.mrf.mxu1 }
 0x935   : > { %v2846_v50 = vadd.f32 %v3858_v46, %v2685_v44  ;;  %4447 = vpow2.f32 %v3440_v7  ;;  %v3439_v23 = vmul.f32 -1.442695, %v2843_v24 }
 0x936   : > { %v2782_v52 = vpop.f32.mrf.mxu1 }
 0x937   : > { %v3442_v0 = vmul.f32 -1.442695, %v2846_v50  ;;  %v2845_v18 = vadd.f32 %v2782_v52, %v2684_v13 }
 0x938   : > { %v3861_v51 = vpop.f32.mrf.mxu1 }
 0x939   : > { %v2848_v54 = vadd.f32 %v3861_v51, %v2687_v6  ;;  %4449 = vpow2.f32 %v3442_v0  ;;  %v3441_v28 = vmul.f32 -1.442695, %v2845_v18  ;;  %v2692_v0 = vld [vmem:[#allocation2 + $0x3e0] sm:$0xff] }
 0x93a   : > { %v2792_v12 = vpop.f32.mrf.mxu1 }
 0x93b   : > { %v3444_v20 = vmul.f32 -1.442695, %v2848_v54  ;;  %v2847_v22 = vadd.f32 %v2792_v12, %v2686_v14 }
 0x93c   : > { %v3864_v21 = vpop.f32.mrf.mxu1 }
 0x93d   : > { %v2850_v4 = vadd.f32 %v3864_v21, %v2689_v32  ;;  %4451 = vpow2.f32 %v3444_v20  ;;  %v3443_v62 = vmul.f32 -1.442695, %v2847_v22 }
 0x93e   : > { %v2802_v25 = vpop.f32.mrf.mxu1  ;;  %v4444_v55 = vpop.eup %4443 }
 0x93f   : > { %v3446_v29 = vmul.f32 -1.442695, %v2850_v4  ;;  %v2849_v30 = vadd.f32 %v2802_v25, %v2688_v58  ;;  %v2906_v59 = vadd.f32 1.0, %v4444_v55 }
 0x940   : > { %v3867_v31 = vpop.f32.mrf.mxu1  ;;  %v4446_v57 = vpop.eup %4445 }
 0x941   : > { %v3445_v48 = vmul.f32 -1.442695, %v2849_v30  ;;  %v2852_v9 = vadd.f32 %v3867_v31, %v2691_v27  ;;  %4453 = vpow2.f32 %v3446_v29  ;;  %v2905_v34 = vadd.f32 1.0, %v4446_v57 }
 0x942   : > { %v2812_v10 = vpop.f32.mrf.mxu1  ;;  %4455 = vpow2.f32 %v3441_v28  ;;  %v4448_v3 = vpop.eup %4447 }
 0x943   : > { %v3448_v53 = vmul.f32 -1.442695, %v2852_v9  ;;  %v2851_v19 = vadd.f32 %v2812_v10, %v2690_v26  ;;  %4457 = vpow2.f32 %v3445_v48  ;;  %v2908_v36 = vadd.f32 1.0, %v4448_v3 }
 0x944   : > { %v3870_v11 = vpop.f32.mrf.mxu1  ;;  %4459 = vpow2.f32 %v3443_v62 }
 0x945   : > { %v3447_v63 = vmul.f32 -1.442695, %v2851_v19  ;;  %4461 = vpow2.f32 %v3448_v53  ;;  %v2854_v33 = vadd.f32 %v3870_v11, %v2693_v1 }
 0x946   : > { %v2822_v2 = vpop.f32.mrf.mxu1  ;;  %4463 = vpow2.f32 %v3439_v23  ;;  %v4450_v56 = vpop.eup %4449 }
 0x947   : > { %4465 = vpow2.f32 %v3447_v63  ;;  %v2910_v38 = vadd.f32 1.0, %v4450_v56  ;;  %v3450_v41 = vmul.f32 -1.442695, %v2854_v33  ;;  %v2853_v18 = vadd.f32 %v2822_v2, %v2692_v0  ;;  %v2981_v0 = vld [vmem:[%s5416_s4] sm:$0xff] }
 0x948   : > { %v3873_v49 = vpop.f32.mrf.mxu1  ;;  %4467 = vrcp.f32 %v2906_v59 }
 0x949   : > { %v2856_v42 = vadd.f32 %v3873_v49, %v2695_v35  ;;  %4469 = vrcp.f32 %v2905_v34  ;;  %v3449_v58 = vmul.f32 -1.442695, %v2853_v18 }
 0x94a   : > { %v4452_v37 = vpop.eup %4451  ;;  %v2832_v40 = vpop.f32.mrf.mxu1  ;;  %4471 = vrcp.f32 %v2908_v36 }
 0x94b   : > { %v2912_v44 = vadd.f32 1.0, %v4452_v37  ;;  %v2855_v45 = vadd.f32 %v2832_v40, %v2694_v39  ;;  %4473 = vrcp.f32 %v2910_v38  ;;  %v3452_v60 = vmul.f32 -1.442695, %v2856_v42 }
 0x94c   : > { %4475 = vpow2.f32 %v3450_v41 }
 0x94d   : > { %v3451_v13 = vmul.f32 -1.442695, %v2855_v45 }
 0x94e   : > { %v4454_v43 = vpop.eup %4453 }
 0x94f   : > { %v4456_v46 = vpop.eup %4455  ;;  %v2914_v47 = vadd.f32 1.0, %v4454_v43 }
 0x950   : > { %v4458_v50 = vpop.eup %4457  ;;  %v2909_v12 = vadd.f32 1.0, %v4456_v46 }
 0x951   : > { %v4460_v52 = vpop.eup %4459  ;;  %4477 = vrcp.f32 %v2914_v47  ;;  %v2913_v6 = vadd.f32 1.0, %v4458_v50 }
 0x952   : > { %v4462_v7 = vpop.eup %4461  ;;  %4479 = vrcp.f32 %v2912_v44  ;;  %v2911_v32 = vadd.f32 1.0, %v4460_v52 }
 0x953   : > { %v4464_v51 = vpop.eup %4463  ;;  %4481 = vrcp.f32 %v2913_v6  ;;  %v2916_v54 = vadd.f32 1.0, %v4462_v7 }
 0x954   : > { %v4466_v14 = vpop.eup %4465  ;;  %4483 = vpow2.f32 %v3452_v60  ;;  %v2907_v20 = vadd.f32 1.0, %v4464_v51 }
 0x955   : > { %4485 = vrcp.f32 %v2916_v54  ;;  %v2915_v17 = vadd.f32 1.0, %v4466_v14  ;;  %v4468_v21 = vpop.eup %4467 }
 0x956   : > { %4487 = vpow2.f32 %v3451_v13  ;;  %v4470_v22 = vpop.eup %4469  ;;  %v2986_v13 = vpop.permute.xlu0 %2985 }
 0x957   : > { %4489 = vrcp.f32 %v2915_v17  ;;  %v4472_v4 = vpop.eup %4471 }
 0x958   : > { %4491 = vrcp.f32 %v2909_v12  ;;  %v4474_v24 = vpop.eup %4473 }
 0x959   : > { %4493 = vrcp.f32 %v2911_v32  ;;  %v4476_v25 = vpop.eup %4475  ;;  %v2962_v3 = vmul.f32 %v4474_v24, %v5314_v15 }
 0x95a   : > { %4495 = vrcp.f32 %v2907_v20  ;;  %v2918_v11 = vadd.f32 1.0, %v4476_v25 }
 0x95b   : > { %4497 = vpow2.f32 %v3449_v58 }
 0x95c   : > { %4499 = vrcp.f32 %v2918_v11 }
 0x95e   : > { %v4478_v27 = vpop.eup %4477 }
 0x95f   : > { %v4480_v28 = vpop.eup %4479  ;;  %v2954_v29 = vmul.f32 2.0, %v4478_v27 }
 0x960   : > { %v4482_v30 = vpop.eup %4481  ;;  %v2964_v59 = vmul.f32 %v4480_v28, %v5317_v16 }
 0x961   : > { %v4484_v31 = vpop.eup %4483  ;;  %v3454_v26 = vadd.f32 -1.0, %v2954_v29  ;;  %v2953_v62 = vmul.f32 2.0, %v4482_v30 }
 0x962   : > { %v4486_v48 = vpop.eup %4485  ;;  %v2920_v2 = vadd.f32 1.0, %v4484_v31 }
 0x963   : > { %v4488_v9 = vpop.eup %4487  ;;  %v3453_v10 = vadd.f32 -1.0, %v2953_v62  ;;  %v2956_v23 = vmul.f32 2.0, %v4486_v48  ;;  %v2966_v19 = vmul.f32 %v4468_v21, %v3454_v26 }
 0x964   : > { %v4490_v53 = vpop.eup %4489  ;;  %v2919_v49 = vadd.f32 1.0, %v4488_v9  ;;  %4501 = vrcp.f32 %v2920_v2 }
 0x965   : > { %v4492_v63 = vpop.eup %4491  ;;  %v3456_v55 = vadd.f32 -1.0, %v2956_v23  ;;  %v2955_v1 = vmul.f32 2.0, %v4490_v53  ;;  %v2965_v56 = vmul.f32 %v4470_v22, %v3453_v10  ;;  %v2970_v36 = vadd.f32 %v2966_v19, %v2962_v3 }
 0x966   : > { %v4494_v57 = vpop.eup %4493  ;;  %v2961_v37 = vmul.f32 %v4492_v63, %v5320_v5  ;;  %4503 = vrcp.f32 %v2919_v49 }
 0x967   : > { %v2968_v33 = vmul.f32 %v4472_v4, %v3456_v55  ;;  %v3455_v34 = vadd.f32 -1.0, %v2955_v1  ;;  %v4496_v35 = vpop.eup %4495  ;;  %v2963_v39 = vmul.f32 %v4494_v57, %v5323_v8 }
 0x968   : > { %v4498_v41 = vpop.eup %4497  ;;  %v2969_v42 = vadd.f32 %v2965_v56, %v2961_v37 }
 0x969   : > { %v2972_v38 = vadd.f32 %v2968_v33, %v2964_v59  ;;  %v2967_v40 = vmul.f32 %v4496_v35, %v3455_v34  ;;  %v2917_v16 = vadd.f32 1.0, %v4498_v41  ;;  %v4500_v43 = vpop.eup %4499 }
 0x96b   : > { %4505 = vtanh.f32 %v2972_v38  ;;  %v2971_v15 = vadd.f32 %v2967_v40, %v2963_v39 }
 0x96c   : > { %4507 = vtanh.f32 %v2970_v36 }
 0x96d   : > { %4509 = vtanh.f32 %v2971_v15 }
 0x96e   : > { %4511 = vtanh.f32 %v2969_v42 }
 0x96f   : > { %4513 = vrcp.f32 %v2917_v16 }
 0x971   : > { %v4502_v44 = vpop.eup %4501 }
 0x973   : > { %v4504_v45 = vpop.eup %4503 }
 0x978   : > { %v4506_v5 = vpop.eup %4505 }
 0x979   : > { %v4508_v46 = vpop.eup %4507  ;;  %v2980_v47 = vmul.f32 %v4506_v5, %v4502_v44 }
 0x97a   : > { %v4510_v50 = vpop.eup %4509  ;;  %v2978_v52 = vmul.f32 %v4508_v46, %v4500_v43 }
 0x97b   : > { %3875 = vmatpush3.msra.mxu0 %v2980_v47  ;;  %v2979_v8 = vmul.f32 %v4510_v50, %v4504_v45  ;;  %v4512_v60 = vpop.eup %4511 }
 0x97c   : > { %3876 = vmatprep.subr.mxu0 %v4590_v61  ;;  %v4514_v6 = vpop.eup %4513 }
 0x97d   : > { %3877 = vmatpush3.msra.mxu0 %v2979_v8  ;;  %v2977_v7 = vmul.f32 %v4514_v6, %v4512_v60 }
 0x97e   : > { %3878 = vmatprep.subr.mxu0 %v4590_v61 }
 0x97f   : > { %3879 = vmatpush3.msra.mxu0 %v2978_v52 }
 0x980   : > { %3880 = vmatprep.subr.mxu0 %v4590_v61 }
 0x981   : > { %3881 = vmatpush3.msra.mxu0 %v2977_v7 }
 0x982   : > { %3883 = vmatmul.mubr.msk.f32.vlgmr.msra.gmra.mxu0 %vm533_vm0, %v2981_v0 }
 0xa42   : > { %v3057_v51 = vpop.f32.mrf.mxu0 }
 0xa43   : > { %v3058_v54 = vadd.f32 %v3057_v51, %v2986_v13 }
 0xa44   : > { %v3884_v14 = vpop.f32.mrf.mxu0 }
 0xa45   : > { %v3061_v12 = vrot.slane %v3058_v54, 4 }
 0xa47   : > { %v3062_v32 = vmax.f32 %v3058_v54, %v3061_v12 }
 0xa49   : > { %v3063_v17 = vrot.slane %v3062_v32, 2 }
 0xa4b   : > { %v3064_v18 = vmax.f32 %v3062_v32, %v3063_v17 }
 0xa4d   : > { %v3065_v20 = vrot.slane %v3064_v18, 1 }
 0xa4f   : > { %v3066_v21 = vmax.f32 %v3064_v18, %v3065_v20 }
 0xa51   : > { %v3067_v58 = vsub.f32 %v3058_v54, %v3066_v21 }
 0xa53   : > { %v3068_v22 = vmul.f32 1.442695, %v3067_v58 }
 0xa55   : > { %4515 = vpow2.f32 %v3068_v22 }
 0xa62   : > { %v4516_v61 = vpop.eup %4515 }
 0xa63   : > { %v3070_v4 = vrot.slane %v4516_v61, 4 }
 0xa65   : > { %v3071_v24 = vadd.f32 %v4516_v61, %v3070_v4 }
 0xa67   : > { %v3072_v25 = vrot.slane %v3071_v24, 2 }
 0xa69   : > { %v3073_v27 = vadd.f32 %v3072_v25, %v3071_v24 }
 0xa6b   : > { %v3074_v28 = vrot.slane %v3073_v27, 1 }
 0xa6d   : > { %v3075_v29 = vadd.f32 %v3074_v28, %v3073_v27 }
 0xa6f   : > { %4517 = vlog2.f32 %v3075_v29 }
 0xa7c   : > { %v4518_v30 = vpop.eup %4517 }
 0xa7d   : > { %v3077_v31 = vmul.f32 0.6931472, %v4518_v30 }
 0xa7f   : > { %v3078_v26 = vsub.f32 %v3067_v58, %v3077_v31 }
 0xa81   : > { %3079 = vst [vmem:[%s242_s15] sm:$0xff] %v3078_v26 }
 0xa82   : > { %4532 = shalt.err (!%p4529_p4)
}
 0xa83   : > { %s4533_s20 = scalar_lea.hbm %s3092_s13, 128  ;;  %s4537_s15 = scalar_lea.hbm %s5418_s6, 256 }
 0xa84   : > { %p4534_p7 = scmp.ne.s32.totalorder %s3092_s13, %s4533_s20  ;;  %p4538_p10 = scmp.lt.s32.totalorder %s3092_s13, %s5418_s6 }
 0xa85   : > { %p4539_p11 = scmp.lt.s32.totalorder %s4537_s15, %s4533_s20 }
 0xa86   : > { %p4535_p8 = pnand %p4534_p7, %p4667_p5 }
 0xa87   : > { %p4540_p12 = por %p4539_p11, %p4538_p10 }
 0xa88   : > { %p4536_p9 = pneg %p4535_p8 }
 0xa8a   : > { %p4541_p13 = pnand %p4540_p12, %p4536_p9 }
 0xa8c   : > { %4544 = shalt.err (!%p4541_p13)
}
 0xa8d   : > { %3885 = dma.vmem_to_hbm [thread:$0]  (%p4667_p5), %s3095_s29, 128, %s3092_s13, %s3081_s14  }
 0xa8e PF: > { %p3891_p0 = scmp.ge.s32.totalorder %s4583_s24, 2  ;;  %s3106_s17 = sand.u32 1, %s4571_s21  }
 0xa8f   : > { %s3107_s10 = scalar_lea.sflag [#allocation4], %s3106_s17 }
 0xa90   : > { %p3888_p1 = pnand %p3891_p0, %p4671_p6 }
 0xa92   : > { %p3889_p2 = pneg %p3888_p1 }
 0xa94   : > { %4566 = dma.done.wait (%p3889_p2), %s3107_s10, 128  }
 0xa95   : > { %4568 = vsyncadd (%p3889_p2), %s3107_s10, 4294967168  ;;  %p16_p3 = scmp.ge.s32.totalorder %s4654_s27, 4   ;;  %s5447_s21 = smov %s4575_s22 }
 0xa96   : > { %s5448_s22 = smov %s4579_s23  ;;  %s5449_s23 = smov %s4665_s30 }
 0xa97   : > { %s5450_s24 = smov %s4654_s27  ;;  %18 = sbr.rel (!%p16_p3) target bundleno = 3 (0x3), region = 106 }
 0xa9c   :  { %3112 = vsyncpa [#allocation4], 1 }
 0xa9d   :  { %3114 = vsyncpa [#allocation4 + $0x1], 1 }

</bundles_post_ra>
